<compile_context>
chip_gen: v7x
topology: tpu7x:2x2x1
jax: 0.10.0
libtpu: 0.0.40
codegen_flags: <defaults>
</compile_context>

<pallas_src>
import functools

import jax
import jax.numpy as jnp
from jax.experimental import pallas as pl
from jax.experimental.pallas import tpu as pltpu


def _round_up(x, m):
    return ((x + m - 1) // m) * m


def _lstm_recurrent_kernel(gx_ref, whh_ref, bias_ref, mem_ref, cn_ref,
                           h_scratch, c_scratch,
                           *, t_chunk, hp, seq_len):
    """One grid step == t_chunk LSTM time steps (PyTorch gate order i, f, g, o).

    gx_ref  : (t_chunk, b_tile, 4*hp) compute dtype  (precomputed x_t @ W_ih^T, no bias)
    whh_ref : (hp, 4*hp)              compute dtype  (resident recurrent weight)
    bias_ref: (1, 4*hp)               f32            (resident b_ih + b_hh)
    mem_ref : (t_chunk, b_tile, hp)   mem dtype      (memory_bank chunk)
    cn_ref  : (b_tile, hp)            f32            (final cell state, written once)
    h_scratch: (b_tile, hp) compute dtype carry; c_scratch: (b_tile, hp) f32 carry.
    """
    chunk = pl.program_id(1)

    @pl.when(chunk == 0)
    def _():
        # encoder_state=None -> zero initial hidden / cell state (per batch tile)
        h_scratch[...] = jnp.zeros_like(h_scratch)
        c_scratch[...] = jnp.zeros_like(c_scratch)

    def step(t, carry):
        h_prev = h_scratch[...]                    # (b_tile, hp) compute dtype
        c_prev = c_scratch[...]                    # (b_tile, hp) f32
        gx_t = gx_ref[t]                           # (b_tile, 4*hp) compute dtype

        # Per-gate pre-activation: hp-wide column chunk of the recurrent matmul plus the
        # streamed input projection and the resident bias (f32 accumulation).
        def pre(g):
            rec = jnp.dot(h_prev, whh_ref[:, g * hp:(g + 1) * hp],
                          preferred_element_type=jnp.float32)
            return (gx_t[:, g * hp:(g + 1) * hp].astype(jnp.float32)
                    + bias_ref[:, g * hp:(g + 1) * hp]
                    + rec)

        i_g = jax.nn.sigmoid(pre(0))
        f_g = jax.nn.sigmoid(pre(1))
        g_g = jnp.tanh(pre(2))
        o_g = jax.nn.sigmoid(pre(3))

        c_new = f_g * c_prev + i_g * g_g           # f32
        h_new = o_g * jnp.tanh(c_new)              # f32

        h_scratch[...] = h_new.astype(h_scratch.dtype)
        c_scratch[...] = c_new
        mem_ref[t] = h_new.astype(mem_ref.dtype)

        # Write the final cell state exactly once (real last time step, not padding).
        @pl.when(chunk * t_chunk + t == seq_len - 1)
        def _():
            cn_ref[...] = c_new

        return carry

    jax.lax.fori_loop(0, t_chunk, step, 0, unroll=True)


def std_rnn_encoder(src, emb_table, w_ih, w_hh, b_ih, b_hh,
                    *, compute_dtype=jnp.float32, mem_dtype=None,
                    t_chunk=16, b_tile_cap=256, prefer_two_batch_tiles=True,
                    vmem_budget_bytes=48 << 20):
    """
    src:       [seq, batch] int32 token ids
    emb_table: [vocab, emb_dim]
    w_ih:      [4H, emb_dim]   (PyTorch LSTM weight_ih_l0)
    w_hh:      [4H, H]         (PyTorch LSTM weight_hh_l0)
    b_ih,b_hh: [4H]
    compute_dtype: dtype for MXU inputs and streamed gates/h-carry (bf16 recommended);
                   accumulation and the c carry stay f32.
    mem_dtype: dtype of memory_bank (defaults to compute_dtype).
    Returns ((h_n, c_n), memory_bank).
    """
    if mem_dtype is None:
        mem_dtype = compute_dtype

    seq_len, batch = src.shape
    emb_dim = emb_table.shape[1]
    four_h = w_ih.shape[0]
    H = four_h // 4

    compute_bytes = jnp.dtype(compute_dtype).itemsize
    mem_bytes = jnp.dtype(mem_dtype).itemsize

    # ---- padded / tiled sizes (lane & sublane friendly) ----
    hp = _round_up(H, 128)                        # lane-dense gate slices + unmasked stores
    sub = 16 if compute_bytes == 2 else (32 if compute_bytes == 1 else 8)
    bp = _round_up(batch, sub)                    # packed sublane tile (16 for bf16)
    if bp > b_tile_cap:
        b_tile = b_tile_cap
        bp = _round_up(bp, b_tile)
    elif prefer_two_batch_tiles and bp >= 2 * sub:
        # >=2 batch tiles so the 'parallel' axis can engage both v7x TensorCores
        b_tile = _round_up(bp, 2 * sub) // 2
        bp = 2 * b_tile
    else:
        b_tile = bp
    num_b_tiles = bp // b_tile

    # ---- time chunking with an explicit VMEM budget (v7x: 64 MiB total) ----
    t_chunk = max(1, min(t_chunk, seq_len))
    fixed_bytes = (2 * hp * 4 * hp * compute_bytes       # W_hh^T (double-buffered)
                   + 2 * 4 * hp * 4                      # bias row
                   + 2 * b_tile * hp * 4                 # c_n output block
                   + b_tile * hp * (compute_bytes + 4))  # h / c scratch

    def _streamed_bytes(tc):
        return 2 * tc * b_tile * (4 * hp * compute_bytes + hp * mem_bytes)

    while t_chunk > 1 and fixed_bytes + _streamed_bytes(t_chunk) > vmem_budget_bytes:
        t_chunk = max(1, t_chunk // 2)

    seq_p = _round_up(seq_len, t_chunk)
    num_chunks = seq_p // t_chunk
    vmem_limit = int(min(128 << 20,
                         max(32 << 20,
                             1.5 * (fixed_bytes + _streamed_bytes(t_chunk)) + (4 << 20))))

    # ---- pad weights per gate block (zero padding keeps padded hidden units exactly 0) ----
    w_ih_p = jnp.pad(w_ih.reshape(4, H, emb_dim),
                     ((0, 0), (0, hp - H), (0, 0))).reshape(4 * hp, emb_dim)
    w_hh_p = jnp.pad(w_hh.reshape(4, H, H),
                     ((0, 0), (0, hp - H), (0, hp - H))).reshape(4 * hp, hp)
    bias_p = jnp.pad((b_ih + b_hh).reshape(4, H),
                     ((0, 0), (0, hp - H))).reshape(1, 4 * hp).astype(jnp.float32)

    wih_t = jnp.transpose(w_ih_p).astype(compute_dtype)   # (E, 4hp)
    whh_t = jnp.transpose(w_hh_p).astype(compute_dtype)   # (hp, 4hp)

    # ---- embedding lookup (glue, XLA gather) + hoisted input projection ----
    # Pad BEFORE the projection (cheap: over emb_dim, not 4*hp) and store gates in
    # compute_dtype; bias is added inside the kernel.
    emb = emb_table[src]                                   # (seq, batch, E)
    emb_p = jnp.pad(emb, ((0, seq_p - seq_len), (0, bp - batch), (0, 0)))
    x = emb_p.astype(compute_dtype).reshape(seq_p * bp, emb_dim)
    gates_x = jnp.dot(x, wih_t, preferred_element_type=jnp.float32).astype(compute_dtype)
    gates_x = gates_x.reshape(seq_p, bp, 4 * hp)

    kernel = functools.partial(_lstm_recurrent_kernel,
                               t_chunk=t_chunk, hp=hp, seq_len=seq_len)

    grid_spec = pltpu.PrefetchScalarGridSpec(
        num_scalar_prefetch=0,
        grid=(num_b_tiles, num_chunks),
        in_specs=[
            # precomputed input gates, chunked over time, tiled over batch (compute dtype)
            pl.BlockSpec((t_chunk, b_tile, 4 * hp), lambda b, c: (c, b, 0)),
            # resident recurrent weight W_hh^T
            pl.BlockSpec((hp, 4 * hp), lambda b, c: (0, 0)),
            # resident bias row (b_ih + b_hh), f32
            pl.BlockSpec((1, 4 * hp), lambda b, c: (0, 0)),
        ],
        out_specs=[
            pl.BlockSpec((t_chunk, b_tile, hp), lambda b, c: (c, b, 0)),   # memory_bank
            pl.BlockSpec((b_tile, hp), lambda b, c: (b, 0)),               # c_n (written once)
        ],
        scratch_shapes=[
            pltpu.VMEM((b_tile, hp), compute_dtype),   # h carry (compute dtype)
            pltpu.VMEM((b_tile, hp), jnp.float32),     # c carry (f32)
        ],
    )

    mem_p, cn_p = pl.pallas_call(
        kernel,
        grid_spec=grid_spec,
        out_shape=(
            jax.ShapeDtypeStruct((seq_p, bp, hp), mem_dtype),
            jax.ShapeDtypeStruct((bp, hp), jnp.float32),
        ),
        compiler_params=pltpu.CompilerParams(
            # batch tiles independent (megacore / dual-TC shardable); time is the serial
            # recurrence (scratch carry relies on batch-outer / time-inner order + the
            # chunk==0 reset).
            dimension_semantics=("parallel", "arbitrary"),
            vmem_limit_bytes=vmem_limit,
        ),
    )(gates_x, whh_t, bias_p)

    memory_bank = mem_p[:seq_len, :batch, :H]          # [seq, batch, H]
    c_n = cn_p[:batch, :H][None]                       # [1, batch, H]
    h_n = memory_bank[seq_len - 1][None]               # [1, batch, H] (== last output)
    return (h_n, c_n), memory_bank


def _reference_lstm(emb, w_ih, w_hh, b_ih, b_hh):
    """Pure-JAX reference matching torch.nn.LSTM (1 layer, unidirectional)."""
    seq_len, batch, _ = emb.shape
    H = w_hh.shape[1]
    b = (b_ih + b_hh)[None, :]

    def step(carry, x_t):
        h, c = carry
        gates = x_t @ w_ih.T + h @ w_hh.T + b
        i = jax.nn.sigmoid(gates[:, 0 * H:1 * H])
        f = jax.nn.sigmoid(gates[:, 1 * H:2 * H])
        g = jnp.tanh(gates[:, 2 * H:3 * H])
        o = jax.nn.sigmoid(gates[:, 3 * H:4 * H])
        c_new = f * c + i * g
        h_new = o * jnp.tanh(c_new)
        return (h_new, c_new), h_new

    init = (jnp.zeros((batch, H), jnp.float32), jnp.zeros((batch, H), jnp.float32))
    (h_n, c_n), outs = jax.lax.scan(step, init, emb)
    return outs, h_n[None], c_n[None]


if __name__ == "__main__":
    # Small, forward-consistent shapes
    seq_len, batch = 8, 4
    vocab, emb_dim = 50, 32
    hidden = 32           # num_directions=1 -> per-direction hidden == 32
    four_h = 4 * hidden

    key = jax.random.PRNGKey(0)
    k_emb, k_wih, k_whh, k_bih, k_bhh, k_src = jax.random.split(key, 6)

    scale = 1.0 / jnp.sqrt(hidden)
    emb_table = jax.random.normal(k_emb, (vocab, emb_dim), jnp.float32) * 0.1
    w_ih = jax.random.uniform(k_wih, (four_h, emb_dim), jnp.float32, -scale, scale)
    w_hh = jax.random.uniform(k_whh, (four_h, hidden), jnp.float32, -scale, scale)
    b_ih = jax.random.uniform(k_bih, (four_h,), jnp.float32, -scale, scale)
    b_hh = jax.random.uniform(k_bhh, (four_h,), jnp.float32, -scale, scale)

    src = jax.random.randint(k_src, (seq_len, batch), 0, vocab, jnp.int32)

    emb = emb_table[src].astype(jnp.float32)
    ref_mem, ref_h, ref_c = _reference_lstm(emb, w_ih, w_hh, b_ih, b_hh)

    # --- f32 path (tight tolerance vs. pure-JAX reference) ---
    (h_n, c_n), memory_bank = std_rnn_encoder(
        src, emb_table, w_ih, w_hh, b_ih, b_hh,
        compute_dtype=jnp.float32, t_chunk=8)
    jax.block_until_ready((h_n, c_n, memory_bank))

    assert jnp.allclose(memory_bank, ref_mem, atol=2e-5, rtol=2e-5)
    assert jnp.allclose(h_n, ref_h, atol=2e-5, rtol=2e-5)
    assert jnp.allclose(c_n, ref_c, atol=2e-5, rtol=2e-5)

    # --- bf16 streaming path (bf16 gates_x / h carry / memory_bank; f32 accumulation & c) ---
    (h_b, c_b), mem_b = std_rnn_encoder(
        src, emb_table, w_ih, w_hh, b_ih, b_hh,
        compute_dtype=jnp.bfloat16, t_chunk=8)
    jax.block_until_ready((h_b, c_b, mem_b))
    assert jnp.allclose(mem_b.astype(jnp.float32), ref_mem, atol=5e-2, rtol=5e-2)
    assert jnp.allclose(h_b.astype(jnp.float32), ref_h, atol=5e-2, rtol=5e-2)
    assert jnp.allclose(c_b, ref_c, atol=5e-2, rtol=5e-2)

    print("KERNEL_OK")
</pallas_src>

<mosaic_0001>
module attributes {stable_mosaic.version = 11 : i64} {
  func.func @_lstm_recurrent_kernel(%arg0: i32, %arg1: i32, %arg2: memref<8x8x512xf32, #tpu.memory_space<vmem>>, %arg3: memref<128x512xf32, #tpu.memory_space<vmem>>, %arg4: memref<1x512xf32, #tpu.memory_space<vmem>>, %arg5: memref<8x8x128xf32, #tpu.memory_space<vmem>>, %arg6: memref<8x128xf32, #tpu.memory_space<vmem>>, %arg7: memref<8x128xf32, #tpu.memory_space<vmem>>, %arg8: memref<8x128xf32, #tpu.memory_space<vmem>>) attributes {dimension_semantics = [#tpu.dimension_semantics<parallel>, #tpu.dimension_semantics<arbitrary>], iteration_bounds = array<i64: 1, 1>, scalar_prefetch = 0 : i64, scratch_operands = 2 : i64, tpu.core_type = #tpu.core_type<tc>, window_params = [{transform_indices = @transform_0, window_bounds = array<i64: 8, 8, 512>}, {pipeline_mode = #tpu.pipeline_mode<synchronous>, transform_indices = @transform_1, window_bounds = array<i64: 128, 512>}, {pipeline_mode = #tpu.pipeline_mode<synchronous>, transform_indices = @transform_2, window_bounds = array<i64: 1, 512>}, {transform_indices = @transform_3, window_bounds = array<i64: 8, 8, 128>}, {transform_indices = @transform_4, window_bounds = array<i64: 8, 128>}]} {
    %c0_i32 = arith.constant 0 : i32
    %0 = arith.cmpi eq, %arg1, %c0_i32 : i32
    %1 = arith.extui %0 : i1 to i32
    %c0_i32_0 = arith.constant 0 : i32
    %2 = arith.cmpi ne, %1, %c0_i32_0 : i32
    scf.if %2 {
      %cst_301 = arith.constant 0.000000e+00 : f32
      %523 = vector.broadcast %cst_301 : f32 to vector<8x128xf32>
      %c0_302 = arith.constant 0 : index
      %c0_303 = arith.constant 0 : index
      %524 = vector.load %arg7[%c0_302, %c0_303] : memref<8x128xf32, #tpu.memory_space<vmem>>, vector<8x128xf32>
      tpu.vector_store %arg7[%c0_302, %c0_303], %523 {strides = array<i32>} : memref<8x128xf32, #tpu.memory_space<vmem>>, vector<8x128xf32>,
      %cst_304 = arith.constant 0.000000e+00 : f32
      %525 = vector.broadcast %cst_304 : f32 to vector<8x128xf32>
      %c0_305 = arith.constant 0 : index
      %c0_306 = arith.constant 0 : index
      %526 = vector.load %arg8[%c0_305, %c0_306] : memref<8x128xf32, #tpu.memory_space<vmem>>, vector<8x128xf32>
      tpu.vector_store %arg8[%c0_305, %c0_306], %525 {strides = array<i32>} : memref<8x128xf32, #tpu.memory_space<vmem>>, vector<8x128xf32>,
    } else {
    }
    %c0_i32_1 = arith.constant 0 : i32
    %c0 = arith.constant 0 : index
    %c0_2 = arith.constant 0 : index
    %3 = vector.load %arg7[%c0, %c0_2] : memref<8x128xf32, #tpu.memory_space<vmem>>, vector<8x128xf32>
    %c0_3 = arith.constant 0 : index
    %c0_4 = arith.constant 0 : index
    %4 = vector.load %arg8[%c0_3, %c0_4] : memref<8x128xf32, #tpu.memory_space<vmem>>, vector<8x128xf32>
    %5 = arith.index_cast %c0_i32_1 : i32 to index
    %c0_5 = arith.constant 0 : index
    %c0_6 = arith.constant 0 : index
    %6 = vector.load %arg2[%5, %c0_5, %c0_6] : memref<8x8x512xf32, #tpu.memory_space<vmem>>, vector<1x8x512xf32>
    %7 = vector.shape_cast %6 : vector<1x8x512xf32> to vector<8x512xf32>
    %c0_7 = arith.constant 0 : index
    %c0_8 = arith.constant 0 : index
    %8 = vector.load %arg3[%c0_7, %c0_8] : memref<128x512xf32, #tpu.memory_space<vmem>>, vector<128x128xf32>
    %cst = arith.constant dense<0.000000e+00> : vector<8x128xf32>
    %9 = tpu.matmul %3, %8, %cst {dimension_numbers = #tpu.dot_dimension_numbers<[1], [0], [0], [1], [0, 0, 1, 1], [], []>} : vector<8x128xf32>, vector<128x128xf32>, vector<8x128xf32> -> vector<8x128xf32>
    %10 = vector.extract_strided_slice %7 {offsets = [0, 0], sizes = [8, 128], strides = [1, 1]} : vector<8x512xf32> to vector<8x128xf32>
    %c0_9 = arith.constant 0 : index
    %c0_10 = arith.constant 0 : index
    %11 = vector.load %arg4[%c0_9, %c0_10] : memref<1x512xf32, #tpu.memory_space<vmem>>, vector<1x128xf32>
    %12 = vector.broadcast %11 : vector<1x128xf32> to vector<8x128xf32>
    %13 = arith.addf %10, %12 : vector<8x128xf32>
    %14 = arith.addf %13, %9 : vector<8x128xf32>
    %15 = arith.negf %14 : vector<8x128xf32>
    %16 = math.exp %15 : vector<8x128xf32>
    %cst_11 = arith.constant 1.000000e+00 : f32
    %17 = vector.broadcast %cst_11 : f32 to vector<8x128xf32>
    %18 = arith.addf %17, %16 : vector<8x128xf32>
    %19 = arith.divf %17, %18 : vector<8x128xf32>
    %c0_12 = arith.constant 0 : index
    %c128 = arith.constant 128 : index
    %20 = vector.load %arg3[%c0_12, %c128] : memref<128x512xf32, #tpu.memory_space<vmem>>, vector<128x128xf32>
    %cst_13 = arith.constant dense<0.000000e+00> : vector<8x128xf32>
    %21 = tpu.matmul %3, %20, %cst_13 {dimension_numbers = #tpu.dot_dimension_numbers<[1], [0], [0], [1], [0, 0, 1, 1], [], []>} : vector<8x128xf32>, vector<128x128xf32>, vector<8x128xf32> -> vector<8x128xf32>
    %22 = vector.extract_strided_slice %7 {offsets = [0, 128], sizes = [8, 128], strides = [1, 1]} : vector<8x512xf32> to vector<8x128xf32>
    %c0_14 = arith.constant 0 : index
    %c128_15 = arith.constant 128 : index
    %23 = vector.load %arg4[%c0_14, %c128_15] : memref<1x512xf32, #tpu.memory_space<vmem>>, vector<1x128xf32>
    %24 = vector.broadcast %23 : vector<1x128xf32> to vector<8x128xf32>
    %25 = arith.addf %22, %24 : vector<8x128xf32>
    %26 = arith.addf %25, %21 : vector<8x128xf32>
    %27 = arith.negf %26 : vector<8x128xf32>
    %28 = math.exp %27 : vector<8x128xf32>
    %cst_16 = arith.constant 1.000000e+00 : f32
    %29 = vector.broadcast %cst_16 : f32 to vector<8x128xf32>
    %30 = arith.addf %29, %28 : vector<8x128xf32>
    %31 = arith.divf %29, %30 : vector<8x128xf32>
    %c0_17 = arith.constant 0 : index
    %c256 = arith.constant 256 : index
    %32 = vector.load %arg3[%c0_17, %c256] : memref<128x512xf32, #tpu.memory_space<vmem>>, vector<128x128xf32>
    %cst_18 = arith.constant dense<0.000000e+00> : vector<8x128xf32>
    %33 = tpu.matmul %3, %32, %cst_18 {dimension_numbers = #tpu.dot_dimension_numbers<[1], [0], [0], [1], [0, 0, 1, 1], [], []>} : vector<8x128xf32>, vector<128x128xf32>, vector<8x128xf32> -> vector<8x128xf32>
    %34 = vector.extract_strided_slice %7 {offsets = [0, 256], sizes = [8, 128], strides = [1, 1]} : vector<8x512xf32> to vector<8x128xf32>
    %c0_19 = arith.constant 0 : index
    %c256_20 = arith.constant 256 : index
    %35 = vector.load %arg4[%c0_19, %c256_20] : memref<1x512xf32, #tpu.memory_space<vmem>>, vector<1x128xf32>
    %36 = vector.broadcast %35 : vector<1x128xf32> to vector<8x128xf32>
    %37 = arith.addf %34, %36 : vector<8x128xf32>
    %38 = arith.addf %37, %33 : vector<8x128xf32>
    %39 = math.tanh %38 : vector<8x128xf32>
    %c0_21 = arith.constant 0 : index
    %c384 = arith.constant 384 : index
    %40 = vector.load %arg3[%c0_21, %c384] : memref<128x512xf32, #tpu.memory_space<vmem>>, vector<128x128xf32>
    %cst_22 = arith.constant dense<0.000000e+00> : vector<8x128xf32>
    %41 = tpu.matmul %3, %40, %cst_22 {dimension_numbers = #tpu.dot_dimension_numbers<[1], [0], [0], [1], [0, 0, 1, 1], [], []>} : vector<8x128xf32>, vector<128x128xf32>, vector<8x128xf32> -> vector<8x128xf32>
    %42 = vector.extract_strided_slice %7 {offsets = [0, 384], sizes = [8, 128], strides = [1, 1]} : vector<8x512xf32> to vector<8x128xf32>
    %c0_23 = arith.constant 0 : index
    %c384_24 = arith.constant 384 : index
    %43 = vector.load %arg4[%c0_23, %c384_24] : memref<1x512xf32, #tpu.memory_space<vmem>>, vector<1x128xf32>
    %44 = vector.broadcast %43 : vector<1x128xf32> to vector<8x128xf32>
    %45 = arith.addf %42, %44 : vector<8x128xf32>
    %46 = arith.addf %45, %41 : vector<8x128xf32>
    %47 = arith.negf %46 : vector<8x128xf32>
    %48 = math.exp %47 : vector<8x128xf32>
    %cst_25 = arith.constant 1.000000e+00 : f32
    %49 = vector.broadcast %cst_25 : f32 to vector<8x128xf32>
    %50 = arith.addf %49, %48 : vector<8x128xf32>
    %51 = arith.divf %49, %50 : vector<8x128xf32>
    %52 = arith.mulf %31, %4 : vector<8x128xf32>
    %53 = arith.mulf %19, %39 : vector<8x128xf32>
    %54 = arith.addf %52, %53 : vector<8x128xf32>
    %55 = math.tanh %54 : vector<8x128xf32>
    %56 = arith.mulf %51, %55 : vector<8x128xf32>
    %c0_26 = arith.constant 0 : index
    %c0_27 = arith.constant 0 : index
    %57 = vector.load %arg7[%c0_26, %c0_27] : memref<8x128xf32, #tpu.memory_space<vmem>>, vector<8x128xf32>
    tpu.vector_store %arg7[%c0_26, %c0_27], %56 {strides = array<i32>} : memref<8x128xf32, #tpu.memory_space<vmem>>, vector<8x128xf32>,
    %c0_28 = arith.constant 0 : index
    %c0_29 = arith.constant 0 : index
    %58 = vector.load %arg8[%c0_28, %c0_29] : memref<8x128xf32, #tpu.memory_space<vmem>>, vector<8x128xf32>
    tpu.vector_store %arg8[%c0_28, %c0_29], %54 {strides = array<i32>} : memref<8x128xf32, #tpu.memory_space<vmem>>, vector<8x128xf32>,
    %59 = arith.index_cast %c0_i32_1 : i32 to index
    %c0_30 = arith.constant 0 : index
    %c0_31 = arith.constant 0 : index
    %60 = vector.load %arg5[%59, %c0_30, %c0_31] : memref<8x8x128xf32, #tpu.memory_space<vmem>>, vector<1x8x128xf32>
    %61 = vector.shape_cast %60 : vector<1x8x128xf32> to vector<8x128xf32>
    %62 = vector.shape_cast %56 : vector<8x128xf32> to vector<1x8x128xf32>
    tpu.vector_store %arg5[%59, %c0_30, %c0_31], %62 {strides = array<i32>} : memref<8x8x128xf32, #tpu.memory_space<vmem>>, vector<1x8x128xf32>,
    %c8_i32 = arith.constant 8 : i32
    %63 = arith.muli %arg1, %c8_i32 : i32
    %64 = arith.addi %63, %c0_i32_1 : i32
    %c7_i32 = arith.constant 7 : i32
    %65 = arith.cmpi eq, %64, %c7_i32 : i32
    %66 = arith.extui %65 : i1 to i32
    %c0_i32_32 = arith.constant 0 : i32
    %67 = arith.cmpi ne, %66, %c0_i32_32 : i32
    scf.if %67 {
      %c0_301 = arith.constant 0 : index
      %c0_302 = arith.constant 0 : index
      %523 = vector.load %arg6[%c0_301, %c0_302] : memref<8x128xf32, #tpu.memory_space<vmem>>, vector<8x128xf32>
      tpu.vector_store %arg6[%c0_301, %c0_302], %54 {strides = array<i32>} : memref<8x128xf32, #tpu.memory_space<vmem>>, vector<8x128xf32>,
    } else {
    }
    %c1_i32 = arith.constant 1 : i32
    %c0_33 = arith.constant 0 : index
    %c0_34 = arith.constant 0 : index
    %68 = vector.load %arg7[%c0_33, %c0_34] : memref<8x128xf32, #tpu.memory_space<vmem>>, vector<8x128xf32>
    %c0_35 = arith.constant 0 : index
    %c0_36 = arith.constant 0 : index
    %69 = vector.load %arg8[%c0_35, %c0_36] : memref<8x128xf32, #tpu.memory_space<vmem>>, vector<8x128xf32>
    %70 = arith.index_cast %c1_i32 : i32 to index
    %c0_37 = arith.constant 0 : index
    %c0_38 = arith.constant 0 : index
    %71 = vector.load %arg2[%70, %c0_37, %c0_38] : memref<8x8x512xf32, #tpu.memory_space<vmem>>, vector<1x8x512xf32>
    %72 = vector.shape_cast %71 : vector<1x8x512xf32> to vector<8x512xf32>
    %c0_39 = arith.constant 0 : index
    %c0_40 = arith.constant 0 : index
    %73 = vector.load %arg3[%c0_39, %c0_40] : memref<128x512xf32, #tpu.memory_space<vmem>>, vector<128x128xf32>
    %cst_41 = arith.constant dense<0.000000e+00> : vector<8x128xf32>
    %74 = tpu.matmul %68, %73, %cst_41 {dimension_numbers = #tpu.dot_dimension_numbers<[1], [0], [0], [1], [0, 0, 1, 1], [], []>} : vector<8x128xf32>, vector<128x128xf32>, vector<8x128xf32> -> vector<8x128xf32>
    %75 = vector.extract_strided_slice %72 {offsets = [0, 0], sizes = [8, 128], strides = [1, 1]} : vector<8x512xf32> to vector<8x128xf32>
    %c0_42 = arith.constant 0 : index
    %c0_43 = arith.constant 0 : index
    %76 = vector.load %arg4[%c0_42, %c0_43] : memref<1x512xf32, #tpu.memory_space<vmem>>, vector<1x128xf32>
    %77 = vector.broadcast %76 : vector<1x128xf32> to vector<8x128xf32>
    %78 = arith.addf %75, %77 : vector<8x128xf32>
    %79 = arith.addf %78, %74 : vector<8x128xf32>
    %80 = arith.negf %79 : vector<8x128xf32>
    %81 = math.exp %80 : vector<8x128xf32>
    %cst_44 = arith.constant 1.000000e+00 : f32
    %82 = vector.broadcast %cst_44 : f32 to vector<8x128xf32>
    %83 = arith.addf %82, %81 : vector<8x128xf32>
    %84 = arith.divf %82, %83 : vector<8x128xf32>
    %c0_45 = arith.constant 0 : index
    %c128_46 = arith.constant 128 : index
    %85 = vector.load %arg3[%c0_45, %c128_46] : memref<128x512xf32, #tpu.memory_space<vmem>>, vector<128x128xf32>
    %cst_47 = arith.constant dense<0.000000e+00> : vector<8x128xf32>
    %86 = tpu.matmul %68, %85, %cst_47 {dimension_numbers = #tpu.dot_dimension_numbers<[1], [0], [0], [1], [0, 0, 1, 1], [], []>} : vector<8x128xf32>, vector<128x128xf32>, vector<8x128xf32> -> vector<8x128xf32>
    %87 = vector.extract_strided_slice %72 {offsets = [0, 128], sizes = [8, 128], strides = [1, 1]} : vector<8x512xf32> to vector<8x128xf32>
    %c0_48 = arith.constant 0 : index
    %c128_49 = arith.constant 128 : index
    %88 = vector.load %arg4[%c0_48, %c128_49] : memref<1x512xf32, #tpu.memory_space<vmem>>, vector<1x128xf32>
    %89 = vector.broadcast %88 : vector<1x128xf32> to vector<8x128xf32>
    %90 = arith.addf %87, %89 : vector<8x128xf32>
    %91 = arith.addf %90, %86 : vector<8x128xf32>
    %92 = arith.negf %91 : vector<8x128xf32>
    %93 = math.exp %92 : vector<8x128xf32>
    %cst_50 = arith.constant 1.000000e+00 : f32
    %94 = vector.broadcast %cst_50 : f32 to vector<8x128xf32>
    %95 = arith.addf %94, %93 : vector<8x128xf32>
    %96 = arith.divf %94, %95 : vector<8x128xf32>
    %c0_51 = arith.constant 0 : index
    %c256_52 = arith.constant 256 : index
    %97 = vector.load %arg3[%c0_51, %c256_52] : memref<128x512xf32, #tpu.memory_space<vmem>>, vector<128x128xf32>
    %cst_53 = arith.constant dense<0.000000e+00> : vector<8x128xf32>
    %98 = tpu.matmul %68, %97, %cst_53 {dimension_numbers = #tpu.dot_dimension_numbers<[1], [0], [0], [1], [0, 0, 1, 1], [], []>} : vector<8x128xf32>, vector<128x128xf32>, vector<8x128xf32> -> vector<8x128xf32>
    %99 = vector.extract_strided_slice %72 {offsets = [0, 256], sizes = [8, 128], strides = [1, 1]} : vector<8x512xf32> to vector<8x128xf32>
    %c0_54 = arith.constant 0 : index
    %c256_55 = arith.constant 256 : index
    %100 = vector.load %arg4[%c0_54, %c256_55] : memref<1x512xf32, #tpu.memory_space<vmem>>, vector<1x128xf32>
    %101 = vector.broadcast %100 : vector<1x128xf32> to vector<8x128xf32>
    %102 = arith.addf %99, %101 : vector<8x128xf32>
    %103 = arith.addf %102, %98 : vector<8x128xf32>
    %104 = math.tanh %103 : vector<8x128xf32>
    %c0_56 = arith.constant 0 : index
    %c384_57 = arith.constant 384 : index
    %105 = vector.load %arg3[%c0_56, %c384_57] : memref<128x512xf32, #tpu.memory_space<vmem>>, vector<128x128xf32>
    %cst_58 = arith.constant dense<0.000000e+00> : vector<8x128xf32>
    %106 = tpu.matmul %68, %105, %cst_58 {dimension_numbers = #tpu.dot_dimension_numbers<[1], [0], [0], [1], [0, 0, 1, 1], [], []>} : vector<8x128xf32>, vector<128x128xf32>, vector<8x128xf32> -> vector<8x128xf32>
    %107 = vector.extract_strided_slice %72 {offsets = [0, 384], sizes = [8, 128], strides = [1, 1]} : vector<8x512xf32> to vector<8x128xf32>
    %c0_59 = arith.constant 0 : index
    %c384_60 = arith.constant 384 : index
    %108 = vector.load %arg4[%c0_59, %c384_60] : memref<1x512xf32, #tpu.memory_space<vmem>>, vector<1x128xf32>
    %109 = vector.broadcast %108 : vector<1x128xf32> to vector<8x128xf32>
    %110 = arith.addf %107, %109 : vector<8x128xf32>
    %111 = arith.addf %110, %106 : vector<8x128xf32>
    %112 = arith.negf %111 : vector<8x128xf32>
    %113 = math.exp %112 : vector<8x128xf32>
    %cst_61 = arith.constant 1.000000e+00 : f32
    %114 = vector.broadcast %cst_61 : f32 to vector<8x128xf32>
    %115 = arith.addf %114, %113 : vector<8x128xf32>
    %116 = arith.divf %114, %115 : vector<8x128xf32>
    %117 = arith.mulf %96, %69 : vector<8x128xf32>
    %118 = arith.mulf %84, %104 : vector<8x128xf32>
    %119 = arith.addf %117, %118 : vector<8x128xf32>
    %120 = math.tanh %119 : vector<8x128xf32>
    %121 = arith.mulf %116, %120 : vector<8x128xf32>
    %c0_62 = arith.constant 0 : index
    %c0_63 = arith.constant 0 : index
    %122 = vector.load %arg7[%c0_62, %c0_63] : memref<8x128xf32, #tpu.memory_space<vmem>>, vector<8x128xf32>
    tpu.vector_store %arg7[%c0_62, %c0_63], %121 {strides = array<i32>} : memref<8x128xf32, #tpu.memory_space<vmem>>, vector<8x128xf32>,
    %c0_64 = arith.constant 0 : index
    %c0_65 = arith.constant 0 : index
    %123 = vector.load %arg8[%c0_64, %c0_65] : memref<8x128xf32, #tpu.memory_space<vmem>>, vector<8x128xf32>
    tpu.vector_store %arg8[%c0_64, %c0_65], %119 {strides = array<i32>} : memref<8x128xf32, #tpu.memory_space<vmem>>, vector<8x128xf32>,
    %124 = arith.index_cast %c1_i32 : i32 to index
    %c0_66 = arith.constant 0 : index
    %c0_67 = arith.constant 0 : index
    %125 = vector.load %arg5[%124, %c0_66, %c0_67] : memref<8x8x128xf32, #tpu.memory_space<vmem>>, vector<1x8x128xf32>
    %126 = vector.shape_cast %125 : vector<1x8x128xf32> to vector<8x128xf32>
    %127 = vector.shape_cast %121 : vector<8x128xf32> to vector<1x8x128xf32>
    tpu.vector_store %arg5[%124, %c0_66, %c0_67], %127 {strides = array<i32>} : memref<8x8x128xf32, #tpu.memory_space<vmem>>, vector<1x8x128xf32>,
    %c8_i32_68 = arith.constant 8 : i32
    %128 = arith.muli %arg1, %c8_i32_68 : i32
    %129 = arith.addi %128, %c1_i32 : i32
    %c7_i32_69 = arith.constant 7 : i32
    %130 = arith.cmpi eq, %129, %c7_i32_69 : i32
    %131 = arith.extui %130 : i1 to i32
    %c0_i32_70 = arith.constant 0 : i32
    %132 = arith.cmpi ne, %131, %c0_i32_70 : i32
    scf.if %132 {
      %c0_301 = arith.constant 0 : index
      %c0_302 = arith.constant 0 : index
      %523 = vector.load %arg6[%c0_301, %c0_302] : memref<8x128xf32, #tpu.memory_space<vmem>>, vector<8x128xf32>
      tpu.vector_store %arg6[%c0_301, %c0_302], %119 {strides = array<i32>} : memref<8x128xf32, #tpu.memory_space<vmem>>, vector<8x128xf32>,
    } else {
    }
    %c2_i32 = arith.constant 2 : i32
    %c0_71 = arith.constant 0 : index
    %c0_72 = arith.constant 0 : index
    %133 = vector.load %arg7[%c0_71, %c0_72] : memref<8x128xf32, #tpu.memory_space<vmem>>, vector<8x128xf32>
    %c0_73 = arith.constant 0 : index
    %c0_74 = arith.constant 0 : index
    %134 = vector.load %arg8[%c0_73, %c0_74] : memref<8x128xf32, #tpu.memory_space<vmem>>, vector<8x128xf32>
    %135 = arith.index_cast %c2_i32 : i32 to index
    %c0_75 = arith.constant 0 : index
    %c0_76 = arith.constant 0 : index
    %136 = vector.load %arg2[%135, %c0_75, %c0_76] : memref<8x8x512xf32, #tpu.memory_space<vmem>>, vector<1x8x512xf32>
    %137 = vector.shape_cast %136 : vector<1x8x512xf32> to vector<8x512xf32>
    %c0_77 = arith.constant 0 : index
    %c0_78 = arith.constant 0 : index
    %138 = vector.load %arg3[%c0_77, %c0_78] : memref<128x512xf32, #tpu.memory_space<vmem>>, vector<128x128xf32>
    %cst_79 = arith.constant dense<0.000000e+00> : vector<8x128xf32>
    %139 = tpu.matmul %133, %138, %cst_79 {dimension_numbers = #tpu.dot_dimension_numbers<[1], [0], [0], [1], [0, 0, 1, 1], [], []>} : vector<8x128xf32>, vector<128x128xf32>, vector<8x128xf32> -> vector<8x128xf32>
    %140 = vector.extract_strided_slice %137 {offsets = [0, 0], sizes = [8, 128], strides = [1, 1]} : vector<8x512xf32> to vector<8x128xf32>
    %c0_80 = arith.constant 0 : index
    %c0_81 = arith.constant 0 : index
    %141 = vector.load %arg4[%c0_80, %c0_81] : memref<1x512xf32, #tpu.memory_space<vmem>>, vector<1x128xf32>
    %142 = vector.broadcast %141 : vector<1x128xf32> to vector<8x128xf32>
    %143 = arith.addf %140, %142 : vector<8x128xf32>
    %144 = arith.addf %143, %139 : vector<8x128xf32>
    %145 = arith.negf %144 : vector<8x128xf32>
    %146 = math.exp %145 : vector<8x128xf32>
    %cst_82 = arith.constant 1.000000e+00 : f32
    %147 = vector.broadcast %cst_82 : f32 to vector<8x128xf32>
    %148 = arith.addf %147, %146 : vector<8x128xf32>
    %149 = arith.divf %147, %148 : vector<8x128xf32>
    %c0_83 = arith.constant 0 : index
    %c128_84 = arith.constant 128 : index
    %150 = vector.load %arg3[%c0_83, %c128_84] : memref<128x512xf32, #tpu.memory_space<vmem>>, vector<128x128xf32>
    %cst_85 = arith.constant dense<0.000000e+00> : vector<8x128xf32>
    %151 = tpu.matmul %133, %150, %cst_85 {dimension_numbers = #tpu.dot_dimension_numbers<[1], [0], [0], [1], [0, 0, 1, 1], [], []>} : vector<8x128xf32>, vector<128x128xf32>, vector<8x128xf32> -> vector<8x128xf32>
    %152 = vector.extract_strided_slice %137 {offsets = [0, 128], sizes = [8, 128], strides = [1, 1]} : vector<8x512xf32> to vector<8x128xf32>
    %c0_86 = arith.constant 0 : index
    %c128_87 = arith.constant 128 : index
    %153 = vector.load %arg4[%c0_86, %c128_87] : memref<1x512xf32, #tpu.memory_space<vmem>>, vector<1x128xf32>
    %154 = vector.broadcast %153 : vector<1x128xf32> to vector<8x128xf32>
    %155 = arith.addf %152, %154 : vector<8x128xf32>
    %156 = arith.addf %155, %151 : vector<8x128xf32>
    %157 = arith.negf %156 : vector<8x128xf32>
    %158 = math.exp %157 : vector<8x128xf32>
    %cst_88 = arith.constant 1.000000e+00 : f32
    %159 = vector.broadcast %cst_88 : f32 to vector<8x128xf32>
    %160 = arith.addf %159, %158 : vector<8x128xf32>
    %161 = arith.divf %159, %160 : vector<8x128xf32>
    %c0_89 = arith.constant 0 : index
    %c256_90 = arith.constant 256 : index
    %162 = vector.load %arg3[%c0_89, %c256_90] : memref<128x512xf32, #tpu.memory_space<vmem>>, vector<128x128xf32>
    %cst_91 = arith.constant dense<0.000000e+00> : vector<8x128xf32>
    %163 = tpu.matmul %133, %162, %cst_91 {dimension_numbers = #tpu.dot_dimension_numbers<[1], [0], [0], [1], [0, 0, 1, 1], [], []>} : vector<8x128xf32>, vector<128x128xf32>, vector<8x128xf32> -> vector<8x128xf32>
    %164 = vector.extract_strided_slice %137 {offsets = [0, 256], sizes = [8, 128], strides = [1, 1]} : vector<8x512xf32> to vector<8x128xf32>
    %c0_92 = arith.constant 0 : index
    %c256_93 = arith.constant 256 : index
    %165 = vector.load %arg4[%c0_92, %c256_93] : memref<1x512xf32, #tpu.memory_space<vmem>>, vector<1x128xf32>
    %166 = vector.broadcast %165 : vector<1x128xf32> to vector<8x128xf32>
    %167 = arith.addf %164, %166 : vector<8x128xf32>
    %168 = arith.addf %167, %163 : vector<8x128xf32>
    %169 = math.tanh %168 : vector<8x128xf32>
    %c0_94 = arith.constant 0 : index
    %c384_95 = arith.constant 384 : index
    %170 = vector.load %arg3[%c0_94, %c384_95] : memref<128x512xf32, #tpu.memory_space<vmem>>, vector<128x128xf32>
    %cst_96 = arith.constant dense<0.000000e+00> : vector<8x128xf32>
    %171 = tpu.matmul %133, %170, %cst_96 {dimension_numbers = #tpu.dot_dimension_numbers<[1], [0], [0], [1], [0, 0, 1, 1], [], []>} : vector<8x128xf32>, vector<128x128xf32>, vector<8x128xf32> -> vector<8x128xf32>
    %172 = vector.extract_strided_slice %137 {offsets = [0, 384], sizes = [8, 128], strides = [1, 1]} : vector<8x512xf32> to vector<8x128xf32>
    %c0_97 = arith.constant 0 : index
    %c384_98 = arith.constant 384 : index
    %173 = vector.load %arg4[%c0_97, %c384_98] : memref<1x512xf32, #tpu.memory_space<vmem>>, vector<1x128xf32>
    %174 = vector.broadcast %173 : vector<1x128xf32> to vector<8x128xf32>
    %175 = arith.addf %172, %174 : vector<8x128xf32>
    %176 = arith.addf %175, %171 : vector<8x128xf32>
    %177 = arith.negf %176 : vector<8x128xf32>
    %178 = math.exp %177 : vector<8x128xf32>
    %cst_99 = arith.constant 1.000000e+00 : f32
    %179 = vector.broadcast %cst_99 : f32 to vector<8x128xf32>
    %180 = arith.addf %179, %178 : vector<8x128xf32>
    %181 = arith.divf %179, %180 : vector<8x128xf32>
    %182 = arith.mulf %161, %134 : vector<8x128xf32>
    %183 = arith.mulf %149, %169 : vector<8x128xf32>
    %184 = arith.addf %182, %183 : vector<8x128xf32>
    %185 = math.tanh %184 : vector<8x128xf32>
    %186 = arith.mulf %181, %185 : vector<8x128xf32>
    %c0_100 = arith.constant 0 : index
    %c0_101 = arith.constant 0 : index
    %187 = vector.load %arg7[%c0_100, %c0_101] : memref<8x128xf32, #tpu.memory_space<vmem>>, vector<8x128xf32>
    tpu.vector_store %arg7[%c0_100, %c0_101], %186 {strides = array<i32>} : memref<8x128xf32, #tpu.memory_space<vmem>>, vector<8x128xf32>,
    %c0_102 = arith.constant 0 : index
    %c0_103 = arith.constant 0 : index
    %188 = vector.load %arg8[%c0_102, %c0_103] : memref<8x128xf32, #tpu.memory_space<vmem>>, vector<8x128xf32>
    tpu.vector_store %arg8[%c0_102, %c0_103], %184 {strides = array<i32>} : memref<8x128xf32, #tpu.memory_space<vmem>>, vector<8x128xf32>,
    %189 = arith.index_cast %c2_i32 : i32 to index
    %c0_104 = arith.constant 0 : index
    %c0_105 = arith.constant 0 : index
    %190 = vector.load %arg5[%189, %c0_104, %c0_105] : memref<8x8x128xf32, #tpu.memory_space<vmem>>, vector<1x8x128xf32>
    %191 = vector.shape_cast %190 : vector<1x8x128xf32> to vector<8x128xf32>
    %192 = vector.shape_cast %186 : vector<8x128xf32> to vector<1x8x128xf32>
    tpu.vector_store %arg5[%189, %c0_104, %c0_105], %192 {strides = array<i32>} : memref<8x8x128xf32, #tpu.memory_space<vmem>>, vector<1x8x128xf32>,
    %c8_i32_106 = arith.constant 8 : i32
    %193 = arith.muli %arg1, %c8_i32_106 : i32
    %194 = arith.addi %193, %c2_i32 : i32
    %c7_i32_107 = arith.constant 7 : i32
    %195 = arith.cmpi eq, %194, %c7_i32_107 : i32
    %196 = arith.extui %195 : i1 to i32
    %c0_i32_108 = arith.constant 0 : i32
    %197 = arith.cmpi ne, %196, %c0_i32_108 : i32
    scf.if %197 {
      %c0_301 = arith.constant 0 : index
      %c0_302 = arith.constant 0 : index
      %523 = vector.load %arg6[%c0_301, %c0_302] : memref<8x128xf32, #tpu.memory_space<vmem>>, vector<8x128xf32>
      tpu.vector_store %arg6[%c0_301, %c0_302], %184 {strides = array<i32>} : memref<8x128xf32, #tpu.memory_space<vmem>>, vector<8x128xf32>,
    } else {
    }
    %c3_i32 = arith.constant 3 : i32
    %c0_109 = arith.constant 0 : index
    %c0_110 = arith.constant 0 : index
    %198 = vector.load %arg7[%c0_109, %c0_110] : memref<8x128xf32, #tpu.memory_space<vmem>>, vector<8x128xf32>
    %c0_111 = arith.constant 0 : index
    %c0_112 = arith.constant 0 : index
    %199 = vector.load %arg8[%c0_111, %c0_112] : memref<8x128xf32, #tpu.memory_space<vmem>>, vector<8x128xf32>
    %200 = arith.index_cast %c3_i32 : i32 to index
    %c0_113 = arith.constant 0 : index
    %c0_114 = arith.constant 0 : index
    %201 = vector.load %arg2[%200, %c0_113, %c0_114] : memref<8x8x512xf32, #tpu.memory_space<vmem>>, vector<1x8x512xf32>
    %202 = vector.shape_cast %201 : vector<1x8x512xf32> to vector<8x512xf32>
    %c0_115 = arith.constant 0 : index
    %c0_116 = arith.constant 0 : index
    %203 = vector.load %arg3[%c0_115, %c0_116] : memref<128x512xf32, #tpu.memory_space<vmem>>, vector<128x128xf32>
    %cst_117 = arith.constant dense<0.000000e+00> : vector<8x128xf32>
    %204 = tpu.matmul %198, %203, %cst_117 {dimension_numbers = #tpu.dot_dimension_numbers<[1], [0], [0], [1], [0, 0, 1, 1], [], []>} : vector<8x128xf32>, vector<128x128xf32>, vector<8x128xf32> -> vector<8x128xf32>
    %205 = vector.extract_strided_slice %202 {offsets = [0, 0], sizes = [8, 128], strides = [1, 1]} : vector<8x512xf32> to vector<8x128xf32>
    %c0_118 = arith.constant 0 : index
    %c0_119 = arith.constant 0 : index
    %206 = vector.load %arg4[%c0_118, %c0_119] : memref<1x512xf32, #tpu.memory_space<vmem>>, vector<1x128xf32>
    %207 = vector.broadcast %206 : vector<1x128xf32> to vector<8x128xf32>
    %208 = arith.addf %205, %207 : vector<8x128xf32>
    %209 = arith.addf %208, %204 : vector<8x128xf32>
    %210 = arith.negf %209 : vector<8x128xf32>
    %211 = math.exp %210 : vector<8x128xf32>
    %cst_120 = arith.constant 1.000000e+00 : f32
    %212 = vector.broadcast %cst_120 : f32 to vector<8x128xf32>
    %213 = arith.addf %212, %211 : vector<8x128xf32>
    %214 = arith.divf %212, %213 : vector<8x128xf32>
    %c0_121 = arith.constant 0 : index
    %c128_122 = arith.constant 128 : index
    %215 = vector.load %arg3[%c0_121, %c128_122] : memref<128x512xf32, #tpu.memory_space<vmem>>, vector<128x128xf32>
    %cst_123 = arith.constant dense<0.000000e+00> : vector<8x128xf32>
    %216 = tpu.matmul %198, %215, %cst_123 {dimension_numbers = #tpu.dot_dimension_numbers<[1], [0], [0], [1], [0, 0, 1, 1], [], []>} : vector<8x128xf32>, vector<128x128xf32>, vector<8x128xf32> -> vector<8x128xf32>
    %217 = vector.extract_strided_slice %202 {offsets = [0, 128], sizes = [8, 128], strides = [1, 1]} : vector<8x512xf32> to vector<8x128xf32>
    %c0_124 = arith.constant 0 : index
    %c128_125 = arith.constant 128 : index
    %218 = vector.load %arg4[%c0_124, %c128_125] : memref<1x512xf32, #tpu.memory_space<vmem>>, vector<1x128xf32>
    %219 = vector.broadcast %218 : vector<1x128xf32> to vector<8x128xf32>
    %220 = arith.addf %217, %219 : vector<8x128xf32>
    %221 = arith.addf %220, %216 : vector<8x128xf32>
    %222 = arith.negf %221 : vector<8x128xf32>
    %223 = math.exp %222 : vector<8x128xf32>
    %cst_126 = arith.constant 1.000000e+00 : f32
    %224 = vector.broadcast %cst_126 : f32 to vector<8x128xf32>
    %225 = arith.addf %224, %223 : vector<8x128xf32>
    %226 = arith.divf %224, %225 : vector<8x128xf32>
    %c0_127 = arith.constant 0 : index
    %c256_128 = arith.constant 256 : index
    %227 = vector.load %arg3[%c0_127, %c256_128] : memref<128x512xf32, #tpu.memory_space<vmem>>, vector<128x128xf32>
    %cst_129 = arith.constant dense<0.000000e+00> : vector<8x128xf32>
    %228 = tpu.matmul %198, %227, %cst_129 {dimension_numbers = #tpu.dot_dimension_numbers<[1], [0], [0], [1], [0, 0, 1, 1], [], []>} : vector<8x128xf32>, vector<128x128xf32>, vector<8x128xf32> -> vector<8x128xf32>
    %229 = vector.extract_strided_slice %202 {offsets = [0, 256], sizes = [8, 128], strides = [1, 1]} : vector<8x512xf32> to vector<8x128xf32>
    %c0_130 = arith.constant 0 : index
    %c256_131 = arith.constant 256 : index
    %230 = vector.load %arg4[%c0_130, %c256_131] : memref<1x512xf32, #tpu.memory_space<vmem>>, vector<1x128xf32>
    %231 = vector.broadcast %230 : vector<1x128xf32> to vector<8x128xf32>
    %232 = arith.addf %229, %231 : vector<8x128xf32>
    %233 = arith.addf %232, %228 : vector<8x128xf32>
    %234 = math.tanh %233 : vector<8x128xf32>
    %c0_132 = arith.constant 0 : index
    %c384_133 = arith.constant 384 : index
    %235 = vector.load %arg3[%c0_132, %c384_133] : memref<128x512xf32, #tpu.memory_space<vmem>>, vector<128x128xf32>
    %cst_134 = arith.constant dense<0.000000e+00> : vector<8x128xf32>
    %236 = tpu.matmul %198, %235, %cst_134 {dimension_numbers = #tpu.dot_dimension_numbers<[1], [0], [0], [1], [0, 0, 1, 1], [], []>} : vector<8x128xf32>, vector<128x128xf32>, vector<8x128xf32> -> vector<8x128xf32>
    %237 = vector.extract_strided_slice %202 {offsets = [0, 384], sizes = [8, 128], strides = [1, 1]} : vector<8x512xf32> to vector<8x128xf32>
    %c0_135 = arith.constant 0 : index
    %c384_136 = arith.constant 384 : index
    %238 = vector.load %arg4[%c0_135, %c384_136] : memref<1x512xf32, #tpu.memory_space<vmem>>, vector<1x128xf32>
    %239 = vector.broadcast %238 : vector<1x128xf32> to vector<8x128xf32>
    %240 = arith.addf %237, %239 : vector<8x128xf32>
    %241 = arith.addf %240, %236 : vector<8x128xf32>
    %242 = arith.negf %241 : vector<8x128xf32>
    %243 = math.exp %242 : vector<8x128xf32>
    %cst_137 = arith.constant 1.000000e+00 : f32
    %244 = vector.broadcast %cst_137 : f32 to vector<8x128xf32>
    %245 = arith.addf %244, %243 : vector<8x128xf32>
    %246 = arith.divf %244, %245 : vector<8x128xf32>
    %247 = arith.mulf %226, %199 : vector<8x128xf32>
    %248 = arith.mulf %214, %234 : vector<8x128xf32>
    %249 = arith.addf %247, %248 : vector<8x128xf32>
    %250 = math.tanh %249 : vector<8x128xf32>
    %251 = arith.mulf %246, %250 : vector<8x128xf32>
    %c0_138 = arith.constant 0 : index
    %c0_139 = arith.constant 0 : index
    %252 = vector.load %arg7[%c0_138, %c0_139] : memref<8x128xf32, #tpu.memory_space<vmem>>, vector<8x128xf32>
    tpu.vector_store %arg7[%c0_138, %c0_139], %251 {strides = array<i32>} : memref<8x128xf32, #tpu.memory_space<vmem>>, vector<8x128xf32>,
    %c0_140 = arith.constant 0 : index
    %c0_141 = arith.constant 0 : index
    %253 = vector.load %arg8[%c0_140, %c0_141] : memref<8x128xf32, #tpu.memory_space<vmem>>, vector<8x128xf32>
    tpu.vector_store %arg8[%c0_140, %c0_141], %249 {strides = array<i32>} : memref<8x128xf32, #tpu.memory_space<vmem>>, vector<8x128xf32>,
    %254 = arith.index_cast %c3_i32 : i32 to index
    %c0_142 = arith.constant 0 : index
    %c0_143 = arith.constant 0 : index
    %255 = vector.load %arg5[%254, %c0_142, %c0_143] : memref<8x8x128xf32, #tpu.memory_space<vmem>>, vector<1x8x128xf32>
    %256 = vector.shape_cast %255 : vector<1x8x128xf32> to vector<8x128xf32>
    %257 = vector.shape_cast %251 : vector<8x128xf32> to vector<1x8x128xf32>
    tpu.vector_store %arg5[%254, %c0_142, %c0_143], %257 {strides = array<i32>} : memref<8x8x128xf32, #tpu.memory_space<vmem>>, vector<1x8x128xf32>,
    %c8_i32_144 = arith.constant 8 : i32
    %258 = arith.muli %arg1, %c8_i32_144 : i32
    %259 = arith.addi %258, %c3_i32 : i32
    %c7_i32_145 = arith.constant 7 : i32
    %260 = arith.cmpi eq, %259, %c7_i32_145 : i32
    %261 = arith.extui %260 : i1 to i32
    %c0_i32_146 = arith.constant 0 : i32
    %262 = arith.cmpi ne, %261, %c0_i32_146 : i32
    scf.if %262 {
      %c0_301 = arith.constant 0 : index
      %c0_302 = arith.constant 0 : index
      %523 = vector.load %arg6[%c0_301, %c0_302] : memref<8x128xf32, #tpu.memory_space<vmem>>, vector<8x128xf32>
      tpu.vector_store %arg6[%c0_301, %c0_302], %249 {strides = array<i32>} : memref<8x128xf32, #tpu.memory_space<vmem>>, vector<8x128xf32>,
    } else {
    }
    %c4_i32 = arith.constant 4 : i32
    %c0_147 = arith.constant 0 : index
    %c0_148 = arith.constant 0 : index
    %263 = vector.load %arg7[%c0_147, %c0_148] : memref<8x128xf32, #tpu.memory_space<vmem>>, vector<8x128xf32>
    %c0_149 = arith.constant 0 : index
    %c0_150 = arith.constant 0 : index
    %264 = vector.load %arg8[%c0_149, %c0_150] : memref<8x128xf32, #tpu.memory_space<vmem>>, vector<8x128xf32>
    %265 = arith.index_cast %c4_i32 : i32 to index
    %c0_151 = arith.constant 0 : index
    %c0_152 = arith.constant 0 : index
    %266 = vector.load %arg2[%265, %c0_151, %c0_152] : memref<8x8x512xf32, #tpu.memory_space<vmem>>, vector<1x8x512xf32>
    %267 = vector.shape_cast %266 : vector<1x8x512xf32> to vector<8x512xf32>
    %c0_153 = arith.constant 0 : index
    %c0_154 = arith.constant 0 : index
    %268 = vector.load %arg3[%c0_153, %c0_154] : memref<128x512xf32, #tpu.memory_space<vmem>>, vector<128x128xf32>
    %cst_155 = arith.constant dense<0.000000e+00> : vector<8x128xf32>
    %269 = tpu.matmul %263, %268, %cst_155 {dimension_numbers = #tpu.dot_dimension_numbers<[1], [0], [0], [1], [0, 0, 1, 1], [], []>} : vector<8x128xf32>, vector<128x128xf32>, vector<8x128xf32> -> vector<8x128xf32>
    %270 = vector.extract_strided_slice %267 {offsets = [0, 0], sizes = [8, 128], strides = [1, 1]} : vector<8x512xf32> to vector<8x128xf32>
    %c0_156 = arith.constant 0 : index
    %c0_157 = arith.constant 0 : index
    %271 = vector.load %arg4[%c0_156, %c0_157] : memref<1x512xf32, #tpu.memory_space<vmem>>, vector<1x128xf32>
    %272 = vector.broadcast %271 : vector<1x128xf32> to vector<8x128xf32>
    %273 = arith.addf %270, %272 : vector<8x128xf32>
    %274 = arith.addf %273, %269 : vector<8x128xf32>
    %275 = arith.negf %274 : vector<8x128xf32>
    %276 = math.exp %275 : vector<8x128xf32>
    %cst_158 = arith.constant 1.000000e+00 : f32
    %277 = vector.broadcast %cst_158 : f32 to vector<8x128xf32>
    %278 = arith.addf %277, %276 : vector<8x128xf32>
    %279 = arith.divf %277, %278 : vector<8x128xf32>
    %c0_159 = arith.constant 0 : index
    %c128_160 = arith.constant 128 : index
    %280 = vector.load %arg3[%c0_159, %c128_160] : memref<128x512xf32, #tpu.memory_space<vmem>>, vector<128x128xf32>
    %cst_161 = arith.constant dense<0.000000e+00> : vector<8x128xf32>
    %281 = tpu.matmul %263, %280, %cst_161 {dimension_numbers = #tpu.dot_dimension_numbers<[1], [0], [0], [1], [0, 0, 1, 1], [], []>} : vector<8x128xf32>, vector<128x128xf32>, vector<8x128xf32> -> vector<8x128xf32>
    %282 = vector.extract_strided_slice %267 {offsets = [0, 128], sizes = [8, 128], strides = [1, 1]} : vector<8x512xf32> to vector<8x128xf32>
    %c0_162 = arith.constant 0 : index
    %c128_163 = arith.constant 128 : index
    %283 = vector.load %arg4[%c0_162, %c128_163] : memref<1x512xf32, #tpu.memory_space<vmem>>, vector<1x128xf32>
    %284 = vector.broadcast %283 : vector<1x128xf32> to vector<8x128xf32>
    %285 = arith.addf %282, %284 : vector<8x128xf32>
    %286 = arith.addf %285, %281 : vector<8x128xf32>
    %287 = arith.negf %286 : vector<8x128xf32>
    %288 = math.exp %287 : vector<8x128xf32>
    %cst_164 = arith.constant 1.000000e+00 : f32
    %289 = vector.broadcast %cst_164 : f32 to vector<8x128xf32>
    %290 = arith.addf %289, %288 : vector<8x128xf32>
    %291 = arith.divf %289, %290 : vector<8x128xf32>
    %c0_165 = arith.constant 0 : index
    %c256_166 = arith.constant 256 : index
    %292 = vector.load %arg3[%c0_165, %c256_166] : memref<128x512xf32, #tpu.memory_space<vmem>>, vector<128x128xf32>
    %cst_167 = arith.constant dense<0.000000e+00> : vector<8x128xf32>
    %293 = tpu.matmul %263, %292, %cst_167 {dimension_numbers = #tpu.dot_dimension_numbers<[1], [0], [0], [1], [0, 0, 1, 1], [], []>} : vector<8x128xf32>, vector<128x128xf32>, vector<8x128xf32> -> vector<8x128xf32>
    %294 = vector.extract_strided_slice %267 {offsets = [0, 256], sizes = [8, 128], strides = [1, 1]} : vector<8x512xf32> to vector<8x128xf32>
    %c0_168 = arith.constant 0 : index
    %c256_169 = arith.constant 256 : index
    %295 = vector.load %arg4[%c0_168, %c256_169] : memref<1x512xf32, #tpu.memory_space<vmem>>, vector<1x128xf32>
    %296 = vector.broadcast %295 : vector<1x128xf32> to vector<8x128xf32>
    %297 = arith.addf %294, %296 : vector<8x128xf32>
    %298 = arith.addf %297, %293 : vector<8x128xf32>
    %299 = math.tanh %298 : vector<8x128xf32>
    %c0_170 = arith.constant 0 : index
    %c384_171 = arith.constant 384 : index
    %300 = vector.load %arg3[%c0_170, %c384_171] : memref<128x512xf32, #tpu.memory_space<vmem>>, vector<128x128xf32>
    %cst_172 = arith.constant dense<0.000000e+00> : vector<8x128xf32>
    %301 = tpu.matmul %263, %300, %cst_172 {dimension_numbers = #tpu.dot_dimension_numbers<[1], [0], [0], [1], [0, 0, 1, 1], [], []>} : vector<8x128xf32>, vector<128x128xf32>, vector<8x128xf32> -> vector<8x128xf32>
    %302 = vector.extract_strided_slice %267 {offsets = [0, 384], sizes = [8, 128], strides = [1, 1]} : vector<8x512xf32> to vector<8x128xf32>
    %c0_173 = arith.constant 0 : index
    %c384_174 = arith.constant 384 : index
    %303 = vector.load %arg4[%c0_173, %c384_174] : memref<1x512xf32, #tpu.memory_space<vmem>>, vector<1x128xf32>
    %304 = vector.broadcast %303 : vector<1x128xf32> to vector<8x128xf32>
    %305 = arith.addf %302, %304 : vector<8x128xf32>
    %306 = arith.addf %305, %301 : vector<8x128xf32>
    %307 = arith.negf %306 : vector<8x128xf32>
    %308 = math.exp %307 : vector<8x128xf32>
    %cst_175 = arith.constant 1.000000e+00 : f32
    %309 = vector.broadcast %cst_175 : f32 to vector<8x128xf32>
    %310 = arith.addf %309, %308 : vector<8x128xf32>
    %311 = arith.divf %309, %310 : vector<8x128xf32>
    %312 = arith.mulf %291, %264 : vector<8x128xf32>
    %313 = arith.mulf %279, %299 : vector<8x128xf32>
    %314 = arith.addf %312, %313 : vector<8x128xf32>
    %315 = math.tanh %314 : vector<8x128xf32>
    %316 = arith.mulf %311, %315 : vector<8x128xf32>
    %c0_176 = arith.constant 0 : index
    %c0_177 = arith.constant 0 : index
    %317 = vector.load %arg7[%c0_176, %c0_177] : memref<8x128xf32, #tpu.memory_space<vmem>>, vector<8x128xf32>
    tpu.vector_store %arg7[%c0_176, %c0_177], %316 {strides = array<i32>} : memref<8x128xf32, #tpu.memory_space<vmem>>, vector<8x128xf32>,
    %c0_178 = arith.constant 0 : index
    %c0_179 = arith.constant 0 : index
    %318 = vector.load %arg8[%c0_178, %c0_179] : memref<8x128xf32, #tpu.memory_space<vmem>>, vector<8x128xf32>
    tpu.vector_store %arg8[%c0_178, %c0_179], %314 {strides = array<i32>} : memref<8x128xf32, #tpu.memory_space<vmem>>, vector<8x128xf32>,
    %319 = arith.index_cast %c4_i32 : i32 to index
    %c0_180 = arith.constant 0 : index
    %c0_181 = arith.constant 0 : index
    %320 = vector.load %arg5[%319, %c0_180, %c0_181] : memref<8x8x128xf32, #tpu.memory_space<vmem>>, vector<1x8x128xf32>
    %321 = vector.shape_cast %320 : vector<1x8x128xf32> to vector<8x128xf32>
    %322 = vector.shape_cast %316 : vector<8x128xf32> to vector<1x8x128xf32>
    tpu.vector_store %arg5[%319, %c0_180, %c0_181], %322 {strides = array<i32>} : memref<8x8x128xf32, #tpu.memory_space<vmem>>, vector<1x8x128xf32>,
    %c8_i32_182 = arith.constant 8 : i32
    %323 = arith.muli %arg1, %c8_i32_182 : i32
    %324 = arith.addi %323, %c4_i32 : i32
    %c7_i32_183 = arith.constant 7 : i32
    %325 = arith.cmpi eq, %324, %c7_i32_183 : i32
    %326 = arith.extui %325 : i1 to i32
    %c0_i32_184 = arith.constant 0 : i32
    %327 = arith.cmpi ne, %326, %c0_i32_184 : i32
    scf.if %327 {
      %c0_301 = arith.constant 0 : index
      %c0_302 = arith.constant 0 : index
      %523 = vector.load %arg6[%c0_301, %c0_302] : memref<8x128xf32, #tpu.memory_space<vmem>>, vector<8x128xf32>
      tpu.vector_store %arg6[%c0_301, %c0_302], %314 {strides = array<i32>} : memref<8x128xf32, #tpu.memory_space<vmem>>, vector<8x128xf32>,
    } else {
    }
    %c5_i32 = arith.constant 5 : i32
    %c0_185 = arith.constant 0 : index
    %c0_186 = arith.constant 0 : index
    %328 = vector.load %arg7[%c0_185, %c0_186] : memref<8x128xf32, #tpu.memory_space<vmem>>, vector<8x128xf32>
    %c0_187 = arith.constant 0 : index
    %c0_188 = arith.constant 0 : index
    %329 = vector.load %arg8[%c0_187, %c0_188] : memref<8x128xf32, #tpu.memory_space<vmem>>, vector<8x128xf32>
    %330 = arith.index_cast %c5_i32 : i32 to index
    %c0_189 = arith.constant 0 : index
    %c0_190 = arith.constant 0 : index
    %331 = vector.load %arg2[%330, %c0_189, %c0_190] : memref<8x8x512xf32, #tpu.memory_space<vmem>>, vector<1x8x512xf32>
    %332 = vector.shape_cast %331 : vector<1x8x512xf32> to vector<8x512xf32>
    %c0_191 = arith.constant 0 : index
    %c0_192 = arith.constant 0 : index
    %333 = vector.load %arg3[%c0_191, %c0_192] : memref<128x512xf32, #tpu.memory_space<vmem>>, vector<128x128xf32>
    %cst_193 = arith.constant dense<0.000000e+00> : vector<8x128xf32>
    %334 = tpu.matmul %328, %333, %cst_193 {dimension_numbers = #tpu.dot_dimension_numbers<[1], [0], [0], [1], [0, 0, 1, 1], [], []>} : vector<8x128xf32>, vector<128x128xf32>, vector<8x128xf32> -> vector<8x128xf32>
    %335 = vector.extract_strided_slice %332 {offsets = [0, 0], sizes = [8, 128], strides = [1, 1]} : vector<8x512xf32> to vector<8x128xf32>
    %c0_194 = arith.constant 0 : index
    %c0_195 = arith.constant 0 : index
    %336 = vector.load %arg4[%c0_194, %c0_195] : memref<1x512xf32, #tpu.memory_space<vmem>>, vector<1x128xf32>
    %337 = vector.broadcast %336 : vector<1x128xf32> to vector<8x128xf32>
    %338 = arith.addf %335, %337 : vector<8x128xf32>
    %339 = arith.addf %338, %334 : vector<8x128xf32>
    %340 = arith.negf %339 : vector<8x128xf32>
    %341 = math.exp %340 : vector<8x128xf32>
    %cst_196 = arith.constant 1.000000e+00 : f32
    %342 = vector.broadcast %cst_196 : f32 to vector<8x128xf32>
    %343 = arith.addf %342, %341 : vector<8x128xf32>
    %344 = arith.divf %342, %343 : vector<8x128xf32>
    %c0_197 = arith.constant 0 : index
    %c128_198 = arith.constant 128 : index
    %345 = vector.load %arg3[%c0_197, %c128_198] : memref<128x512xf32, #tpu.memory_space<vmem>>, vector<128x128xf32>
    %cst_199 = arith.constant dense<0.000000e+00> : vector<8x128xf32>
    %346 = tpu.matmul %328, %345, %cst_199 {dimension_numbers = #tpu.dot_dimension_numbers<[1], [0], [0], [1], [0, 0, 1, 1], [], []>} : vector<8x128xf32>, vector<128x128xf32>, vector<8x128xf32> -> vector<8x128xf32>
    %347 = vector.extract_strided_slice %332 {offsets = [0, 128], sizes = [8, 128], strides = [1, 1]} : vector<8x512xf32> to vector<8x128xf32>
    %c0_200 = arith.constant 0 : index
    %c128_201 = arith.constant 128 : index
    %348 = vector.load %arg4[%c0_200, %c128_201] : memref<1x512xf32, #tpu.memory_space<vmem>>, vector<1x128xf32>
    %349 = vector.broadcast %348 : vector<1x128xf32> to vector<8x128xf32>
    %350 = arith.addf %347, %349 : vector<8x128xf32>
    %351 = arith.addf %350, %346 : vector<8x128xf32>
    %352 = arith.negf %351 : vector<8x128xf32>
    %353 = math.exp %352 : vector<8x128xf32>
    %cst_202 = arith.constant 1.000000e+00 : f32
    %354 = vector.broadcast %cst_202 : f32 to vector<8x128xf32>
    %355 = arith.addf %354, %353 : vector<8x128xf32>
    %356 = arith.divf %354, %355 : vector<8x128xf32>
    %c0_203 = arith.constant 0 : index
    %c256_204 = arith.constant 256 : index
    %357 = vector.load %arg3[%c0_203, %c256_204] : memref<128x512xf32, #tpu.memory_space<vmem>>, vector<128x128xf32>
    %cst_205 = arith.constant dense<0.000000e+00> : vector<8x128xf32>
    %358 = tpu.matmul %328, %357, %cst_205 {dimension_numbers = #tpu.dot_dimension_numbers<[1], [0], [0], [1], [0, 0, 1, 1], [], []>} : vector<8x128xf32>, vector<128x128xf32>, vector<8x128xf32> -> vector<8x128xf32>
    %359 = vector.extract_strided_slice %332 {offsets = [0, 256], sizes = [8, 128], strides = [1, 1]} : vector<8x512xf32> to vector<8x128xf32>
    %c0_206 = arith.constant 0 : index
    %c256_207 = arith.constant 256 : index
    %360 = vector.load %arg4[%c0_206, %c256_207] : memref<1x512xf32, #tpu.memory_space<vmem>>, vector<1x128xf32>
    %361 = vector.broadcast %360 : vector<1x128xf32> to vector<8x128xf32>
    %362 = arith.addf %359, %361 : vector<8x128xf32>
    %363 = arith.addf %362, %358 : vector<8x128xf32>
    %364 = math.tanh %363 : vector<8x128xf32>
    %c0_208 = arith.constant 0 : index
    %c384_209 = arith.constant 384 : index
    %365 = vector.load %arg3[%c0_208, %c384_209] : memref<128x512xf32, #tpu.memory_space<vmem>>, vector<128x128xf32>
    %cst_210 = arith.constant dense<0.000000e+00> : vector<8x128xf32>
    %366 = tpu.matmul %328, %365, %cst_210 {dimension_numbers = #tpu.dot_dimension_numbers<[1], [0], [0], [1], [0, 0, 1, 1], [], []>} : vector<8x128xf32>, vector<128x128xf32>, vector<8x128xf32> -> vector<8x128xf32>
    %367 = vector.extract_strided_slice %332 {offsets = [0, 384], sizes = [8, 128], strides = [1, 1]} : vector<8x512xf32> to vector<8x128xf32>
    %c0_211 = arith.constant 0 : index
    %c384_212 = arith.constant 384 : index
    %368 = vector.load %arg4[%c0_211, %c384_212] : memref<1x512xf32, #tpu.memory_space<vmem>>, vector<1x128xf32>
    %369 = vector.broadcast %368 : vector<1x128xf32> to vector<8x128xf32>
    %370 = arith.addf %367, %369 : vector<8x128xf32>
    %371 = arith.addf %370, %366 : vector<8x128xf32>
    %372 = arith.negf %371 : vector<8x128xf32>
    %373 = math.exp %372 : vector<8x128xf32>
    %cst_213 = arith.constant 1.000000e+00 : f32
    %374 = vector.broadcast %cst_213 : f32 to vector<8x128xf32>
    %375 = arith.addf %374, %373 : vector<8x128xf32>
    %376 = arith.divf %374, %375 : vector<8x128xf32>
    %377 = arith.mulf %356, %329 : vector<8x128xf32>
    %378 = arith.mulf %344, %364 : vector<8x128xf32>
    %379 = arith.addf %377, %378 : vector<8x128xf32>
    %380 = math.tanh %379 : vector<8x128xf32>
    %381 = arith.mulf %376, %380 : vector<8x128xf32>
    %c0_214 = arith.constant 0 : index
    %c0_215 = arith.constant 0 : index
    %382 = vector.load %arg7[%c0_214, %c0_215] : memref<8x128xf32, #tpu.memory_space<vmem>>, vector<8x128xf32>
    tpu.vector_store %arg7[%c0_214, %c0_215], %381 {strides = array<i32>} : memref<8x128xf32, #tpu.memory_space<vmem>>, vector<8x128xf32>,
    %c0_216 = arith.constant 0 : index
    %c0_217 = arith.constant 0 : index
    %383 = vector.load %arg8[%c0_216, %c0_217] : memref<8x128xf32, #tpu.memory_space<vmem>>, vector<8x128xf32>
    tpu.vector_store %arg8[%c0_216, %c0_217], %379 {strides = array<i32>} : memref<8x128xf32, #tpu.memory_space<vmem>>, vector<8x128xf32>,
    %384 = arith.index_cast %c5_i32 : i32 to index
    %c0_218 = arith.constant 0 : index
    %c0_219 = arith.constant 0 : index
    %385 = vector.load %arg5[%384, %c0_218, %c0_219] : memref<8x8x128xf32, #tpu.memory_space<vmem>>, vector<1x8x128xf32>
    %386 = vector.shape_cast %385 : vector<1x8x128xf32> to vector<8x128xf32>
    %387 = vector.shape_cast %381 : vector<8x128xf32> to vector<1x8x128xf32>
    tpu.vector_store %arg5[%384, %c0_218, %c0_219], %387 {strides = array<i32>} : memref<8x8x128xf32, #tpu.memory_space<vmem>>, vector<1x8x128xf32>,
    %c8_i32_220 = arith.constant 8 : i32
    %388 = arith.muli %arg1, %c8_i32_220 : i32
    %389 = arith.addi %388, %c5_i32 : i32
    %c7_i32_221 = arith.constant 7 : i32
    %390 = arith.cmpi eq, %389, %c7_i32_221 : i32
    %391 = arith.extui %390 : i1 to i32
    %c0_i32_222 = arith.constant 0 : i32
    %392 = arith.cmpi ne, %391, %c0_i32_222 : i32
    scf.if %392 {
      %c0_301 = arith.constant 0 : index
      %c0_302 = arith.constant 0 : index
      %523 = vector.load %arg6[%c0_301, %c0_302] : memref<8x128xf32, #tpu.memory_space<vmem>>, vector<8x128xf32>
      tpu.vector_store %arg6[%c0_301, %c0_302], %379 {strides = array<i32>} : memref<8x128xf32, #tpu.memory_space<vmem>>, vector<8x128xf32>,
    } else {
    }
    %c6_i32 = arith.constant 6 : i32
    %c0_223 = arith.constant 0 : index
    %c0_224 = arith.constant 0 : index
    %393 = vector.load %arg7[%c0_223, %c0_224] : memref<8x128xf32, #tpu.memory_space<vmem>>, vector<8x128xf32>
    %c0_225 = arith.constant 0 : index
    %c0_226 = arith.constant 0 : index
    %394 = vector.load %arg8[%c0_225, %c0_226] : memref<8x128xf32, #tpu.memory_space<vmem>>, vector<8x128xf32>
    %395 = arith.index_cast %c6_i32 : i32 to index
    %c0_227 = arith.constant 0 : index
    %c0_228 = arith.constant 0 : index
    %396 = vector.load %arg2[%395, %c0_227, %c0_228] : memref<8x8x512xf32, #tpu.memory_space<vmem>>, vector<1x8x512xf32>
    %397 = vector.shape_cast %396 : vector<1x8x512xf32> to vector<8x512xf32>
    %c0_229 = arith.constant 0 : index
    %c0_230 = arith.constant 0 : index
    %398 = vector.load %arg3[%c0_229, %c0_230] : memref<128x512xf32, #tpu.memory_space<vmem>>, vector<128x128xf32>
    %cst_231 = arith.constant dense<0.000000e+00> : vector<8x128xf32>
    %399 = tpu.matmul %393, %398, %cst_231 {dimension_numbers = #tpu.dot_dimension_numbers<[1], [0], [0], [1], [0, 0, 1, 1], [], []>} : vector<8x128xf32>, vector<128x128xf32>, vector<8x128xf32> -> vector<8x128xf32>
    %400 = vector.extract_strided_slice %397 {offsets = [0, 0], sizes = [8, 128], strides = [1, 1]} : vector<8x512xf32> to vector<8x128xf32>
    %c0_232 = arith.constant 0 : index
    %c0_233 = arith.constant 0 : index
    %401 = vector.load %arg4[%c0_232, %c0_233] : memref<1x512xf32, #tpu.memory_space<vmem>>, vector<1x128xf32>
    %402 = vector.broadcast %401 : vector<1x128xf32> to vector<8x128xf32>
    %403 = arith.addf %400, %402 : vector<8x128xf32>
    %404 = arith.addf %403, %399 : vector<8x128xf32>
    %405 = arith.negf %404 : vector<8x128xf32>
    %406 = math.exp %405 : vector<8x128xf32>
    %cst_234 = arith.constant 1.000000e+00 : f32
    %407 = vector.broadcast %cst_234 : f32 to vector<8x128xf32>
    %408 = arith.addf %407, %406 : vector<8x128xf32>
    %409 = arith.divf %407, %408 : vector<8x128xf32>
    %c0_235 = arith.constant 0 : index
    %c128_236 = arith.constant 128 : index
    %410 = vector.load %arg3[%c0_235, %c128_236] : memref<128x512xf32, #tpu.memory_space<vmem>>, vector<128x128xf32>
    %cst_237 = arith.constant dense<0.000000e+00> : vector<8x128xf32>
    %411 = tpu.matmul %393, %410, %cst_237 {dimension_numbers = #tpu.dot_dimension_numbers<[1], [0], [0], [1], [0, 0, 1, 1], [], []>} : vector<8x128xf32>, vector<128x128xf32>, vector<8x128xf32> -> vector<8x128xf32>
    %412 = vector.extract_strided_slice %397 {offsets = [0, 128], sizes = [8, 128], strides = [1, 1]} : vector<8x512xf32> to vector<8x128xf32>
    %c0_238 = arith.constant 0 : index
    %c128_239 = arith.constant 128 : index
    %413 = vector.load %arg4[%c0_238, %c128_239] : memref<1x512xf32, #tpu.memory_space<vmem>>, vector<1x128xf32>
    %414 = vector.broadcast %413 : vector<1x128xf32> to vector<8x128xf32>
    %415 = arith.addf %412, %414 : vector<8x128xf32>
    %416 = arith.addf %415, %411 : vector<8x128xf32>
    %417 = arith.negf %416 : vector<8x128xf32>
    %418 = math.exp %417 : vector<8x128xf32>
    %cst_240 = arith.constant 1.000000e+00 : f32
    %419 = vector.broadcast %cst_240 : f32 to vector<8x128xf32>
    %420 = arith.addf %419, %418 : vector<8x128xf32>
    %421 = arith.divf %419, %420 : vector<8x128xf32>
    %c0_241 = arith.constant 0 : index
    %c256_242 = arith.constant 256 : index
    %422 = vector.load %arg3[%c0_241, %c256_242] : memref<128x512xf32, #tpu.memory_space<vmem>>, vector<128x128xf32>
    %cst_243 = arith.constant dense<0.000000e+00> : vector<8x128xf32>
    %423 = tpu.matmul %393, %422, %cst_243 {dimension_numbers = #tpu.dot_dimension_numbers<[1], [0], [0], [1], [0, 0, 1, 1], [], []>} : vector<8x128xf32>, vector<128x128xf32>, vector<8x128xf32> -> vector<8x128xf32>
    %424 = vector.extract_strided_slice %397 {offsets = [0, 256], sizes = [8, 128], strides = [1, 1]} : vector<8x512xf32> to vector<8x128xf32>
    %c0_244 = arith.constant 0 : index
    %c256_245 = arith.constant 256 : index
    %425 = vector.load %arg4[%c0_244, %c256_245] : memref<1x512xf32, #tpu.memory_space<vmem>>, vector<1x128xf32>
    %426 = vector.broadcast %425 : vector<1x128xf32> to vector<8x128xf32>
    %427 = arith.addf %424, %426 : vector<8x128xf32>
    %428 = arith.addf %427, %423 : vector<8x128xf32>
    %429 = math.tanh %428 : vector<8x128xf32>
    %c0_246 = arith.constant 0 : index
    %c384_247 = arith.constant 384 : index
    %430 = vector.load %arg3[%c0_246, %c384_247] : memref<128x512xf32, #tpu.memory_space<vmem>>, vector<128x128xf32>
    %cst_248 = arith.constant dense<0.000000e+00> : vector<8x128xf32>
    %431 = tpu.matmul %393, %430, %cst_248 {dimension_numbers = #tpu.dot_dimension_numbers<[1], [0], [0], [1], [0, 0, 1, 1], [], []>} : vector<8x128xf32>, vector<128x128xf32>, vector<8x128xf32> -> vector<8x128xf32>
    %432 = vector.extract_strided_slice %397 {offsets = [0, 384], sizes = [8, 128], strides = [1, 1]} : vector<8x512xf32> to vector<8x128xf32>
    %c0_249 = arith.constant 0 : index
    %c384_250 = arith.constant 384 : index
    %433 = vector.load %arg4[%c0_249, %c384_250] : memref<1x512xf32, #tpu.memory_space<vmem>>, vector<1x128xf32>
    %434 = vector.broadcast %433 : vector<1x128xf32> to vector<8x128xf32>
    %435 = arith.addf %432, %434 : vector<8x128xf32>
    %436 = arith.addf %435, %431 : vector<8x128xf32>
    %437 = arith.negf %436 : vector<8x128xf32>
    %438 = math.exp %437 : vector<8x128xf32>
    %cst_251 = arith.constant 1.000000e+00 : f32
    %439 = vector.broadcast %cst_251 : f32 to vector<8x128xf32>
    %440 = arith.addf %439, %438 : vector<8x128xf32>
    %441 = arith.divf %439, %440 : vector<8x128xf32>
    %442 = arith.mulf %421, %394 : vector<8x128xf32>
    %443 = arith.mulf %409, %429 : vector<8x128xf32>
    %444 = arith.addf %442, %443 : vector<8x128xf32>
    %445 = math.tanh %444 : vector<8x128xf32>
    %446 = arith.mulf %441, %445 : vector<8x128xf32>
    %c0_252 = arith.constant 0 : index
    %c0_253 = arith.constant 0 : index
    %447 = vector.load %arg7[%c0_252, %c0_253] : memref<8x128xf32, #tpu.memory_space<vmem>>, vector<8x128xf32>
    tpu.vector_store %arg7[%c0_252, %c0_253], %446 {strides = array<i32>} : memref<8x128xf32, #tpu.memory_space<vmem>>, vector<8x128xf32>,
    %c0_254 = arith.constant 0 : index
    %c0_255 = arith.constant 0 : index
    %448 = vector.load %arg8[%c0_254, %c0_255] : memref<8x128xf32, #tpu.memory_space<vmem>>, vector<8x128xf32>
    tpu.vector_store %arg8[%c0_254, %c0_255], %444 {strides = array<i32>} : memref<8x128xf32, #tpu.memory_space<vmem>>, vector<8x128xf32>,
    %449 = arith.index_cast %c6_i32 : i32 to index
    %c0_256 = arith.constant 0 : index
    %c0_257 = arith.constant 0 : index
    %450 = vector.load %arg5[%449, %c0_256, %c0_257] : memref<8x8x128xf32, #tpu.memory_space<vmem>>, vector<1x8x128xf32>
    %451 = vector.shape_cast %450 : vector<1x8x128xf32> to vector<8x128xf32>
    %452 = vector.shape_cast %446 : vector<8x128xf32> to vector<1x8x128xf32>
    tpu.vector_store %arg5[%449, %c0_256, %c0_257], %452 {strides = array<i32>} : memref<8x8x128xf32, #tpu.memory_space<vmem>>, vector<1x8x128xf32>,
    %c8_i32_258 = arith.constant 8 : i32
    %453 = arith.muli %arg1, %c8_i32_258 : i32
    %454 = arith.addi %453, %c6_i32 : i32
    %c7_i32_259 = arith.constant 7 : i32
    %455 = arith.cmpi eq, %454, %c7_i32_259 : i32
    %456 = arith.extui %455 : i1 to i32
    %c0_i32_260 = arith.constant 0 : i32
    %457 = arith.cmpi ne, %456, %c0_i32_260 : i32
    scf.if %457 {
      %c0_301 = arith.constant 0 : index
      %c0_302 = arith.constant 0 : index
      %523 = vector.load %arg6[%c0_301, %c0_302] : memref<8x128xf32, #tpu.memory_space<vmem>>, vector<8x128xf32>
      tpu.vector_store %arg6[%c0_301, %c0_302], %444 {strides = array<i32>} : memref<8x128xf32, #tpu.memory_space<vmem>>, vector<8x128xf32>,
    } else {
    }
    %c7_i32_261 = arith.constant 7 : i32
    %c0_262 = arith.constant 0 : index
    %c0_263 = arith.constant 0 : index
    %458 = vector.load %arg7[%c0_262, %c0_263] : memref<8x128xf32, #tpu.memory_space<vmem>>, vector<8x128xf32>
    %c0_264 = arith.constant 0 : index
    %c0_265 = arith.constant 0 : index
    %459 = vector.load %arg8[%c0_264, %c0_265] : memref<8x128xf32, #tpu.memory_space<vmem>>, vector<8x128xf32>
    %460 = arith.index_cast %c7_i32_261 : i32 to index
    %c0_266 = arith.constant 0 : index
    %c0_267 = arith.constant 0 : index
    %461 = vector.load %arg2[%460, %c0_266, %c0_267] : memref<8x8x512xf32, #tpu.memory_space<vmem>>, vector<1x8x512xf32>
    %462 = vector.shape_cast %461 : vector<1x8x512xf32> to vector<8x512xf32>
    %c0_268 = arith.constant 0 : index
    %c0_269 = arith.constant 0 : index
    %463 = vector.load %arg3[%c0_268, %c0_269] : memref<128x512xf32, #tpu.memory_space<vmem>>, vector<128x128xf32>
    %cst_270 = arith.constant dense<0.000000e+00> : vector<8x128xf32>
    %464 = tpu.matmul %458, %463, %cst_270 {dimension_numbers = #tpu.dot_dimension_numbers<[1], [0], [0], [1], [0, 0, 1, 1], [], []>} : vector<8x128xf32>, vector<128x128xf32>, vector<8x128xf32> -> vector<8x128xf32>
    %465 = vector.extract_strided_slice %462 {offsets = [0, 0], sizes = [8, 128], strides = [1, 1]} : vector<8x512xf32> to vector<8x128xf32>
    %c0_271 = arith.constant 0 : index
    %c0_272 = arith.constant 0 : index
    %466 = vector.load %arg4[%c0_271, %c0_272] : memref<1x512xf32, #tpu.memory_space<vmem>>, vector<1x128xf32>
    %467 = vector.broadcast %466 : vector<1x128xf32> to vector<8x128xf32>
    %468 = arith.addf %465, %467 : vector<8x128xf32>
    %469 = arith.addf %468, %464 : vector<8x128xf32>
    %470 = arith.negf %469 : vector<8x128xf32>
    %471 = math.exp %470 : vector<8x128xf32>
    %cst_273 = arith.constant 1.000000e+00 : f32
    %472 = vector.broadcast %cst_273 : f32 to vector<8x128xf32>
    %473 = arith.addf %472, %471 : vector<8x128xf32>
    %474 = arith.divf %472, %473 : vector<8x128xf32>
    %c0_274 = arith.constant 0 : index
    %c128_275 = arith.constant 128 : index
    %475 = vector.load %arg3[%c0_274, %c128_275] : memref<128x512xf32, #tpu.memory_space<vmem>>, vector<128x128xf32>
    %cst_276 = arith.constant dense<0.000000e+00> : vector<8x128xf32>
    %476 = tpu.matmul %458, %475, %cst_276 {dimension_numbers = #tpu.dot_dimension_numbers<[1], [0], [0], [1], [0, 0, 1, 1], [], []>} : vector<8x128xf32>, vector<128x128xf32>, vector<8x128xf32> -> vector<8x128xf32>
    %477 = vector.extract_strided_slice %462 {offsets = [0, 128], sizes = [8, 128], strides = [1, 1]} : vector<8x512xf32> to vector<8x128xf32>
    %c0_277 = arith.constant 0 : index
    %c128_278 = arith.constant 128 : index
    %478 = vector.load %arg4[%c0_277, %c128_278] : memref<1x512xf32, #tpu.memory_space<vmem>>, vector<1x128xf32>
    %479 = vector.broadcast %478 : vector<1x128xf32> to vector<8x128xf32>
    %480 = arith.addf %477, %479 : vector<8x128xf32>
    %481 = arith.addf %480, %476 : vector<8x128xf32>
    %482 = arith.negf %481 : vector<8x128xf32>
    %483 = math.exp %482 : vector<8x128xf32>
    %cst_279 = arith.constant 1.000000e+00 : f32
    %484 = vector.broadcast %cst_279 : f32 to vector<8x128xf32>
    %485 = arith.addf %484, %483 : vector<8x128xf32>
    %486 = arith.divf %484, %485 : vector<8x128xf32>
    %c0_280 = arith.constant 0 : index
    %c256_281 = arith.constant 256 : index
    %487 = vector.load %arg3[%c0_280, %c256_281] : memref<128x512xf32, #tpu.memory_space<vmem>>, vector<128x128xf32>
    %cst_282 = arith.constant dense<0.000000e+00> : vector<8x128xf32>
    %488 = tpu.matmul %458, %487, %cst_282 {dimension_numbers = #tpu.dot_dimension_numbers<[1], [0], [0], [1], [0, 0, 1, 1], [], []>} : vector<8x128xf32>, vector<128x128xf32>, vector<8x128xf32> -> vector<8x128xf32>
    %489 = vector.extract_strided_slice %462 {offsets = [0, 256], sizes = [8, 128], strides = [1, 1]} : vector<8x512xf32> to vector<8x128xf32>
    %c0_283 = arith.constant 0 : index
    %c256_284 = arith.constant 256 : index
    %490 = vector.load %arg4[%c0_283, %c256_284] : memref<1x512xf32, #tpu.memory_space<vmem>>, vector<1x128xf32>
    %491 = vector.broadcast %490 : vector<1x128xf32> to vector<8x128xf32>
    %492 = arith.addf %489, %491 : vector<8x128xf32>
    %493 = arith.addf %492, %488 : vector<8x128xf32>
    %494 = math.tanh %493 : vector<8x128xf32>
    %c0_285 = arith.constant 0 : index
    %c384_286 = arith.constant 384 : index
    %495 = vector.load %arg3[%c0_285, %c384_286] : memref<128x512xf32, #tpu.memory_space<vmem>>, vector<128x128xf32>
    %cst_287 = arith.constant dense<0.000000e+00> : vector<8x128xf32>
    %496 = tpu.matmul %458, %495, %cst_287 {dimension_numbers = #tpu.dot_dimension_numbers<[1], [0], [0], [1], [0, 0, 1, 1], [], []>} : vector<8x128xf32>, vector<128x128xf32>, vector<8x128xf32> -> vector<8x128xf32>
    %497 = vector.extract_strided_slice %462 {offsets = [0, 384], sizes = [8, 128], strides = [1, 1]} : vector<8x512xf32> to vector<8x128xf32>
    %c0_288 = arith.constant 0 : index
    %c384_289 = arith.constant 384 : index
    %498 = vector.load %arg4[%c0_288, %c384_289] : memref<1x512xf32, #tpu.memory_space<vmem>>, vector<1x128xf32>
    %499 = vector.broadcast %498 : vector<1x128xf32> to vector<8x128xf32>
    %500 = arith.addf %497, %499 : vector<8x128xf32>
    %501 = arith.addf %500, %496 : vector<8x128xf32>
    %502 = arith.negf %501 : vector<8x128xf32>
    %503 = math.exp %502 : vector<8x128xf32>
    %cst_290 = arith.constant 1.000000e+00 : f32
    %504 = vector.broadcast %cst_290 : f32 to vector<8x128xf32>
    %505 = arith.addf %504, %503 : vector<8x128xf32>
    %506 = arith.divf %504, %505 : vector<8x128xf32>
    %507 = arith.mulf %486, %459 : vector<8x128xf32>
    %508 = arith.mulf %474, %494 : vector<8x128xf32>
    %509 = arith.addf %507, %508 : vector<8x128xf32>
    %510 = math.tanh %509 : vector<8x128xf32>
    %511 = arith.mulf %506, %510 : vector<8x128xf32>
    %c0_291 = arith.constant 0 : index
    %c0_292 = arith.constant 0 : index
    %512 = vector.load %arg7[%c0_291, %c0_292] : memref<8x128xf32, #tpu.memory_space<vmem>>, vector<8x128xf32>
    tpu.vector_store %arg7[%c0_291, %c0_292], %511 {strides = array<i32>} : memref<8x128xf32, #tpu.memory_space<vmem>>, vector<8x128xf32>,
    %c0_293 = arith.constant 0 : index
    %c0_294 = arith.constant 0 : index
    %513 = vector.load %arg8[%c0_293, %c0_294] : memref<8x128xf32, #tpu.memory_space<vmem>>, vector<8x128xf32>
    tpu.vector_store %arg8[%c0_293, %c0_294], %509 {strides = array<i32>} : memref<8x128xf32, #tpu.memory_space<vmem>>, vector<8x128xf32>,
    %514 = arith.index_cast %c7_i32_261 : i32 to index
    %c0_295 = arith.constant 0 : index
    %c0_296 = arith.constant 0 : index
    %515 = vector.load %arg5[%514, %c0_295, %c0_296] : memref<8x8x128xf32, #tpu.memory_space<vmem>>, vector<1x8x128xf32>
    %516 = vector.shape_cast %515 : vector<1x8x128xf32> to vector<8x128xf32>
    %517 = vector.shape_cast %511 : vector<8x128xf32> to vector<1x8x128xf32>
    tpu.vector_store %arg5[%514, %c0_295, %c0_296], %517 {strides = array<i32>} : memref<8x8x128xf32, #tpu.memory_space<vmem>>, vector<1x8x128xf32>,
    %c8_i32_297 = arith.constant 8 : i32
    %518 = arith.muli %arg1, %c8_i32_297 : i32
    %519 = arith.addi %518, %c7_i32_261 : i32
    %c7_i32_298 = arith.constant 7 : i32
    %520 = arith.cmpi eq, %519, %c7_i32_298 : i32
    %521 = arith.extui %520 : i1 to i32
    %c0_i32_299 = arith.constant 0 : i32
    %522 = arith.cmpi ne, %521, %c0_i32_299 : i32
    scf.if %522 {
      %c0_301 = arith.constant 0 : index
      %c0_302 = arith.constant 0 : index
      %523 = vector.load %arg6[%c0_301, %c0_302] : memref<8x128xf32, #tpu.memory_space<vmem>>, vector<8x128xf32>
      tpu.vector_store %arg6[%c0_301, %c0_302], %509 {strides = array<i32>} : memref<8x128xf32, #tpu.memory_space<vmem>>, vector<8x128xf32>,
    } else {
    }
    %c8_i32_300 = arith.constant 8 : i32
    return
  }
  func.func @transform_0(%arg0: i32, %arg1: i32) -> (i32, i32, i32) {
    %c0_i32 = arith.constant 0 : i32
    %c0_i32_0 = arith.constant 0 : i32
    return %arg1, %arg0, %c0_i32 : i32, i32, i32
  }
  func.func @transform_1(%arg0: i32, %arg1: i32) -> (i32, i32) {
    %c0_i32 = arith.constant 0 : i32
    %c0_i32_0 = arith.constant 0 : i32
    %c0_i32_1 = arith.constant 0 : i32
    return %c0_i32, %c0_i32_0 : i32, i32
  }
  func.func @transform_2(%arg0: i32, %arg1: i32) -> (i32, i32) {
    %c0_i32 = arith.constant 0 : i32
    %c0_i32_0 = arith.constant 0 : i32
    %c0_i32_1 = arith.constant 0 : i32
    return %c0_i32, %c0_i32_0 : i32, i32
  }
  func.func @transform_3(%arg0: i32, %arg1: i32) -> (i32, i32, i32) {
    %c0_i32 = arith.constant 0 : i32
    %c0_i32_0 = arith.constant 0 : i32
    return %arg1, %arg0, %c0_i32 : i32, i32, i32
  }
  func.func @transform_4(%arg0: i32, %arg1: i32) -> (i32, i32) {
    %c0_i32 = arith.constant 0 : i32
    %c0_i32_0 = arith.constant 0 : i32
    return %arg0, %c0_i32 : i32, i32
  }
}

</mosaic_0001>

<bundles_post_ra>
// kernel: tpu_custom_call.1
= control target key start
LH: loop header
LB: loop body
LE: loop exit
PB: predicated region body
PF: predicated region fallthrough
CT: control target
= control target key end

     0   :  { %10 = vsyncpa [#allocation5], 0  ;;  %s7163_s0 = inlined_call_operand.hbm [shape: f32[8,8,512], index: 0, kind: input, shape index: {}]   ;;  %s7164_s1 = inlined_call_operand.hbm [shape: f32[128,512], index: 1, kind: input, shape index: {}]   ;;  %s7165_s2 = inlined_call_operand.vmem [shape: f32[1,512], index: 2, kind: input, shape index: {}]   ;;  %s7166_s3 = inlined_call_operand.hbm [shape: f32[8,8,128], index: 3, kind: output, shape index: {0}]   ;;  %s7167_s4 = inlined_call_operand.hbm [shape: f32[8,128], index: 4, kind: output, shape index: {1}]  }
   0x1   :  { %11 = vsyncpa [#allocation8], 0 }
   0x2   :  { %12 = vsyncpa [#allocation6], 0 }
   0x3   :  { %13 = vsyncpa [#allocation11], 0  ;;  %s6173_s15 = smov [#allocation4]   ;;  %s6077_s19 = scalar_lea.hbm %s7163_s0, 4096 }
   0x4   :  { %s19_s16 = sshll.u32 %s6173_s15, 4  ;;  %p6078_p0 = scmp.ne.s32.totalorder %s7163_s0, %s6077_s19  ;;  %s20_s16 = int_to_ptr.vmem [resolvable:$true] %s19_s16 }
   0x5   :  { %p6081_p1 = scmp.lt.u32.totalorder %s6077_s19, %s7163_s0 }
   0x7   :  { %p6083_p2 = pnand %p6081_p1, %p6078_p0 }
   0x9   :  { %6086 = shalt.err (!%p6083_p2)
}
   0xa   :  { %s6087_s24 = scalar_lea.vmem %s20_s16, 4096  ;;  %p6092_p4 = scmp.lt.s32.totalorder %s20_s16, %s20_s16 }
   0xb   :  { %p6088_p3 = scmp.ne.s32.totalorder %s20_s16, %s6087_s24  ;;  %p6093_p5 = scmp.lt.s32.totalorder %s6087_s24, %s6087_s24 }
   0xd   :  { %p6094_p6 = por %p6093_p5, %p6092_p4 }
   0xf   :  { %p6095_p7 = pnand %p6094_p6, %p6088_p3 }
  0x11   :  { %6098 = shalt.err (!%p6095_p7)
}
  0x12   :  { %s6174_s25 = smov 512   ;;  %s6175_s26 = smov 32  }
  0x13   :  { %25 = dma.hbm_to_vmem [thread:$0]  %s7163_s0, 4096, %s20_s16, [#allocation5], %s6174_s25, %s6174_s25, %s6175_s26  }
  0x14   :  { %s6176_s29 = smov [#allocation7]   ;;  %s6099_s7 = scalar_lea.hbm %s7164_s1, 8192 }
  0x15   :  { %s31_s30 = sshll.u32 %s6176_s29, 4  ;;  %p6100_p8 = scmp.ne.s32.totalorder %s7164_s1, %s6099_s7  ;;  %s32_s30 = int_to_ptr.vmem [resolvable:$true] %s31_s30 }
  0x16   :  { %p6103_p9 = scmp.lt.u32.totalorder %s6099_s7, %s7164_s1 }
  0x18   :  { %p6105_p10 = pnand %p6103_p9, %p6100_p8 }
  0x1a   :  { %6108 = shalt.err (!%p6105_p10)
}
  0x1b   :  { %s6109_s12 = scalar_lea.vmem %s32_s30, 8192  ;;  %p6114_p12 = scmp.lt.s32.totalorder %s32_s30, %s32_s30 }
  0x1c   :  { %p6110_p11 = scmp.ne.s32.totalorder %s32_s30, %s6109_s12  ;;  %p6115_p13 = scmp.lt.s32.totalorder %s6109_s12, %s6109_s12 }
  0x1e   :  { %p6116_p0 = por %p6115_p13, %p6114_p12 }
  0x20   :  { %p6117_p1 = pnand %p6116_p0, %p6110_p11 }
  0x22   :  { %6120 = shalt.err (!%p6117_p1)
}
  0x23   :  { %37 = dma.hbm_to_vmem [thread:$0]  %s7164_s1, 8192, %s32_s30, [#allocation8], %s6174_s25, %s6174_s25, %s6175_s26  }
  0x24   :  { %6165 = dma.done.wait [#allocation5], 4096  }
  0x25   :  { %6166 = vsyncadd [#allocation5], 4294963200 }
  0x26   :  { %6167 = dma.done.wait [#allocation8], 8192  }
  0x27   :  { %6168 = vsyncadd [#allocation8], 4294959104  ;;  %v6177_v0 = vmov 0.0|0.0   ;;  %vm6178_vm0 = vmmov 0   ;;  %v6179_v1 = vmov 0.0   ;;  %v58_v2 = vld [vmem:[#allocation7] sm:$0xff] }
  0x28   :  { %5170 = vmatprep.subr.bf16.mxu0 %v6177_v0  ;;  %5194 = vmatprep.subr.bf16.mxu1 %v6177_v0  ;;  %v59_v3 = vld [vmem:[#allocation7 + $0x20] sm:$0xff]  ;;  %v159_v4 = vld [vmem:[#allocation7 + $0x8] sm:$0xff]  ;;  %v260_v50 = vld [vmem:[#allocation7 + $0x10] sm:$0xff] }
  0x29   :  { %4082 = vmatprep.mubr.msk.f32.mxu0 %vm6178_vm0, %v6179_v1  ;;  %4117 = vmatprep.mubr.msk.f32.mxu1 %vm6178_vm0, %v6179_v1  ;;  %v6239_v5 = vpack.c.bf16 %v59_v3, %v58_v2  ;;  %v160_v6 = vld [vmem:[#allocation7 + $0x28] sm:$0xff]  ;;  %v60_v7 = vld [vmem:[#allocation7 + $0x40] sm:$0xff]  ;;  %v261_v51 = vld [vmem:[#allocation7 + $0x30] sm:$0xff] }
  0x2a   :  { %v61_v8 = vld [vmem:[#allocation7 + $0x60] sm:$0xff]  ;;  %v6241_v9 = vpack.c.bf16 %v160_v6, %v159_v4  ;;  %v161_v10 = vld [vmem:[#allocation7 + $0x48] sm:$0xff]  ;;  %v356_v52 = vld [vmem:[#allocation7 + $0x18] sm:$0xff]  ;;  %v6300_v54 = vpack.c.bf16 %v261_v51, %v260_v50 }
  0x2b   :  { %v162_v11 = vld [vmem:[#allocation7 + $0x68] sm:$0xff]  ;;  %5172 = vmatpush3.bf16.msra.mxu0 %v6239_v5  ;;  %v6244_v12 = vpack.c.bf16 %v61_v8, %v60_v7  ;;  %v62_v14 = vld [vmem:[#allocation7 + $0x80] sm:$0xff]  ;;  %v357_v53 = vld [vmem:[#allocation7 + $0x38] sm:$0xff] }
  0x2c   :  { %5196 = vmatpush3.bf16.msra.mxu1 %v6241_v9  ;;  %5173 = vmatprep.subr.bf16.mxu0 %v6177_v0  ;;  %v6248_v13 = vpack.c.bf16 %v162_v11, %v161_v10  ;;  %v63_v15 = vld [vmem:[#allocation7 + $0xa0] sm:$0xff]  ;;  %v163_v16 = vld [vmem:[#allocation7 + $0x88] sm:$0xff]  ;;  %v6304_v55 = vpack.c.bf16 %v357_v53, %v356_v52  ;;  %v262_v56 = vld [vmem:[#allocation7 + $0x50] sm:$0xff] }
  0x2d   :  { %5197 = vmatprep.subr.bf16.mxu1 %v6177_v0  ;;  %v164_v17 = vld [vmem:[#allocation7 + $0xa8] sm:$0xff]  ;;  %v6252_v18 = vpack.c.bf16 %v63_v15, %v62_v14  ;;  %v64_v20 = vld [vmem:[#allocation7 + $0xc0] sm:$0xff]  ;;  %v263_v57 = vld [vmem:[#allocation7 + $0x70] sm:$0xff] }
  0x2e   :  { %v6256_v19 = vpack.c.bf16 %v164_v17, %v163_v16  ;;  %v65_v21 = vld [vmem:[#allocation7 + $0xe0] sm:$0xff]  ;;  %v165_v22 = vld [vmem:[#allocation7 + $0xc8] sm:$0xff]  ;;  %v358_v58 = vld [vmem:[#allocation7 + $0x58] sm:$0xff]  ;;  %v6310_v60 = vpack.c.bf16 %v263_v57, %v262_v56 }
  0x2f   :  { %5175 = vmatpush3.bf16.msra.mxu0 %v6244_v12  ;;  %v166_v23 = vld [vmem:[#allocation7 + $0xe8] sm:$0xff]  ;;  %v6260_v24 = vpack.c.bf16 %v65_v21, %v64_v20  ;;  %v66_v26 = vld [vmem:[#allocation7 + $0x100] sm:$0xff]  ;;  %v359_v59 = vld [vmem:[#allocation7 + $0x78] sm:$0xff] }
  0x30   :  { %5199 = vmatpush3.bf16.msra.mxu1 %v6248_v13  ;;  %5176 = vmatprep.subr.bf16.mxu0 %v6177_v0  ;;  %v6264_v25 = vpack.c.bf16 %v166_v23, %v165_v22  ;;  %v67_v27 = vld [vmem:[#allocation7 + $0x120] sm:$0xff]  ;;  %v167_v28 = vld [vmem:[#allocation7 + $0x108] sm:$0xff]  ;;  %v6314_v61 = vpack.c.bf16 %v359_v59, %v358_v58  ;;  %v264_v62 = vld [vmem:[#allocation7 + $0x90] sm:$0xff] }
  0x31   :  { %5200 = vmatprep.subr.bf16.mxu1 %v6177_v0  ;;  %v168_v29 = vld [vmem:[#allocation7 + $0x128] sm:$0xff]  ;;  %v6268_v30 = vpack.c.bf16 %v67_v27, %v66_v26  ;;  %v68_v32 = vld [vmem:[#allocation7 + $0x140] sm:$0xff]  ;;  %v265_v63 = vld [vmem:[#allocation7 + $0xb0] sm:$0xff] }
  0x32   :  { %v6272_v31 = vpack.c.bf16 %v168_v29, %v167_v28  ;;  %v69_v33 = vld [vmem:[#allocation7 + $0x160] sm:$0xff]  ;;  %v169_v34 = vld [vmem:[#allocation7 + $0x148] sm:$0xff]  ;;  %v360_v2 = vld [vmem:[#allocation7 + $0x98] sm:$0xff]  ;;  %v6322_v4 = vpack.c.bf16 %v265_v63, %v264_v62 }
  0x33   :  { %5178 = vmatpush3.bf16.msra.mxu0 %v6252_v18  ;;  %v170_v35 = vld [vmem:[#allocation7 + $0x168] sm:$0xff]  ;;  %v6276_v36 = vpack.c.bf16 %v69_v33, %v68_v32  ;;  %v70_v38 = vld [vmem:[#allocation7 + $0x180] sm:$0xff]  ;;  %v361_v3 = vld [vmem:[#allocation7 + $0xb8] sm:$0xff] }
  0x34   :  { %5202 = vmatpush3.bf16.msra.mxu1 %v6256_v19  ;;  %5179 = vmatprep.subr.bf16.mxu0 %v6177_v0  ;;  %v6280_v37 = vpack.c.bf16 %v170_v35, %v169_v34  ;;  %v71_v39 = vld [vmem:[#allocation7 + $0x1a0] sm:$0xff]  ;;  %v171_v40 = vld [vmem:[#allocation7 + $0x188] sm:$0xff]  ;;  %v6326_v6 = vpack.c.bf16 %v361_v3, %v360_v2  ;;  %v266_v7 = vld [vmem:[#allocation7 + $0xd0] sm:$0xff] }
  0x35   :  { %5203 = vmatprep.subr.bf16.mxu1 %v6177_v0  ;;  %v172_v41 = vld [vmem:[#allocation7 + $0x1a8] sm:$0xff]  ;;  %v6284_v42 = vpack.c.bf16 %v71_v39, %v70_v38  ;;  %v72_v44 = vld [vmem:[#allocation7 + $0x1c0] sm:$0xff]  ;;  %v267_v8 = vld [vmem:[#allocation7 + $0xf0] sm:$0xff] }
  0x36   :  { %v6288_v43 = vpack.c.bf16 %v172_v41, %v171_v40  ;;  %v73_v45 = vld [vmem:[#allocation7 + $0x1e0] sm:$0xff]  ;;  %v173_v46 = vld [vmem:[#allocation7 + $0x1c8] sm:$0xff]  ;;  %v362_v10 = vld [vmem:[#allocation7 + $0xd8] sm:$0xff]  ;;  %v6330_v14 = vpack.c.bf16 %v267_v8, %v266_v7 }
  0x37   :  { %5181 = vmatpush3.bf16.msra.mxu0 %v6260_v24  ;;  %v174_v47 = vld [vmem:[#allocation7 + $0x1e8] sm:$0xff]  ;;  %v6292_v48 = vpack.c.bf16 %v73_v45, %v72_v44  ;;  %v363_v11 = vld [vmem:[#allocation7 + $0xf8] sm:$0xff]  ;;  %v268_v16 = vld [vmem:[#allocation7 + $0x110] sm:$0xff] }
  0x38   :  { %5205 = vmatpush3.bf16.msra.mxu1 %v6264_v25  ;;  %5182 = vmatprep.subr.bf16.mxu0 %v6177_v0  ;;  %v6296_v49 = vpack.c.bf16 %v174_v47, %v173_v46  ;;  %v6334_v15 = vpack.c.bf16 %v363_v11, %v362_v10  ;;  %v269_v17 = vld [vmem:[#allocation7 + $0x130] sm:$0xff]  ;;  %v364_v20 = vld [vmem:[#allocation7 + $0x118] sm:$0xff]  ;;  %v55_v53 = vld [vmem:[#allocation4 + $0x8] sm:$0xff] }
  0x39   :  { %5206 = vmatprep.subr.bf16.mxu1 %v6177_v0  ;;  %v365_v21 = vld [vmem:[#allocation7 + $0x138] sm:$0xff]  ;;  %v6338_v22 = vpack.c.bf16 %v269_v17, %v268_v16  ;;  %v270_v26 = vld [vmem:[#allocation7 + $0x150] sm:$0xff]  ;;  %v6414_v57 = vld [vmem:[%s7165_s2 + $0x1] ss:$0 sm:$0xff] }
  0x3a   :  { %v6342_v23 = vpack.c.bf16 %v365_v21, %v364_v20  ;;  %v271_v27 = vld [vmem:[#allocation7 + $0x170] sm:$0xff]  ;;  %v366_v28 = vld [vmem:[#allocation7 + $0x158] sm:$0xff]  ;;  %v54_v59 = vld [vmem:[#allocation4] sm:$0xff]  ;;  %v252_v2 = vadd.f32 %v6414_v57, %v55_v53 }
  0x3b   :  { %5184 = vmatpush3.bf16.msra.mxu0 %v6268_v30  ;;  %v367_v29 = vld [vmem:[#allocation7 + $0x178] sm:$0xff]  ;;  %v6346_v32 = vpack.c.bf16 %v271_v27, %v270_v26  ;;  %v272_v34 = vld [vmem:[#allocation7 + $0x190] sm:$0xff]  ;;  %v6419_v62 = vld [vmem:[%s7165_s2] ss:$0 sm:$0xff] }
  0x3c   :  { %5208 = vmatpush3.bf16.msra.mxu1 %v6272_v31  ;;  %5185 = vmatprep.subr.bf16.mxu0 %v6177_v0  ;;  %v6350_v33 = vpack.c.bf16 %v367_v29, %v366_v28  ;;  %v273_v35 = vld [vmem:[#allocation7 + $0x1b0] sm:$0xff]  ;;  %v368_v38 = vld [vmem:[#allocation7 + $0x198] sm:$0xff]  ;;  %v151_v3 = vadd.f32 %v6419_v62, %v54_v59  ;;  %v6426_v20 = vld [vmem:[%s7165_s2 + $0x2] ss:$0 sm:$0xff] }
  0x3d   :  { %5209 = vmatprep.subr.bf16.mxu1 %v6177_v0  ;;  %v369_v39 = vld [vmem:[#allocation7 + $0x1b8] sm:$0xff]  ;;  %v6354_v40 = vpack.c.bf16 %v273_v35, %v272_v34  ;;  %v274_v44 = vld [vmem:[#allocation7 + $0x1d0] sm:$0xff]  ;;  %v6431_v27 = vld [vmem:[%s7165_s2 + $0x3] ss:$0 sm:$0xff] }
  0x3e   :  { %v6358_v41 = vpack.c.bf16 %v369_v39, %v368_v38  ;;  %v275_v45 = vld [vmem:[#allocation7 + $0x1f0] sm:$0xff]  ;;  %v370_v46 = vld [vmem:[#allocation7 + $0x1d8] sm:$0xff] }
  0x3f   :  { %5187 = vmatpush3.bf16.msra.mxu0 %v6276_v36  ;;  %v371_v47 = vld [vmem:[#allocation7 + $0x1f8] sm:$0xff]  ;;  %v6362_v50 = vpack.c.bf16 %v275_v45, %v274_v44  ;;  %v56_v17 = vld [vmem:[#allocation4 + $0x10] sm:$0xff] }
  0x40   :  { %5211 = vmatpush3.bf16.msra.mxu1 %v6280_v37  ;;  %5188 = vmatprep.subr.bf16.mxu0 %v6177_v0  ;;  %v6366_v51 = vpack.c.bf16 %v371_v47, %v370_v46  ;;  %v57_v26 = vld [vmem:[#allocation4 + $0x18] sm:$0xff]  ;;  %v353_v29 = vadd.f32 %v6426_v20, %v56_v17 }
  0x41   :  { %5212 = vmatprep.subr.bf16.mxu1 %v6177_v0  ;;  %v449_v35 = vadd.f32 %v6431_v27, %v57_v26 }
  0x43   :  { %5190 = vmatpush3.bf16.msra.mxu0 %v6284_v42 }
  0x44   :  { %5214 = vmatpush3.bf16.msra.mxu1 %v6288_v43  ;;  %5191 = vmatprep.subr.bf16.mxu0 %v6177_v0 }
  0x45   :  { %5215 = vmatprep.subr.bf16.mxu1 %v6177_v0 }
  0x47   :  { %5193 = vmatpush3.bf16.msra.mxu0 %v6292_v48 }
  0x48   :  { %5217 = vmatpush3.bf16.msra.mxu1 %v6296_v49  ;;  %5218 = vmatprep.subr.bf16.mxu0 %v6177_v0 }
  0x49   :  { %5242 = vmatprep.subr.bf16.mxu1 %v6177_v0 }
  0x4a   :  { %4083 = vmatmul.mubr.f32.vlgmr.msra.gmra.mrb[0].mxu0 %v6179_v1 }
  0x4b   :  { %4118 = vmatmul.mubr.f32.vlgmr.msra.gmra.mrb[0].mxu1 %v6179_v1  ;;  %5220 = vmatpush3.bf16.msra.mxu0 %v6300_v54 }
  0x4c   :  { %5244 = vmatpush3.bf16.msra.mxu1 %v6304_v55  ;;  %5221 = vmatprep.subr.bf16.mxu0 %v6177_v0 }
  0x4d   :  { %5245 = vmatprep.subr.bf16.mxu1 %v6177_v0  ;;  %4152 = vmatprep.mubr.msk.f32.mxu0 %vm6178_vm0, %v6179_v1 }
  0x4e   :  { %4187 = vmatprep.mubr.msk.f32.mxu1 %vm6178_vm0, %v6179_v1 }
  0x4f   :  { %5223 = vmatpush3.bf16.msra.mxu0 %v6310_v60 }
  0x50   :  { %5247 = vmatpush3.bf16.msra.mxu1 %v6314_v61  ;;  %5224 = vmatprep.subr.bf16.mxu0 %v6177_v0 }
  0x51   :  { %5248 = vmatprep.subr.bf16.mxu1 %v6177_v0 }
  0x53   :  { %5226 = vmatpush3.bf16.msra.mxu0 %v6322_v4 }
  0x54   :  { %5250 = vmatpush3.bf16.msra.mxu1 %v6326_v6  ;;  %5227 = vmatprep.subr.bf16.mxu0 %v6177_v0 }
  0x55   :  { %5251 = vmatprep.subr.bf16.mxu1 %v6177_v0 }
  0x57   :  { %5229 = vmatpush3.bf16.msra.mxu0 %v6330_v14 }
  0x58   :  { %5253 = vmatpush3.bf16.msra.mxu1 %v6334_v15  ;;  %5230 = vmatprep.subr.bf16.mxu0 %v6177_v0 }
  0x59   :  { %5254 = vmatprep.subr.bf16.mxu1 %v6177_v0 }
  0x5b   :  { %5232 = vmatpush3.bf16.msra.mxu0 %v6338_v22 }
  0x5c   :  { %5256 = vmatpush3.bf16.msra.mxu1 %v6342_v23  ;;  %5233 = vmatprep.subr.bf16.mxu0 %v6177_v0 }
  0x5d   :  { %5257 = vmatprep.subr.bf16.mxu1 %v6177_v0 }
  0x5f   :  { %5235 = vmatpush3.bf16.msra.mxu0 %v6346_v32 }
  0x60   :  { %5259 = vmatpush3.bf16.msra.mxu1 %v6350_v33  ;;  %5236 = vmatprep.subr.bf16.mxu0 %v6177_v0 }
  0x61   :  { %5260 = vmatprep.subr.bf16.mxu1 %v6177_v0 }
  0x63   :  { %5238 = vmatpush3.bf16.msra.mxu0 %v6354_v40 }
  0x64   :  { %5262 = vmatpush3.bf16.msra.mxu1 %v6358_v41  ;;  %5239 = vmatprep.subr.bf16.mxu0 %v6177_v0 }
  0x65   :  { %5263 = vmatprep.subr.bf16.mxu1 %v6177_v0 }
  0x67   :  { %5241 = vmatpush3.bf16.msra.mxu0 %v6362_v50 }
  0x68   :  { %5265 = vmatpush3.bf16.msra.mxu1 %v6366_v51  ;;  %5266 = vmatprep.subr.bf16.mxu0 %v6177_v0 }
  0x69   :  { %5290 = vmatprep.subr.bf16.mxu1 %v6177_v0 }
  0x6a   :  { %4153 = vmatmul.mubr.f32.vlgmr.msra.gmra.mrb[2].mxu0 %v6179_v1 }
  0x6b   :  { %4188 = vmatmul.mubr.f32.vlgmr.msra.gmra.mrb[2].mxu1 %v6179_v1  ;;  %5268 = vmatpush3.bf16.msra.mxu0 %v6239_v5 }
  0x6c   :  { %5292 = vmatpush3.bf16.msra.mxu1 %v6241_v9  ;;  %5269 = vmatprep.subr.bf16.mxu0 %v6177_v0 }
  0x6d   :  { %5293 = vmatprep.subr.bf16.mxu1 %v6177_v0  ;;  %4222 = vmatprep.mubr.msk.f32.mxu0 %vm6178_vm0, %v6179_v1 }
  0x6e   :  { %4257 = vmatprep.mubr.msk.f32.mxu1 %vm6178_vm0, %v6179_v1 }
  0x6f   :  { %5271 = vmatpush3.bf16.msra.mxu0 %v6244_v12 }
  0x70   :  { %5295 = vmatpush3.bf16.msra.mxu1 %v6248_v13  ;;  %5272 = vmatprep.subr.bf16.mxu0 %v6177_v0 }
  0x71   :  { %5296 = vmatprep.subr.bf16.mxu1 %v6177_v0 }
  0x73   :  { %5274 = vmatpush3.bf16.msra.mxu0 %v6252_v18 }
  0x74   :  { %5298 = vmatpush3.bf16.msra.mxu1 %v6256_v19  ;;  %5275 = vmatprep.subr.bf16.mxu0 %v6177_v0 }
  0x75   :  { %5299 = vmatprep.subr.bf16.mxu1 %v6177_v0 }
  0x77   :  { %5277 = vmatpush3.bf16.msra.mxu0 %v6260_v24 }
  0x78   :  { %5301 = vmatpush3.bf16.msra.mxu1 %v6264_v25  ;;  %5278 = vmatprep.subr.bf16.mxu0 %v6177_v0 }
  0x79   :  { %5302 = vmatprep.subr.bf16.mxu1 %v6177_v0 }
  0x7b   :  { %5280 = vmatpush3.bf16.msra.mxu0 %v6268_v30 }
  0x7c   :  { %5304 = vmatpush3.bf16.msra.mxu1 %v6272_v31  ;;  %5281 = vmatprep.subr.bf16.mxu0 %v6177_v0 }
  0x7d   :  { %5305 = vmatprep.subr.bf16.mxu1 %v6177_v0 }
  0x7f   :  { %5283 = vmatpush3.bf16.msra.mxu0 %v6276_v36 }
  0x80   :  { %5307 = vmatpush3.bf16.msra.mxu1 %v6280_v37  ;;  %5284 = vmatprep.subr.bf16.mxu0 %v6177_v0 }
  0x81   :  { %5308 = vmatprep.subr.bf16.mxu1 %v6177_v0 }
  0x83   :  { %5286 = vmatpush3.bf16.msra.mxu0 %v6284_v42 }
  0x84   :  { %5310 = vmatpush3.bf16.msra.mxu1 %v6288_v43  ;;  %5287 = vmatprep.subr.bf16.mxu0 %v6177_v0 }
  0x85   :  { %5311 = vmatprep.subr.bf16.mxu1 %v6177_v0 }
  0x87   :  { %5289 = vmatpush3.bf16.msra.mxu0 %v6292_v48 }
  0x88   :  { %5313 = vmatpush3.bf16.msra.mxu1 %v6296_v49  ;;  %5314 = vmatprep.subr.bf16.mxu0 %v6177_v0 }
  0x89   :  { %5338 = vmatprep.subr.bf16.mxu1 %v6177_v0 }
 0x11d   :  { %v140_v52 = vpop.f32.mrb[0].mxu0 }
 0x11e   :  { %v241_v56 = vpop.f32.mrb[0].mxu1  ;;  %v4084_v58 = vpop.f32.mrb[1].mxu0  ;;  %v152_v8 = vadd.f32 %v151_v3, %v140_v52 }
 0x11f   :  { %v4119_v63 = vpop.f32.mrb[1].mxu1  ;;  %v253_v7 = vadd.f32 %v252_v2, %v241_v56 }
 0x120   :  { %v3451_v11 = vmul.f32 -1.442695, %v152_v8 }
 0x121   :  { %v3453_v10 = vmul.f32 -1.442695, %v253_v7 }
 0x123   :  { %5949 = vpow2.f32 %v3453_v10 }
 0x124   :  { %5951 = vpow2.f32 %v3451_v11 }
 0x12d   :  { %v5950_v16 = vpop.eup %5949 }
 0x12e   :  { %v5952_v21 = vpop.eup %5951  ;;  %v257_v28 = vadd.f32 1.0, %v5950_v16 }
 0x12f   :  { %v156_v34 = vadd.f32 1.0, %v5952_v21 }
 0x130   :  { %5953 = vrcp.f32 %v257_v28 }
 0x131   :  { %5955 = vrcp.f32 %v156_v34 }
 0x13a   :  { %v5954_v53 = vpop.eup %5953 }
 0x13b   :  { %v5956_v56 = vpop.eup %5955  ;;  %v457_v59 = vmul.f32 0.0, %v5954_v53 }
 0x13d   :  { %v342_v38 = vpop.f32.mrb[2].mxu0 }
 0x13e   :  { %v354_v39 = vadd.f32 %v353_v29, %v342_v38  ;;  %v438_v44 = vpop.f32.mrb[2].mxu1  ;;  %v4154_v45 = vpop.f32.mrb[3].mxu0 }
 0x13f   :  { %v450_v46 = vadd.f32 %v449_v35, %v438_v44  ;;  %v4189_v47 = vpop.f32.mrb[3].mxu1 }
 0x140   :  { %5957 = vtanh.f32 %v354_v39 }
 0x141   :  { %v3456_v52 = vmul.f32 -1.442695, %v450_v46 }
 0x143   :  { %5959 = vpow2.f32 %v3456_v52 }
 0x14a   :  { %v5958_v58 = vpop.eup %5957 }
 0x14b   :  { %v458_v63 = vmul.f32 %v5958_v58, %v5956_v56 }
 0x14d   :  { %v5960_v2 = vpop.eup %5959  ;;  %v6435_v3 = vadd.f32 %v458_v63, %v457_v59 }
 0x14e   :  { %v454_v7 = vadd.f32 1.0, %v5960_v2 }
 0x14f   :  { %5961 = vtanh.f32 %v6435_v3 }
 0x150   :  { %5963 = vrcp.f32 %v454_v7 }
 0x159   :  { %v5962_v8 = vpop.eup %5961 }
 0x15a   :  { %v5964_v10 = vpop.eup %5963 }
 0x15b   :  { %v461_v11 = vmul.f32 %v5964_v10, %v5962_v8  ;;  %v1326_v10 = vld [vmem:[#allocation7 + $0xc0] sm:$0xff] }
 0x15d   :  { %464 = vst [vmem:[#allocation9] sm:$0xff] %v461_v11  ;;  %4223 = vmatmul.mubr.f32.vlgmr.msra.gmra.mrb[4].mxu0 %v461_v11  ;;  %4258 = vmatmul.mubr.f32.vlgmr.msra.gmra.mrb[4].mxu1 %v461_v11 }
 0x15e   :  { %5316 = vmatpush3.bf16.msra.mxu0 %v6300_v54  ;;  %5340 = vmatpush3.bf16.msra.mxu1 %v6304_v55 }
 0x15f   :  { %5317 = vmatprep.subr.bf16.mxu0 %v6177_v0  ;;  %5341 = vmatprep.subr.bf16.mxu1 %v6177_v0 }
 0x160   :  { %4292 = vmatprep.mubr.msk.f32.mxu0 %vm6178_vm0, %v6179_v1  ;;  %4327 = vmatprep.mubr.msk.f32.mxu1 %vm6178_vm0, %v6179_v1 }
 0x162   :  { %5319 = vmatpush3.bf16.msra.mxu0 %v6310_v60  ;;  %5343 = vmatpush3.bf16.msra.mxu1 %v6314_v61 }
 0x163   :  { %5320 = vmatprep.subr.bf16.mxu0 %v6177_v0  ;;  %5344 = vmatprep.subr.bf16.mxu1 %v6177_v0 }
 0x166   :  { %5322 = vmatpush3.bf16.msra.mxu0 %v6322_v4  ;;  %5346 = vmatpush3.bf16.msra.mxu1 %v6326_v6 }
 0x167   :  { %5323 = vmatprep.subr.bf16.mxu0 %v6177_v0  ;;  %5347 = vmatprep.subr.bf16.mxu1 %v6177_v0 }
 0x16a   :  { %5325 = vmatpush3.bf16.msra.mxu0 %v6330_v14  ;;  %5349 = vmatpush3.bf16.msra.mxu1 %v6334_v15 }
 0x16b   :  { %5326 = vmatprep.subr.bf16.mxu0 %v6177_v0  ;;  %5350 = vmatprep.subr.bf16.mxu1 %v6177_v0 }
 0x16e   :  { %5328 = vmatpush3.bf16.msra.mxu0 %v6338_v22  ;;  %5352 = vmatpush3.bf16.msra.mxu1 %v6342_v23 }
 0x16f   :  { %5329 = vmatprep.subr.bf16.mxu0 %v6177_v0  ;;  %5353 = vmatprep.subr.bf16.mxu1 %v6177_v0 }
 0x172   :  { %5331 = vmatpush3.bf16.msra.mxu0 %v6346_v32  ;;  %5355 = vmatpush3.bf16.msra.mxu1 %v6350_v33 }
 0x173   :  { %5332 = vmatprep.subr.bf16.mxu0 %v6177_v0  ;;  %5356 = vmatprep.subr.bf16.mxu1 %v6177_v0 }
 0x176   :  { %5334 = vmatpush3.bf16.msra.mxu0 %v6354_v40  ;;  %5358 = vmatpush3.bf16.msra.mxu1 %v6358_v41 }
 0x177   :  { %5335 = vmatprep.subr.bf16.mxu0 %v6177_v0  ;;  %5359 = vmatprep.subr.bf16.mxu1 %v6177_v0 }
 0x17a   :  { %5337 = vmatpush3.bf16.msra.mxu0 %v6362_v50  ;;  %5361 = vmatpush3.bf16.msra.mxu1 %v6366_v51 }
 0x17b   :  { %5362 = vmatprep.subr.bf16.mxu0 %v6177_v0  ;;  %5386 = vmatprep.subr.bf16.mxu1 %v6177_v0 }
 0x17d   :  { %4293 = vmatmul.mubr.f32.vlgmr.msra.gmra.mrb[6].mxu0 %v461_v11  ;;  %4328 = vmatmul.mubr.f32.vlgmr.msra.gmra.mrb[6].mxu1 %v461_v11  ;;  %v1327_v11 = vld [vmem:[#allocation7 + $0xe0] sm:$0xff] }
 0x17e   :  { %5364 = vmatpush3.bf16.msra.mxu0 %v6239_v5  ;;  %5388 = vmatpush3.bf16.msra.mxu1 %v6241_v9 }
 0x17f   :  { %5365 = vmatprep.subr.bf16.mxu0 %v6177_v0  ;;  %5389 = vmatprep.subr.bf16.mxu1 %v6177_v0 }
 0x180   :  { %4362 = vmatprep.mubr.msk.f32.mxu0 %vm6178_vm0, %v6179_v1  ;;  %4397 = vmatprep.mubr.msk.f32.mxu1 %vm6178_vm0, %v6179_v1 }
 0x182   :  { %5367 = vmatpush3.bf16.msra.mxu0 %v6244_v12  ;;  %5391 = vmatpush3.bf16.msra.mxu1 %v6248_v13  ;;  %v475_v12 = vld [vmem:[#allocation4 + $0x28] sm:$0xff] }
 0x183   :  { %5368 = vmatprep.subr.bf16.mxu0 %v6177_v0  ;;  %5392 = vmatprep.subr.bf16.mxu1 %v6177_v0 }
 0x186   :  { %5370 = vmatpush3.bf16.msra.mxu0 %v6252_v18  ;;  %5394 = vmatpush3.bf16.msra.mxu1 %v6256_v19  ;;  %v474_v19 = vld [vmem:[#allocation4 + $0x20] sm:$0xff] }
 0x187   :  { %5371 = vmatprep.subr.bf16.mxu0 %v6177_v0  ;;  %5395 = vmatprep.subr.bf16.mxu1 %v6177_v0 }
 0x18a   :  { %5373 = vmatpush3.bf16.msra.mxu0 %v6260_v24  ;;  %5397 = vmatpush3.bf16.msra.mxu1 %v6264_v25  ;;  %v672_v24 = vadd.f32 %v6414_v57, %v475_v12  ;;  %v571_v25 = vadd.f32 %v6419_v62, %v474_v19  ;;  %v1428_v12 = vld [vmem:[#allocation7 + $0xe8] sm:$0xff]  ;;  %v1329_v19 = vld [vmem:[#allocation7 + $0x120] sm:$0xff] }
 0x18b   :  { %5374 = vmatprep.subr.bf16.mxu0 %v6177_v0  ;;  %5398 = vmatprep.subr.bf16.mxu1 %v6177_v0 }
 0x18e   :  { %5376 = vmatpush3.bf16.msra.mxu0 %v6268_v30  ;;  %5400 = vmatpush3.bf16.msra.mxu1 %v6272_v31 }
 0x18f   :  { %5377 = vmatprep.subr.bf16.mxu0 %v6177_v0  ;;  %5401 = vmatprep.subr.bf16.mxu1 %v6177_v0 }
 0x192   :  { %5379 = vmatpush3.bf16.msra.mxu0 %v6276_v36  ;;  %5403 = vmatpush3.bf16.msra.mxu1 %v6280_v37 }
 0x193   :  { %5380 = vmatprep.subr.bf16.mxu0 %v6177_v0  ;;  %5404 = vmatprep.subr.bf16.mxu1 %v6177_v0 }
 0x196   :  { %5382 = vmatpush3.bf16.msra.mxu0 %v6284_v42  ;;  %5406 = vmatpush3.bf16.msra.mxu1 %v6288_v43  ;;  %v476_v43 = vld [vmem:[#allocation4 + $0x30] sm:$0xff] }
 0x197   :  { %5383 = vmatprep.subr.bf16.mxu0 %v6177_v0  ;;  %5407 = vmatprep.subr.bf16.mxu1 %v6177_v0  ;;  %v773_v17 = vadd.f32 %v6426_v20, %v476_v43 }
 0x19a   :  { %5385 = vmatpush3.bf16.msra.mxu0 %v6292_v48  ;;  %5409 = vmatpush3.bf16.msra.mxu1 %v6296_v49  ;;  %v477_v48 = vld [vmem:[#allocation4 + $0x38] sm:$0xff] }
 0x19b   :  { %5410 = vmatprep.subr.bf16.mxu0 %v6177_v0  ;;  %5434 = vmatprep.subr.bf16.mxu1 %v6177_v0  ;;  %v869_v21 = vadd.f32 %v6431_v27, %v477_v48  ;;  %v1432_v48 = vld [vmem:[#allocation7 + $0x168] sm:$0xff] }
 0x230   :  { %v560_v5 = vpop.f32.mrb[4].mxu0  ;;  %v661_v9 = vpop.f32.mrb[4].mxu1 }
 0x231   :  { %v4224_v13 = vpop.f32.mrb[5].mxu0  ;;  %v4259_v18 = vpop.f32.mrb[5].mxu1  ;;  %v673_v30 = vadd.f32 %v672_v24, %v661_v9  ;;  %v572_v31 = vadd.f32 %v571_v25, %v560_v5  ;;  %v1427_v5 = vld [vmem:[#allocation7 + $0xc8] sm:$0xff]  ;;  %v6582_v9 = vpack.c.bf16 %v1327_v11, %v1326_v10 }
 0x232   :  { %v6584_v13 = vpack.c.bf16 %v1428_v12, %v1427_v5  ;;  %v1328_v18 = vld [vmem:[#allocation7 + $0x100] sm:$0xff]  ;;  %v1429_v24 = vld [vmem:[#allocation7 + $0x108] sm:$0xff] }
 0x233   :  { %v3460_v36 = vmul.f32 -1.442695, %v673_v30  ;;  %v3458_v37 = vmul.f32 -1.442695, %v572_v31  ;;  %v6590_v25 = vpack.c.bf16 %v1329_v19, %v1328_v18  ;;  %v1430_v30 = vld [vmem:[#allocation7 + $0x128] sm:$0xff] }
 0x234   :  { %v6592_v31 = vpack.c.bf16 %v1430_v30, %v1429_v24 }
 0x235   :  { %5965 = vpow2.f32 %v3460_v36  ;;  %v1330_v36 = vld [vmem:[#allocation7 + $0x140] sm:$0xff] }
 0x236   :  { %5967 = vpow2.f32 %v3458_v37  ;;  %v1331_v37 = vld [vmem:[#allocation7 + $0x160] sm:$0xff] }
 0x237   :  { %v6598_v43 = vpack.c.bf16 %v1331_v37, %v1330_v36 }
 0x23f   :  { %v5966_v42 = vpop.eup %5965 }
 0x240   :  { %v5968_v49 = vpop.eup %5967  ;;  %v677_v16 = vadd.f32 1.0, %v5966_v42  ;;  %v1431_v42 = vld [vmem:[#allocation7 + $0x148] sm:$0xff] }
 0x241   :  { %v576_v26 = vadd.f32 1.0, %v5968_v49  ;;  %v6600_v49 = vpack.c.bf16 %v1432_v48, %v1431_v42  ;;  %v1522_v42 = vld [vmem:[#allocation7 + $0x10] sm:$0xff] }
 0x242   :  { %5969 = vrcp.f32 %v677_v16  ;;  %v1332_v16 = vld [vmem:[#allocation7 + $0x180] sm:$0xff]  ;;  %v1523_v48 = vld [vmem:[#allocation7 + $0x30] sm:$0xff] }
 0x243   :  { %5971 = vrcp.f32 %v576_v26 }
 0x24c   :  { %v5970_v45 = vpop.eup %5969 }
 0x24d   :  { %v5972_v46 = vpop.eup %5971  ;;  %v877_v52 = vmul.f32 %v5970_v45, %v6435_v3  ;;  %v1426_v3 = vld [vmem:[#allocation7 + $0xa8] sm:$0xff] }
 0x250   :  { %v762_v28 = vpop.f32.mrb[6].mxu0  ;;  %v858_v29 = vpop.f32.mrb[6].mxu1 }
 0x251   :  { %v774_v34 = vadd.f32 %v773_v17, %v762_v28  ;;  %v870_v35 = vadd.f32 %v869_v21, %v858_v29  ;;  %v4294_v38 = vpop.f32.mrb[7].mxu0  ;;  %v4329_v39 = vpop.f32.mrb[7].mxu1  ;;  %v1333_v17 = vld [vmem:[#allocation7 + $0x1a0] sm:$0xff]  ;;  %v1433_v21 = vld [vmem:[#allocation7 + $0x188] sm:$0xff] }
 0x252   :  { %v6603_v26 = vpack.c.bf16 %v1333_v17, %v1332_v16  ;;  %v1434_v28 = vld [vmem:[#allocation7 + $0x1a8] sm:$0xff]  ;;  %v1618_v16 = vld [vmem:[#allocation7 + $0x18] sm:$0xff] }
 0x253   :  { %5973 = vtanh.f32 %v774_v34  ;;  %v3463_v44 = vmul.f32 -1.442695, %v870_v35  ;;  %v6607_v29 = vpack.c.bf16 %v1434_v28, %v1433_v21  ;;  %v1334_v34 = vld [vmem:[#allocation7 + $0x1c0] sm:$0xff]  ;;  %v1435_v38 = vld [vmem:[#allocation7 + $0x1c8] sm:$0xff]  ;;  %v1619_v17 = vld [vmem:[#allocation7 + $0x38] sm:$0xff] }
 0x254   :  { %v1335_v35 = vld [vmem:[#allocation7 + $0x1e0] sm:$0xff]  ;;  %v1436_v39 = vld [vmem:[#allocation7 + $0x1e8] sm:$0xff] }
 0x255   :  { %5975 = vpow2.f32 %v3463_v44  ;;  %v6611_v44 = vpack.c.bf16 %v1335_v35, %v1334_v34  ;;  %v6615_v45 = vpack.c.bf16 %v1436_v39, %v1435_v38  ;;  %v6630_v34 = vpack.c.bf16 %v1523_v48, %v1522_v42  ;;  %v1524_v38 = vld [vmem:[#allocation7 + $0x50] sm:$0xff] }
 0x256   :  { %v6632_v35 = vpack.c.bf16 %v1619_v17, %v1618_v16  ;;  %v1525_v39 = vld [vmem:[#allocation7 + $0x70] sm:$0xff]  ;;  %v1632_v16 = vld [vmem:[#allocation7 + $0x1d8] sm:$0xff] }
 0x257   :  { %v1536_v42 = vld [vmem:[#allocation7 + $0x1d0] sm:$0xff]  ;;  %v1633_v17 = vld [vmem:[#allocation7 + $0x1f8] sm:$0xff] }
 0x258   :  { %v1537_v48 = vld [vmem:[#allocation7 + $0x1f0] sm:$0xff] }
 0x25d   :  { %v5974_v47 = vpop.eup %5973 }
 0x25e   :  { %v878_v53 = vmul.f32 %v5974_v47, %v5972_v46 }
 0x25f   :  { %v5976_v56 = vpop.eup %5975 }
 0x260   :  { %v6515_v58 = vadd.f32 %v878_v53, %v877_v52  ;;  %v874_v59 = vadd.f32 1.0, %v5976_v56  ;;  %v896_v52 = vld [vmem:[#allocation4 + $0x48] sm:$0xff] }
 0x262   :  { %5977 = vtanh.f32 %v6515_v58 }
 0x263   :  { %5979 = vrcp.f32 %v874_v59  ;;  %v895_v59 = vld [vmem:[#allocation4 + $0x40] sm:$0xff] }
 0x26c   :  { %v5978_v63 = vpop.eup %5977 }
 0x26d   :  { %v5980_v2 = vpop.eup %5979 }
 0x26e   :  { %v881_v7 = vmul.f32 %v5980_v2, %v5978_v63  ;;  %v1093_v63 = vadd.f32 %v6414_v57, %v896_v52  ;;  %v992_v2 = vadd.f32 %v6419_v62, %v895_v59  ;;  %v6641_v52 = vpack.c.bf16 %v1525_v39, %v1524_v38  ;;  %v1527_v59 = vld [vmem:[#allocation7 + $0xb0] sm:$0xff]  ;;  %v1317_v39 = vld [vmem:[#allocation4 + $0x68] sm:$0xff] }
 0x270   :  { %885 = vst [vmem:[#allocation9 + $0x8] sm:$0xff] %v881_v7  ;;  %4363 = vmatmul.mubr.f32.vlgmr.msra.gmra.mrb[8].mxu0 %v881_v7  ;;  %4398 = vmatmul.mubr.f32.vlgmr.msra.gmra.mrb[8].mxu1 %v881_v7 }
 0x271   :  { %5412 = vmatpush3.bf16.msra.mxu0 %v6300_v54  ;;  %5436 = vmatpush3.bf16.msra.mxu1 %v6304_v55  ;;  %v1320_v54 = vld [vmem:[#allocation7] sm:$0xff] }
 0x272   :  { %5413 = vmatprep.subr.bf16.mxu0 %v6177_v0  ;;  %5437 = vmatprep.subr.bf16.mxu1 %v6177_v0  ;;  %v1321_v55 = vld [vmem:[#allocation7 + $0x20] sm:$0xff] }
 0x273   :  { %4432 = vmatprep.mubr.msk.f32.mxu0 %vm6178_vm0, %v6179_v1  ;;  %4467 = vmatprep.mubr.msk.f32.mxu1 %vm6178_vm0, %v6179_v1 }
 0x275   :  { %5415 = vmatpush3.bf16.msra.mxu0 %v6310_v60  ;;  %5439 = vmatpush3.bf16.msra.mxu1 %v6314_v61  ;;  %v1421_v60 = vld [vmem:[#allocation7 + $0x8] sm:$0xff]  ;;  %v6558_v61 = vpack.c.bf16 %v1321_v55, %v1320_v54 }
 0x276   :  { %5416 = vmatprep.subr.bf16.mxu0 %v6177_v0  ;;  %5440 = vmatprep.subr.bf16.mxu1 %v6177_v0 }
 0x279   :  { %5418 = vmatpush3.bf16.msra.mxu0 %v6322_v4  ;;  %5442 = vmatpush3.bf16.msra.mxu1 %v6326_v6  ;;  %v1422_v4 = vld [vmem:[#allocation7 + $0x28] sm:$0xff] }
 0x27a   :  { %5419 = vmatprep.subr.bf16.mxu0 %v6177_v0  ;;  %5443 = vmatprep.subr.bf16.mxu1 %v6177_v0  ;;  %v6560_v6 = vpack.c.bf16 %v1422_v4, %v1421_v60 }
 0x27d   :  { %5421 = vmatpush3.bf16.msra.mxu0 %v6330_v14  ;;  %5445 = vmatpush3.bf16.msra.mxu1 %v6334_v15  ;;  %v1322_v14 = vld [vmem:[#allocation7 + $0x40] sm:$0xff] }
 0x27e   :  { %5422 = vmatprep.subr.bf16.mxu0 %v6177_v0  ;;  %5446 = vmatprep.subr.bf16.mxu1 %v6177_v0  ;;  %v1323_v15 = vld [vmem:[#allocation7 + $0x60] sm:$0xff] }
 0x281   :  { %5424 = vmatpush3.bf16.msra.mxu0 %v6338_v22  ;;  %5448 = vmatpush3.bf16.msra.mxu1 %v6342_v23  ;;  %v1423_v22 = vld [vmem:[#allocation7 + $0x48] sm:$0xff]  ;;  %v6566_v23 = vpack.c.bf16 %v1323_v15, %v1322_v14  ;;  %v897_v14 = vld [vmem:[#allocation4 + $0x50] sm:$0xff]  ;;  %v898_v15 = vld [vmem:[#allocation4 + $0x58] sm:$0xff] }
 0x282   :  { %5425 = vmatprep.subr.bf16.mxu0 %v6177_v0  ;;  %5449 = vmatprep.subr.bf16.mxu1 %v6177_v0 }
 0x285   :  { %5427 = vmatpush3.bf16.msra.mxu0 %v6346_v32  ;;  %5451 = vmatpush3.bf16.msra.mxu1 %v6350_v33  ;;  %v1424_v32 = vld [vmem:[#allocation7 + $0x68] sm:$0xff] }
 0x286   :  { %5428 = vmatprep.subr.bf16.mxu0 %v6177_v0  ;;  %5452 = vmatprep.subr.bf16.mxu1 %v6177_v0  ;;  %v6568_v33 = vpack.c.bf16 %v1424_v32, %v1423_v22 }
 0x289   :  { %5430 = vmatpush3.bf16.msra.mxu0 %v6354_v40  ;;  %5454 = vmatpush3.bf16.msra.mxu1 %v6358_v41  ;;  %v1324_v40 = vld [vmem:[#allocation7 + $0x80] sm:$0xff] }
 0x28a   :  { %5431 = vmatprep.subr.bf16.mxu0 %v6177_v0  ;;  %5455 = vmatprep.subr.bf16.mxu1 %v6177_v0  ;;  %v1325_v41 = vld [vmem:[#allocation7 + $0xa0] sm:$0xff] }
 0x28d   :  { %5433 = vmatpush3.bf16.msra.mxu0 %v6362_v50  ;;  %5457 = vmatpush3.bf16.msra.mxu1 %v6366_v51  ;;  %v1425_v50 = vld [vmem:[#allocation7 + $0x88] sm:$0xff]  ;;  %v6574_v51 = vpack.c.bf16 %v1325_v41, %v1324_v40  ;;  %v1194_v40 = vadd.f32 %v6426_v20, %v897_v14  ;;  %v1290_v41 = vadd.f32 %v6431_v27, %v898_v15  ;;  %v1625_v14 = vld [vmem:[#allocation7 + $0xf8] sm:$0xff] }
 0x28e   :  { %5458 = vmatprep.subr.bf16.mxu0 %v6177_v0  ;;  %5482 = vmatprep.subr.bf16.mxu1 %v6177_v0  ;;  %v6576_v8 = vpack.c.bf16 %v1426_v3, %v1425_v50 }
 0x290   :  { %4433 = vmatmul.mubr.f32.vlgmr.msra.gmra.mrb[10].mxu0 %v881_v7  ;;  %4468 = vmatmul.mubr.f32.vlgmr.msra.gmra.mrb[10].mxu1 %v881_v7 }
 0x291   :  { %4502 = vmatprep.mubr.msk.f32.mxu0 %vm6178_vm0, %v6179_v1  ;;  %4537 = vmatprep.mubr.msk.f32.mxu1 %vm6178_vm0, %v6179_v1 }
 0x292   :  { %5460 = vmatpush3.bf16.msra.mxu0 %v6558_v61  ;;  %5484 = vmatpush3.bf16.msra.mxu1 %v6560_v6 }
 0x293   :  { %5461 = vmatprep.subr.bf16.mxu0 %v6177_v0  ;;  %5485 = vmatprep.subr.bf16.mxu1 %v6177_v0 }
 0x296   :  { %5463 = vmatpush3.bf16.msra.mxu0 %v6566_v23  ;;  %5487 = vmatpush3.bf16.msra.mxu1 %v6568_v33 }
 0x297   :  { %5464 = vmatprep.subr.bf16.mxu0 %v6177_v0  ;;  %5488 = vmatprep.subr.bf16.mxu1 %v6177_v0 }
 0x29a   :  { %5466 = vmatpush3.bf16.msra.mxu0 %v6574_v51  ;;  %5490 = vmatpush3.bf16.msra.mxu1 %v6576_v8 }
 0x29b   :  { %5467 = vmatprep.subr.bf16.mxu0 %v6177_v0  ;;  %5491 = vmatprep.subr.bf16.mxu1 %v6177_v0 }
 0x29e   :  { %5469 = vmatpush3.bf16.msra.mxu0 %v6582_v9  ;;  %5493 = vmatpush3.bf16.msra.mxu1 %v6584_v13 }
 0x29f   :  { %5470 = vmatprep.subr.bf16.mxu0 %v6177_v0  ;;  %5494 = vmatprep.subr.bf16.mxu1 %v6177_v0 }
 0x2a2   :  { %5472 = vmatpush3.bf16.msra.mxu0 %v6590_v25  ;;  %5496 = vmatpush3.bf16.msra.mxu1 %v6592_v31 }
 0x2a3   :  { %5473 = vmatprep.subr.bf16.mxu0 %v6177_v0  ;;  %5497 = vmatprep.subr.bf16.mxu1 %v6177_v0 }
 0x2a6   :  { %5475 = vmatpush3.bf16.msra.mxu0 %v6598_v43  ;;  %5499 = vmatpush3.bf16.msra.mxu1 %v6600_v49 }
 0x2a7   :  { %5476 = vmatprep.subr.bf16.mxu0 %v6177_v0  ;;  %5500 = vmatprep.subr.bf16.mxu1 %v6177_v0 }
 0x2aa   :  { %5478 = vmatpush3.bf16.msra.mxu0 %v6603_v26  ;;  %5502 = vmatpush3.bf16.msra.mxu1 %v6607_v29 }
 0x2ab   :  { %5479 = vmatprep.subr.bf16.mxu0 %v6177_v0  ;;  %5503 = vmatprep.subr.bf16.mxu1 %v6177_v0 }
 0x2ae   :  { %5481 = vmatpush3.bf16.msra.mxu0 %v6611_v44  ;;  %5505 = vmatpush3.bf16.msra.mxu1 %v6615_v45 }
 0x2af   :  { %5506 = vmatprep.subr.bf16.mxu0 %v6177_v0  ;;  %5530 = vmatprep.subr.bf16.mxu1 %v6177_v0 }
 0x343   :  { %v981_v46 = vpop.f32.mrb[8].mxu0  ;;  %v1082_v47 = vpop.f32.mrb[8].mxu1 }
 0x344   :  { %v4364_v53 = vpop.f32.mrb[9].mxu0  ;;  %v4399_v56 = vpop.f32.mrb[9].mxu1  ;;  %v1094_v7 = vadd.f32 %v1093_v63, %v1082_v47  ;;  %v993_v54 = vadd.f32 %v992_v2, %v981_v46  ;;  %v1620_v46 = vld [vmem:[#allocation7 + $0x58] sm:$0xff] }
 0x345   :  { %v1621_v47 = vld [vmem:[#allocation7 + $0x78] sm:$0xff]  ;;  %v1526_v56 = vld [vmem:[#allocation7 + $0x90] sm:$0xff] }
 0x346   :  { %v3467_v55 = vmul.f32 -1.442695, %v1094_v7  ;;  %v3465_v60 = vmul.f32 -1.442695, %v993_v54  ;;  %v6643_v53 = vpack.c.bf16 %v1621_v47, %v1620_v46  ;;  %v1622_v63 = vld [vmem:[#allocation7 + $0x98] sm:$0xff]  ;;  %v6653_v7 = vpack.c.bf16 %v1527_v59, %v1526_v56  ;;  %v1316_v59 = vld [vmem:[#allocation4 + $0x60] sm:$0xff] }
 0x347   :  { %v1623_v2 = vld [vmem:[#allocation7 + $0xb8] sm:$0xff]  ;;  %v6744_v46 = vld [vmem:[%s7165_s2 + $0x1] ss:$0 sm:$0xff] }
 0x348   :  { %5981 = vpow2.f32 %v3467_v55  ;;  %v6655_v54 = vpack.c.bf16 %v1623_v2, %v1622_v63  ;;  %v1528_v55 = vld [vmem:[#allocation7 + $0xd0] sm:$0xff]  ;;  %v6749_v63 = vld [vmem:[%s7165_s2] ss:$0 sm:$0xff]  ;;  %v1514_v2 = vadd.f32 %v6744_v46, %v1317_v39 }
 0x349   :  { %5983 = vpow2.f32 %v3465_v60  ;;  %v1529_v60 = vld [vmem:[#allocation7 + $0xf0] sm:$0xff] }
 0x34a   :  { %v6661_v15 = vpack.c.bf16 %v1529_v60, %v1528_v55  ;;  %v1413_v55 = vadd.f32 %v6749_v63, %v1316_v59 }
 0x352   :  { %v5982_v4 = vpop.eup %5981 }
 0x353   :  { %v5984_v22 = vpop.eup %5983  ;;  %v1098_v32 = vadd.f32 1.0, %v5982_v4  ;;  %v1624_v4 = vld [vmem:[#allocation7 + $0xd8] sm:$0xff] }
 0x354   :  { %v997_v50 = vadd.f32 1.0, %v5984_v22  ;;  %v6663_v22 = vpack.c.bf16 %v1625_v14, %v1624_v4 }
 0x355   :  { %5985 = vrcp.f32 %v1098_v32  ;;  %v1530_v32 = vld [vmem:[#allocation7 + $0x110] sm:$0xff] }
 0x356   :  { %5987 = vrcp.f32 %v997_v50  ;;  %v1627_v50 = vld [vmem:[#allocation7 + $0x138] sm:$0xff] }
 0x35f   :  { %v5986_v18 = vpop.eup %5985 }
 0x360   :  { %v5988_v19 = vpop.eup %5987  ;;  %v1298_v30 = vmul.f32 %v5986_v18, %v6515_v58 }
 0x363   :  { %v1183_v3 = vpop.f32.mrb[10].mxu0  ;;  %v1279_v57 = vpop.f32.mrb[10].mxu1 }
 0x364   :  { %v1195_v62 = vadd.f32 %v1194_v40, %v1183_v3  ;;  %v1291_v10 = vadd.f32 %v1290_v41, %v1279_v57  ;;  %v4434_v11 = vpop.f32.mrb[11].mxu0  ;;  %v4469_v5 = vpop.f32.mrb[11].mxu1  ;;  %v1531_v40 = vld [vmem:[#allocation7 + $0x130] sm:$0xff]  ;;  %v1626_v41 = vld [vmem:[#allocation7 + $0x118] sm:$0xff] }
 0x365   :  { %v6669_v3 = vpack.c.bf16 %v1531_v40, %v1530_v32  ;;  %v6671_v57 = vpack.c.bf16 %v1627_v50, %v1626_v41  ;;  %v1628_v11 = vld [vmem:[#allocation7 + $0x158] sm:$0xff]  ;;  %v1318_v40 = vld [vmem:[#allocation4 + $0x70] sm:$0xff]  ;;  %v6756_v50 = vld [vmem:[%s7165_s2 + $0x2] ss:$0 sm:$0xff] }
 0x366   :  { %5989 = vtanh.f32 %v1195_v62  ;;  %v3470_v12 = vmul.f32 -1.442695, %v1291_v10  ;;  %v1532_v62 = vld [vmem:[#allocation7 + $0x150] sm:$0xff]  ;;  %v1629_v5 = vld [vmem:[#allocation7 + $0x178] sm:$0xff] }
 0x367   :  { %v1533_v10 = vld [vmem:[#allocation7 + $0x170] sm:$0xff]  ;;  %v6679_v18 = vpack.c.bf16 %v1629_v5, %v1628_v11 }
 0x368   :  { %5991 = vpow2.f32 %v3470_v12  ;;  %v6677_v12 = vpack.c.bf16 %v1533_v10, %v1532_v62  ;;  %v1319_v62 = vld [vmem:[#allocation4 + $0x78] sm:$0xff]  ;;  %v6761_v10 = vld [vmem:[%s7165_s2 + $0x3] ss:$0 sm:$0xff] }
 0x370   :  { %v5990_v24 = vpop.eup %5989 }
 0x371   :  { %v1299_v20 = vmul.f32 %v5990_v24, %v5988_v19  ;;  %v1534_v19 = vld [vmem:[#allocation7 + $0x190] sm:$0xff] }
 0x372   :  { %v5992_v36 = vpop.eup %5991  ;;  %v1535_v24 = vld [vmem:[#allocation7 + $0x1b0] sm:$0xff] }
 0x373   :  { %v6627_v27 = vadd.f32 %v1299_v20, %v1298_v30  ;;  %v1295_v37 = vadd.f32 1.0, %v5992_v36  ;;  %v1630_v30 = vld [vmem:[#allocation7 + $0x198] sm:$0xff]  ;;  %v6685_v36 = vpack.c.bf16 %v1535_v24, %v1534_v19  ;;  %v1615_v19 = vadd.f32 %v6756_v50, %v1318_v40 }
 0x374   :  { %v1631_v20 = vld [vmem:[#allocation7 + $0x1b8] sm:$0xff]  ;;  %v1711_v24 = vadd.f32 %v6761_v10, %v1319_v62 }
 0x375   :  { %5993 = vtanh.f32 %v6627_v27 }
 0x376   :  { %5995 = vrcp.f32 %v1295_v37  ;;  %v6687_v37 = vpack.c.bf16 %v1631_v20, %v1630_v30 }
 0x37f   :  { %v5994_v21 = vpop.eup %5993 }
 0x380   :  { %v5996_v28 = vpop.eup %5995 }
 0x381   :  { %v6634_v58 = vmul.f32 %v5996_v28, %v5994_v21  ;;  %v6693_v21 = vpack.c.bf16 %v1537_v48, %v1536_v42  ;;  %v6695_v28 = vpack.c.bf16 %v1633_v17, %v1632_v16 }
 0x383   :  { %1306 = vst [vmem:[#allocation9 + $0x10] sm:$0xff] %v6634_v58  ;;  %4503 = vmatmul.mubr.f32.vlgmr.msra.gmra.mrb[12].mxu0 %v6634_v58  ;;  %4538 = vmatmul.mubr.f32.vlgmr.msra.gmra.mrb[12].mxu1 %v6634_v58 }
 0x384   :  { %5508 = vmatpush3.bf16.msra.mxu0 %v6630_v34  ;;  %5532 = vmatpush3.bf16.msra.mxu1 %v6632_v35 }
 0x385   :  { %5509 = vmatprep.subr.bf16.mxu0 %v6177_v0  ;;  %5533 = vmatprep.subr.bf16.mxu1 %v6177_v0 }
 0x386   :  { %4572 = vmatprep.mubr.msk.f32.mxu0 %vm6178_vm0, %v6179_v1  ;;  %4607 = vmatprep.mubr.msk.f32.mxu1 %vm6178_vm0, %v6179_v1 }
 0x388   :  { %5511 = vmatpush3.bf16.msra.mxu0 %v6641_v52  ;;  %5535 = vmatpush3.bf16.msra.mxu1 %v6643_v53 }
 0x389   :  { %5512 = vmatprep.subr.bf16.mxu0 %v6177_v0  ;;  %5536 = vmatprep.subr.bf16.mxu1 %v6177_v0 }
 0x38c   :  { %5514 = vmatpush3.bf16.msra.mxu0 %v6653_v7  ;;  %5538 = vmatpush3.bf16.msra.mxu1 %v6655_v54 }
 0x38d   :  { %5515 = vmatprep.subr.bf16.mxu0 %v6177_v0  ;;  %5539 = vmatprep.subr.bf16.mxu1 %v6177_v0 }
 0x390   :  { %5517 = vmatpush3.bf16.msra.mxu0 %v6661_v15  ;;  %5541 = vmatpush3.bf16.msra.mxu1 %v6663_v22 }
 0x391   :  { %5518 = vmatprep.subr.bf16.mxu0 %v6177_v0  ;;  %5542 = vmatprep.subr.bf16.mxu1 %v6177_v0 }
 0x394   :  { %5520 = vmatpush3.bf16.msra.mxu0 %v6669_v3  ;;  %5544 = vmatpush3.bf16.msra.mxu1 %v6671_v57 }
 0x395   :  { %5521 = vmatprep.subr.bf16.mxu0 %v6177_v0  ;;  %5545 = vmatprep.subr.bf16.mxu1 %v6177_v0 }
 0x398   :  { %5523 = vmatpush3.bf16.msra.mxu0 %v6677_v12  ;;  %5547 = vmatpush3.bf16.msra.mxu1 %v6679_v18 }
 0x399   :  { %5524 = vmatprep.subr.bf16.mxu0 %v6177_v0  ;;  %5548 = vmatprep.subr.bf16.mxu1 %v6177_v0 }
 0x39c   :  { %5526 = vmatpush3.bf16.msra.mxu0 %v6685_v36  ;;  %5550 = vmatpush3.bf16.msra.mxu1 %v6687_v37 }
 0x39d   :  { %5527 = vmatprep.subr.bf16.mxu0 %v6177_v0  ;;  %5551 = vmatprep.subr.bf16.mxu1 %v6177_v0 }
 0x3a0   :  { %5529 = vmatpush3.bf16.msra.mxu0 %v6693_v21  ;;  %5553 = vmatpush3.bf16.msra.mxu1 %v6695_v28 }
 0x3a1   :  { %5554 = vmatprep.subr.bf16.mxu0 %v6177_v0  ;;  %5578 = vmatprep.subr.bf16.mxu1 %v6177_v0 }
 0x3a3   :  { %4573 = vmatmul.mubr.f32.vlgmr.msra.gmra.mrb[14].mxu0 %v6634_v58  ;;  %4608 = vmatmul.mubr.f32.vlgmr.msra.gmra.mrb[14].mxu1 %v6634_v58 }
 0x3a4   :  { %5556 = vmatpush3.bf16.msra.mxu0 %v6558_v61  ;;  %5580 = vmatpush3.bf16.msra.mxu1 %v6560_v6 }
 0x3a5   :  { %5557 = vmatprep.subr.bf16.mxu0 %v6177_v0  ;;  %5581 = vmatprep.subr.bf16.mxu1 %v6177_v0 }
 0x3a6   :  { %4642 = vmatprep.mubr.msk.f32.mxu0 %vm6178_vm0, %v6179_v1  ;;  %4677 = vmatprep.mubr.msk.f32.mxu1 %vm6178_vm0, %v6179_v1 }
 0x3a8   :  { %5559 = vmatpush3.bf16.msra.mxu0 %v6566_v23  ;;  %5583 = vmatpush3.bf16.msra.mxu1 %v6568_v33 }
 0x3a9   :  { %5560 = vmatprep.subr.bf16.mxu0 %v6177_v0  ;;  %5584 = vmatprep.subr.bf16.mxu1 %v6177_v0 }
 0x3ac   :  { %5562 = vmatpush3.bf16.msra.mxu0 %v6574_v51  ;;  %5586 = vmatpush3.bf16.msra.mxu1 %v6576_v8 }
 0x3ad   :  { %5563 = vmatprep.subr.bf16.mxu0 %v6177_v0  ;;  %5587 = vmatprep.subr.bf16.mxu1 %v6177_v0 }
 0x3b0   :  { %5565 = vmatpush3.bf16.msra.mxu0 %v6582_v9  ;;  %5589 = vmatpush3.bf16.msra.mxu1 %v6584_v13 }
 0x3b1   :  { %5566 = vmatprep.subr.bf16.mxu0 %v6177_v0  ;;  %5590 = vmatprep.subr.bf16.mxu1 %v6177_v0 }
 0x3b4   :  { %5568 = vmatpush3.bf16.msra.mxu0 %v6590_v25  ;;  %5592 = vmatpush3.bf16.msra.mxu1 %v6592_v31 }
 0x3b5   :  { %5569 = vmatprep.subr.bf16.mxu0 %v6177_v0  ;;  %5593 = vmatprep.subr.bf16.mxu1 %v6177_v0 }
 0x3b8   :  { %5571 = vmatpush3.bf16.msra.mxu0 %v6598_v43  ;;  %5595 = vmatpush3.bf16.msra.mxu1 %v6600_v49 }
 0x3b9   :  { %5572 = vmatprep.subr.bf16.mxu0 %v6177_v0  ;;  %5596 = vmatprep.subr.bf16.mxu1 %v6177_v0 }
 0x3bc   :  { %5574 = vmatpush3.bf16.msra.mxu0 %v6603_v26  ;;  %5598 = vmatpush3.bf16.msra.mxu1 %v6607_v29 }
 0x3bd   :  { %5575 = vmatprep.subr.bf16.mxu0 %v6177_v0  ;;  %5599 = vmatprep.subr.bf16.mxu1 %v6177_v0 }
 0x3c0   :  { %5577 = vmatpush3.bf16.msra.mxu0 %v6611_v44  ;;  %5601 = vmatpush3.bf16.msra.mxu1 %v6615_v45 }
 0x3c1   :  { %5602 = vmatprep.subr.bf16.mxu0 %v6177_v0  ;;  %5626 = vmatprep.subr.bf16.mxu1 %v6177_v0 }
 0x456   :  { %v1402_v38 = vpop.f32.mrb[12].mxu0  ;;  %v1503_v58 = vpop.f32.mrb[12].mxu1 }
 0x457   :  { %v4504_v47 = vpop.f32.mrb[13].mxu0  ;;  %v4539_v56 = vpop.f32.mrb[13].mxu1  ;;  %v1515_v60 = vadd.f32 %v1514_v2, %v1503_v58  ;;  %v1414_v4 = vadd.f32 %v1413_v55, %v1402_v38 }
 0x459   :  { %v3474_v14 = vmul.f32 -1.442695, %v1515_v60  ;;  %v3472_v32 = vmul.f32 -1.442695, %v1414_v4 }
 0x45b   :  { %5997 = vpow2.f32 %v3474_v14 }
 0x45c   :  { %5999 = vpow2.f32 %v3472_v32 }
 0x465   :  { %v5998_v41 = vpop.eup %5997 }
 0x466   :  { %v6000_v11 = vpop.eup %5999  ;;  %v1519_v5 = vadd.f32 1.0, %v5998_v41 }
 0x467   :  { %v1418_v30 = vadd.f32 1.0, %v6000_v11 }
 0x468   :  { %6001 = vrcp.f32 %v1519_v5 }
 0x469   :  { %6003 = vrcp.f32 %v1418_v30 }
 0x472   :  { %v6002_v39 = vpop.eup %6001 }
 0x473   :  { %v6004_v47 = vpop.eup %6003  ;;  %v1719_v59 = vmul.f32 %v6002_v39, %v6627_v27 }
 0x476   :  { %v1604_v20 = vpop.f32.mrb[14].mxu0  ;;  %v1700_v42 = vpop.f32.mrb[14].mxu1 }
 0x477   :  { %v1616_v48 = vadd.f32 %v1615_v19, %v1604_v20  ;;  %v1712_v16 = vadd.f32 %v1711_v24, %v1700_v42  ;;  %v4574_v17 = vpop.f32.mrb[15].mxu0  ;;  %v4609_v38 = vpop.f32.mrb[15].mxu1 }
 0x479   :  { %6005 = vtanh.f32 %v1616_v48  ;;  %v3477_v58 = vmul.f32 -1.442695, %v1712_v16 }
 0x47b   :  { %6007 = vpow2.f32 %v3477_v58 }
 0x483   :  { %v6006_v56 = vpop.eup %6005 }
 0x484   :  { %v1720_v2 = vmul.f32 %v6006_v56, %v6004_v47 }
 0x485   :  { %v6008_v55 = vpop.eup %6007 }
 0x486   :  { %v6766_v60 = vadd.f32 %v1720_v2, %v1719_v59  ;;  %v1716_v4 = vadd.f32 1.0, %v6008_v55 }
 0x488   :  { %6009 = vtanh.f32 %v6766_v60 }
 0x489   :  { %6011 = vrcp.f32 %v1716_v4 }
 0x492   :  { %v6010_v14 = vpop.eup %6009 }
 0x493   :  { %v6012_v32 = vpop.eup %6011 }
 0x494   :  { %v1723_v40 = vmul.f32 %v6012_v32, %v6010_v14  ;;  %v2589_v32 = vld [vmem:[#allocation7 + $0xc0] sm:$0xff] }
 0x496   :  { %1727 = vst [vmem:[#allocation9 + $0x18] sm:$0xff] %v1723_v40  ;;  %4643 = vmatmul.mubr.f32.vlgmr.msra.gmra.mrb[16].mxu0 %v1723_v40  ;;  %4678 = vmatmul.mubr.f32.vlgmr.msra.gmra.mrb[16].mxu1 %v1723_v40 }
 0x497   :  { %5604 = vmatpush3.bf16.msra.mxu0 %v6630_v34  ;;  %5628 = vmatpush3.bf16.msra.mxu1 %v6632_v35 }
 0x498   :  { %5605 = vmatprep.subr.bf16.mxu0 %v6177_v0  ;;  %5629 = vmatprep.subr.bf16.mxu1 %v6177_v0 }
 0x499   :  { %4712 = vmatprep.mubr.msk.f32.mxu0 %vm6178_vm0, %v6179_v1  ;;  %4747 = vmatprep.mubr.msk.f32.mxu1 %vm6178_vm0, %v6179_v1 }
 0x49b   :  { %5607 = vmatpush3.bf16.msra.mxu0 %v6641_v52  ;;  %5631 = vmatpush3.bf16.msra.mxu1 %v6643_v53 }
 0x49c   :  { %5608 = vmatprep.subr.bf16.mxu0 %v6177_v0  ;;  %5632 = vmatprep.subr.bf16.mxu1 %v6177_v0 }
 0x49f   :  { %5610 = vmatpush3.bf16.msra.mxu0 %v6653_v7  ;;  %5634 = vmatpush3.bf16.msra.mxu1 %v6655_v54 }
 0x4a0   :  { %5611 = vmatprep.subr.bf16.mxu0 %v6177_v0  ;;  %5635 = vmatprep.subr.bf16.mxu1 %v6177_v0 }
 0x4a3   :  { %5613 = vmatpush3.bf16.msra.mxu0 %v6661_v15  ;;  %5637 = vmatpush3.bf16.msra.mxu1 %v6663_v22 }
 0x4a4   :  { %5614 = vmatprep.subr.bf16.mxu0 %v6177_v0  ;;  %5638 = vmatprep.subr.bf16.mxu1 %v6177_v0 }
 0x4a7   :  { %5616 = vmatpush3.bf16.msra.mxu0 %v6669_v3  ;;  %5640 = vmatpush3.bf16.msra.mxu1 %v6671_v57 }
 0x4a8   :  { %5617 = vmatprep.subr.bf16.mxu0 %v6177_v0  ;;  %5641 = vmatprep.subr.bf16.mxu1 %v6177_v0 }
 0x4ab   :  { %5619 = vmatpush3.bf16.msra.mxu0 %v6677_v12  ;;  %5643 = vmatpush3.bf16.msra.mxu1 %v6679_v18 }
 0x4ac   :  { %5620 = vmatprep.subr.bf16.mxu0 %v6177_v0  ;;  %5644 = vmatprep.subr.bf16.mxu1 %v6177_v0 }
 0x4af   :  { %5622 = vmatpush3.bf16.msra.mxu0 %v6685_v36  ;;  %5646 = vmatpush3.bf16.msra.mxu1 %v6687_v37 }
 0x4b0   :  { %5623 = vmatprep.subr.bf16.mxu0 %v6177_v0  ;;  %5647 = vmatprep.subr.bf16.mxu1 %v6177_v0 }
 0x4b3   :  { %5625 = vmatpush3.bf16.msra.mxu0 %v6693_v21  ;;  %5649 = vmatpush3.bf16.msra.mxu1 %v6695_v28 }
 0x4b4   :  { %5650 = vmatprep.subr.bf16.mxu0 %v6177_v0  ;;  %5674 = vmatprep.subr.bf16.mxu1 %v6177_v0 }
 0x4b6   :  { %4713 = vmatmul.mubr.f32.vlgmr.msra.gmra.mrb[18].mxu0 %v1723_v40  ;;  %4748 = vmatmul.mubr.f32.vlgmr.msra.gmra.mrb[18].mxu1 %v1723_v40  ;;  %v2590_v40 = vld [vmem:[#allocation7 + $0xe0] sm:$0xff] }
 0x4b7   :  { %5652 = vmatpush3.bf16.msra.mxu0 %v6558_v61  ;;  %5676 = vmatpush3.bf16.msra.mxu1 %v6560_v6 }
 0x4b8   :  { %5653 = vmatprep.subr.bf16.mxu0 %v6177_v0  ;;  %5677 = vmatprep.subr.bf16.mxu1 %v6177_v0 }
 0x4b9   :  { %4782 = vmatprep.mubr.msk.f32.mxu0 %vm6178_vm0, %v6179_v1  ;;  %4817 = vmatprep.mubr.msk.f32.mxu1 %vm6178_vm0, %v6179_v1 }
 0x4bb   :  { %5655 = vmatpush3.bf16.msra.mxu0 %v6566_v23  ;;  %5679 = vmatpush3.bf16.msra.mxu1 %v6568_v33  ;;  %v1738_v23 = vld [vmem:[#allocation4 + $0x88] sm:$0xff] }
 0x4bc   :  { %5656 = vmatprep.subr.bf16.mxu0 %v6177_v0  ;;  %5680 = vmatprep.subr.bf16.mxu1 %v6177_v0 }
 0x4bf   :  { %5658 = vmatpush3.bf16.msra.mxu0 %v6574_v51  ;;  %5682 = vmatpush3.bf16.msra.mxu1 %v6576_v8  ;;  %v1737_v8 = vld [vmem:[#allocation4 + $0x80] sm:$0xff] }
 0x4c0   :  { %5659 = vmatprep.subr.bf16.mxu0 %v6177_v0  ;;  %5683 = vmatprep.subr.bf16.mxu1 %v6177_v0 }
 0x4c3   :  { %5661 = vmatpush3.bf16.msra.mxu0 %v6582_v9  ;;  %5685 = vmatpush3.bf16.msra.mxu1 %v6584_v13  ;;  %v1935_v9 = vadd.f32 %v6744_v46, %v1738_v23  ;;  %v1834_v13 = vadd.f32 %v6749_v63, %v1737_v8  ;;  %v2691_v23 = vld [vmem:[#allocation7 + $0xe8] sm:$0xff]  ;;  %v2592_v8 = vld [vmem:[#allocation7 + $0x120] sm:$0xff] }
 0x4c4   :  { %5662 = vmatprep.subr.bf16.mxu0 %v6177_v0  ;;  %5686 = vmatprep.subr.bf16.mxu1 %v6177_v0 }
 0x4c7   :  { %5664 = vmatpush3.bf16.msra.mxu0 %v6590_v25  ;;  %5688 = vmatpush3.bf16.msra.mxu1 %v6592_v31 }
 0x4c8   :  { %5665 = vmatprep.subr.bf16.mxu0 %v6177_v0  ;;  %5689 = vmatprep.subr.bf16.mxu1 %v6177_v0 }
 0x4cb   :  { %5667 = vmatpush3.bf16.msra.mxu0 %v6598_v43  ;;  %5691 = vmatpush3.bf16.msra.mxu1 %v6600_v49 }
 0x4cc   :  { %5668 = vmatprep.subr.bf16.mxu0 %v6177_v0  ;;  %5692 = vmatprep.subr.bf16.mxu1 %v6177_v0 }
 0x4cf   :  { %5670 = vmatpush3.bf16.msra.mxu0 %v6603_v26  ;;  %5694 = vmatpush3.bf16.msra.mxu1 %v6607_v29  ;;  %v1739_v29 = vld [vmem:[#allocation4 + $0x90] sm:$0xff] }
 0x4d0   :  { %5671 = vmatprep.subr.bf16.mxu0 %v6177_v0  ;;  %5695 = vmatprep.subr.bf16.mxu1 %v6177_v0  ;;  %v2036_v41 = vadd.f32 %v6756_v50, %v1739_v29 }
 0x4d3   :  { %5673 = vmatpush3.bf16.msra.mxu0 %v6611_v44  ;;  %5697 = vmatpush3.bf16.msra.mxu1 %v6615_v45  ;;  %v1740_v44 = vld [vmem:[#allocation4 + $0x98] sm:$0xff] }
 0x4d4   :  { %5698 = vmatprep.subr.bf16.mxu0 %v6177_v0  ;;  %5722 = vmatprep.subr.bf16.mxu1 %v6177_v0  ;;  %v2132_v62 = vadd.f32 %v6761_v10, %v1740_v44  ;;  %v2695_v44 = vld [vmem:[#allocation7 + $0x168] sm:$0xff] }
 0x569   :  { %v1823_v61 = vpop.f32.mrb[16].mxu0  ;;  %v1924_v6 = vpop.f32.mrb[16].mxu1 }
 0x56a   :  { %v4644_v33 = vpop.f32.mrb[17].mxu0  ;;  %v4679_v51 = vpop.f32.mrb[17].mxu1  ;;  %v1936_v25 = vadd.f32 %v1935_v9, %v1924_v6  ;;  %v1835_v31 = vadd.f32 %v1834_v13, %v1823_v61  ;;  %v2690_v61 = vld [vmem:[#allocation7 + $0xc8] sm:$0xff]  ;;  %v6913_v6 = vpack.c.bf16 %v2590_v40, %v2589_v32 }
 0x56b   :  { %v6915_v33 = vpack.c.bf16 %v2691_v23, %v2690_v61  ;;  %v2591_v51 = vld [vmem:[#allocation7 + $0x100] sm:$0xff]  ;;  %v2692_v9 = vld [vmem:[#allocation7 + $0x108] sm:$0xff] }
 0x56c   :  { %v3481_v43 = vmul.f32 -1.442695, %v1936_v25  ;;  %v3479_v49 = vmul.f32 -1.442695, %v1835_v31  ;;  %v6921_v13 = vpack.c.bf16 %v2592_v8, %v2591_v51  ;;  %v2693_v25 = vld [vmem:[#allocation7 + $0x128] sm:$0xff] }
 0x56d   :  { %v6923_v31 = vpack.c.bf16 %v2693_v25, %v2692_v9 }
 0x56e   :  { %6013 = vpow2.f32 %v3481_v43  ;;  %v2593_v43 = vld [vmem:[#allocation7 + $0x140] sm:$0xff] }
 0x56f   :  { %6015 = vpow2.f32 %v3479_v49  ;;  %v2594_v49 = vld [vmem:[#allocation7 + $0x160] sm:$0xff] }
 0x570   :  { %v6929_v29 = vpack.c.bf16 %v2594_v49, %v2593_v43 }
 0x578   :  { %v6014_v26 = vpop.eup %6013 }
 0x579   :  { %v6016_v45 = vpop.eup %6015  ;;  %v1940_v27 = vadd.f32 1.0, %v6014_v26  ;;  %v2694_v26 = vld [vmem:[#allocation7 + $0x148] sm:$0xff] }
 0x57a   :  { %v1839_v11 = vadd.f32 1.0, %v6016_v45  ;;  %v6931_v45 = vpack.c.bf16 %v2695_v44, %v2694_v26  ;;  %v2785_v26 = vld [vmem:[#allocation7 + $0x10] sm:$0xff] }
 0x57b   :  { %6017 = vrcp.f32 %v1940_v27  ;;  %v2595_v27 = vld [vmem:[#allocation7 + $0x180] sm:$0xff]  ;;  %v2786_v44 = vld [vmem:[#allocation7 + $0x30] sm:$0xff] }
 0x57c   :  { %6019 = vrcp.f32 %v1839_v11 }
 0x585   :  { %v6018_v16 = vpop.eup %6017 }
 0x586   :  { %v6020_v17 = vpop.eup %6019  ;;  %v2140_v58 = vmul.f32 %v6018_v16, %v6766_v60  ;;  %v2689_v60 = vld [vmem:[#allocation7 + $0xa8] sm:$0xff] }
 0x589   :  { %v2025_v5 = vpop.f32.mrb[18].mxu0  ;;  %v2121_v19 = vpop.f32.mrb[18].mxu1 }
 0x58a   :  { %v2037_v24 = vadd.f32 %v2036_v41, %v2025_v5  ;;  %v2133_v30 = vadd.f32 %v2132_v62, %v2121_v19  ;;  %v4714_v20 = vpop.f32.mrb[19].mxu0  ;;  %v4749_v42 = vpop.f32.mrb[19].mxu1  ;;  %v2596_v41 = vld [vmem:[#allocation7 + $0x1a0] sm:$0xff]  ;;  %v2696_v62 = vld [vmem:[#allocation7 + $0x188] sm:$0xff] }
 0x58b   :  { %v6934_v11 = vpack.c.bf16 %v2596_v41, %v2595_v27  ;;  %v2697_v5 = vld [vmem:[#allocation7 + $0x1a8] sm:$0xff]  ;;  %v2881_v27 = vld [vmem:[#allocation7 + $0x18] sm:$0xff] }
 0x58c   :  { %6021 = vtanh.f32 %v2037_v24  ;;  %v3484_v48 = vmul.f32 -1.442695, %v2133_v30  ;;  %v6938_v19 = vpack.c.bf16 %v2697_v5, %v2696_v62  ;;  %v2597_v24 = vld [vmem:[#allocation7 + $0x1c0] sm:$0xff]  ;;  %v2698_v20 = vld [vmem:[#allocation7 + $0x1c8] sm:$0xff]  ;;  %v2882_v41 = vld [vmem:[#allocation7 + $0x38] sm:$0xff] }
 0x58d   :  { %v2598_v30 = vld [vmem:[#allocation7 + $0x1e0] sm:$0xff]  ;;  %v2699_v42 = vld [vmem:[#allocation7 + $0x1e8] sm:$0xff] }
 0x58e   :  { %6023 = vpow2.f32 %v3484_v48  ;;  %v6942_v48 = vpack.c.bf16 %v2598_v30, %v2597_v24  ;;  %v6946_v16 = vpack.c.bf16 %v2699_v42, %v2698_v20  ;;  %v6961_v24 = vpack.c.bf16 %v2786_v44, %v2785_v26  ;;  %v2787_v20 = vld [vmem:[#allocation7 + $0x50] sm:$0xff] }
 0x58f   :  { %v6963_v30 = vpack.c.bf16 %v2882_v41, %v2881_v27  ;;  %v2788_v42 = vld [vmem:[#allocation7 + $0x70] sm:$0xff]  ;;  %v2895_v27 = vld [vmem:[#allocation7 + $0x1d8] sm:$0xff] }
 0x590   :  { %v2799_v26 = vld [vmem:[#allocation7 + $0x1d0] sm:$0xff]  ;;  %v2896_v41 = vld [vmem:[#allocation7 + $0x1f8] sm:$0xff] }
 0x591   :  { %v2800_v44 = vld [vmem:[#allocation7 + $0x1f0] sm:$0xff] }
 0x596   :  { %v6022_v38 = vpop.eup %6021 }
 0x597   :  { %v2141_v39 = vmul.f32 %v6022_v38, %v6020_v17 }
 0x598   :  { %v6024_v47 = vpop.eup %6023 }
 0x599   :  { %v6846_v56 = vadd.f32 %v2141_v39, %v2140_v58  ;;  %v2137_v59 = vadd.f32 1.0, %v6024_v47  ;;  %v2159_v58 = vld [vmem:[#allocation4 + $0xa8] sm:$0xff] }
 0x59b   :  { %6025 = vtanh.f32 %v6846_v56 }
 0x59c   :  { %6027 = vrcp.f32 %v2137_v59  ;;  %v2158_v59 = vld [vmem:[#allocation4 + $0xa0] sm:$0xff] }
 0x5a5   :  { %v6026_v2 = vpop.eup %6025 }
 0x5a6   :  { %v6028_v55 = vpop.eup %6027 }
 0x5a7   :  { %v2144_v4 = vmul.f32 %v6028_v55, %v6026_v2  ;;  %v2356_v2 = vadd.f32 %v6744_v46, %v2159_v58  ;;  %v2255_v55 = vadd.f32 %v6749_v63, %v2158_v59  ;;  %v6972_v58 = vpack.c.bf16 %v2788_v42, %v2787_v20  ;;  %v2790_v59 = vld [vmem:[#allocation7 + $0xb0] sm:$0xff]  ;;  %v7087_v20 = vld [vmem:[%s7165_s2 + $0x2] ss:$0 sm:$0xff]  ;;  %v7092_v42 = vld [vmem:[%s7165_s2 + $0x3] ss:$0 sm:$0xff] }
 0x5a9   :  { %2148 = vst [vmem:[#allocation9 + $0x20] sm:$0xff] %v2144_v4  ;;  %4783 = vmatmul.mubr.f32.vlgmr.msra.gmra.mrb[20].mxu0 %v2144_v4  ;;  %4818 = vmatmul.mubr.f32.vlgmr.msra.gmra.mrb[20].mxu1 %v2144_v4 }
 0x5aa   :  { %5700 = vmatpush3.bf16.msra.mxu0 %v6630_v34  ;;  %5724 = vmatpush3.bf16.msra.mxu1 %v6632_v35  ;;  %v2583_v34 = vld [vmem:[#allocation7] sm:$0xff] }
 0x5ab   :  { %5701 = vmatprep.subr.bf16.mxu0 %v6177_v0  ;;  %5725 = vmatprep.subr.bf16.mxu1 %v6177_v0  ;;  %v2584_v35 = vld [vmem:[#allocation7 + $0x20] sm:$0xff] }
 0x5ac   :  { %4852 = vmatprep.mubr.msk.f32.mxu0 %vm6178_vm0, %v6179_v1  ;;  %4887 = vmatprep.mubr.msk.f32.mxu1 %vm6178_vm0, %v6179_v1 }
 0x5ae   :  { %5703 = vmatpush3.bf16.msra.mxu0 %v6641_v52  ;;  %5727 = vmatpush3.bf16.msra.mxu1 %v6643_v53  ;;  %v2684_v52 = vld [vmem:[#allocation7 + $0x8] sm:$0xff]  ;;  %v6889_v53 = vpack.c.bf16 %v2584_v35, %v2583_v34 }
 0x5af   :  { %5704 = vmatprep.subr.bf16.mxu0 %v6177_v0  ;;  %5728 = vmatprep.subr.bf16.mxu1 %v6177_v0 }
 0x5b2   :  { %5706 = vmatpush3.bf16.msra.mxu0 %v6653_v7  ;;  %5730 = vmatpush3.bf16.msra.mxu1 %v6655_v54  ;;  %v2685_v7 = vld [vmem:[#allocation7 + $0x28] sm:$0xff] }
 0x5b3   :  { %5707 = vmatprep.subr.bf16.mxu0 %v6177_v0  ;;  %5731 = vmatprep.subr.bf16.mxu1 %v6177_v0  ;;  %v6891_v54 = vpack.c.bf16 %v2685_v7, %v2684_v52 }
 0x5b6   :  { %5709 = vmatpush3.bf16.msra.mxu0 %v6661_v15  ;;  %5733 = vmatpush3.bf16.msra.mxu1 %v6663_v22  ;;  %v2585_v15 = vld [vmem:[#allocation7 + $0x40] sm:$0xff] }
 0x5b7   :  { %5710 = vmatprep.subr.bf16.mxu0 %v6177_v0  ;;  %5734 = vmatprep.subr.bf16.mxu1 %v6177_v0  ;;  %v2586_v22 = vld [vmem:[#allocation7 + $0x60] sm:$0xff] }
 0x5ba   :  { %5712 = vmatpush3.bf16.msra.mxu0 %v6669_v3  ;;  %5736 = vmatpush3.bf16.msra.mxu1 %v6671_v57  ;;  %v2686_v3 = vld [vmem:[#allocation7 + $0x48] sm:$0xff]  ;;  %v6897_v57 = vpack.c.bf16 %v2586_v22, %v2585_v15  ;;  %v2160_v15 = vld [vmem:[#allocation4 + $0xb0] sm:$0xff]  ;;  %v2161_v22 = vld [vmem:[#allocation4 + $0xb8] sm:$0xff] }
 0x5bb   :  { %5713 = vmatprep.subr.bf16.mxu0 %v6177_v0  ;;  %5737 = vmatprep.subr.bf16.mxu1 %v6177_v0 }
 0x5be   :  { %5715 = vmatpush3.bf16.msra.mxu0 %v6677_v12  ;;  %5739 = vmatpush3.bf16.msra.mxu1 %v6679_v18  ;;  %v2687_v12 = vld [vmem:[#allocation7 + $0x68] sm:$0xff] }
 0x5bf   :  { %5716 = vmatprep.subr.bf16.mxu0 %v6177_v0  ;;  %5740 = vmatprep.subr.bf16.mxu1 %v6177_v0  ;;  %v6899_v18 = vpack.c.bf16 %v2687_v12, %v2686_v3 }
 0x5c2   :  { %5718 = vmatpush3.bf16.msra.mxu0 %v6685_v36  ;;  %5742 = vmatpush3.bf16.msra.mxu1 %v6687_v37  ;;  %v2587_v36 = vld [vmem:[#allocation7 + $0x80] sm:$0xff] }
 0x5c3   :  { %5719 = vmatprep.subr.bf16.mxu0 %v6177_v0  ;;  %5743 = vmatprep.subr.bf16.mxu1 %v6177_v0  ;;  %v2588_v37 = vld [vmem:[#allocation7 + $0xa0] sm:$0xff] }
 0x5c6   :  { %5721 = vmatpush3.bf16.msra.mxu0 %v6693_v21  ;;  %5745 = vmatpush3.bf16.msra.mxu1 %v6695_v28  ;;  %v2688_v21 = vld [vmem:[#allocation7 + $0x88] sm:$0xff]  ;;  %v6905_v28 = vpack.c.bf16 %v2588_v37, %v2587_v36  ;;  %v2457_v36 = vadd.f32 %v6756_v50, %v2160_v15  ;;  %v2553_v37 = vadd.f32 %v6761_v10, %v2161_v22  ;;  %v2888_v15 = vld [vmem:[#allocation7 + $0xf8] sm:$0xff] }
 0x5c7   :  { %5746 = vmatprep.subr.bf16.mxu0 %v6177_v0  ;;  %5770 = vmatprep.subr.bf16.mxu1 %v6177_v0  ;;  %v6907_v14 = vpack.c.bf16 %v2689_v60, %v2688_v21 }
 0x5c9   :  { %4853 = vmatmul.mubr.f32.vlgmr.msra.gmra.mrb[22].mxu0 %v2144_v4  ;;  %4888 = vmatmul.mubr.f32.vlgmr.msra.gmra.mrb[22].mxu1 %v2144_v4 }
 0x5ca   :  { %4922 = vmatprep.mubr.msk.f32.mxu0 %vm6178_vm0, %v6179_v1  ;;  %4957 = vmatprep.mubr.msk.f32.mxu1 %vm6178_vm0, %v6179_v1 }
 0x5cb   :  { %5748 = vmatpush3.bf16.msra.mxu0 %v6889_v53  ;;  %5772 = vmatpush3.bf16.msra.mxu1 %v6891_v54 }
 0x5cc   :  { %5749 = vmatprep.subr.bf16.mxu0 %v6177_v0  ;;  %5773 = vmatprep.subr.bf16.mxu1 %v6177_v0 }
 0x5cf   :  { %5751 = vmatpush3.bf16.msra.mxu0 %v6897_v57  ;;  %5775 = vmatpush3.bf16.msra.mxu1 %v6899_v18 }
 0x5d0   :  { %5752 = vmatprep.subr.bf16.mxu0 %v6177_v0  ;;  %5776 = vmatprep.subr.bf16.mxu1 %v6177_v0 }
 0x5d3   :  { %5754 = vmatpush3.bf16.msra.mxu0 %v6905_v28  ;;  %5778 = vmatpush3.bf16.msra.mxu1 %v6907_v14 }
 0x5d4   :  { %5755 = vmatprep.subr.bf16.mxu0 %v6177_v0  ;;  %5779 = vmatprep.subr.bf16.mxu1 %v6177_v0 }
 0x5d7   :  { %5757 = vmatpush3.bf16.msra.mxu0 %v6913_v6  ;;  %5781 = vmatpush3.bf16.msra.mxu1 %v6915_v33 }
 0x5d8   :  { %5758 = vmatprep.subr.bf16.mxu0 %v6177_v0  ;;  %5782 = vmatprep.subr.bf16.mxu1 %v6177_v0 }
 0x5db   :  { %5760 = vmatpush3.bf16.msra.mxu0 %v6921_v13  ;;  %5784 = vmatpush3.bf16.msra.mxu1 %v6923_v31 }
 0x5dc   :  { %5761 = vmatprep.subr.bf16.mxu0 %v6177_v0  ;;  %5785 = vmatprep.subr.bf16.mxu1 %v6177_v0 }
 0x5df   :  { %5763 = vmatpush3.bf16.msra.mxu0 %v6929_v29  ;;  %5787 = vmatpush3.bf16.msra.mxu1 %v6931_v45 }
 0x5e0   :  { %5764 = vmatprep.subr.bf16.mxu0 %v6177_v0  ;;  %5788 = vmatprep.subr.bf16.mxu1 %v6177_v0 }
 0x5e3   :  { %5766 = vmatpush3.bf16.msra.mxu0 %v6934_v11  ;;  %5790 = vmatpush3.bf16.msra.mxu1 %v6938_v19 }
 0x5e4   :  { %5767 = vmatprep.subr.bf16.mxu0 %v6177_v0  ;;  %5791 = vmatprep.subr.bf16.mxu1 %v6177_v0 }
 0x5e7   :  { %5769 = vmatpush3.bf16.msra.mxu0 %v6942_v48  ;;  %5793 = vmatpush3.bf16.msra.mxu1 %v6946_v16 }
 0x5e8   :  { %5794 = vmatprep.subr.bf16.mxu0 %v6177_v0  ;;  %5818 = vmatprep.subr.bf16.mxu1 %v6177_v0 }
 0x67c   :  { %v2244_v17 = vpop.f32.mrb[20].mxu0  ;;  %v2345_v38 = vpop.f32.mrb[20].mxu1 }
 0x67d   :  { %v4784_v39 = vpop.f32.mrb[21].mxu0  ;;  %v4819_v47 = vpop.f32.mrb[21].mxu1  ;;  %v2357_v4 = vadd.f32 %v2356_v2, %v2345_v38  ;;  %v2256_v34 = vadd.f32 %v2255_v55, %v2244_v17  ;;  %v2883_v17 = vld [vmem:[#allocation7 + $0x58] sm:$0xff] }
 0x67e   :  { %v2884_v38 = vld [vmem:[#allocation7 + $0x78] sm:$0xff]  ;;  %v2789_v47 = vld [vmem:[#allocation7 + $0x90] sm:$0xff] }
 0x67f   :  { %v3488_v35 = vmul.f32 -1.442695, %v2357_v4  ;;  %v3486_v52 = vmul.f32 -1.442695, %v2256_v34  ;;  %v6974_v39 = vpack.c.bf16 %v2884_v38, %v2883_v17  ;;  %v2885_v2 = vld [vmem:[#allocation7 + $0x98] sm:$0xff]  ;;  %v6984_v4 = vpack.c.bf16 %v2790_v59, %v2789_v47 }
 0x680   :  { %v2886_v55 = vld [vmem:[#allocation7 + $0xb8] sm:$0xff] }
 0x681   :  { %6029 = vpow2.f32 %v3488_v35  ;;  %v6986_v34 = vpack.c.bf16 %v2886_v55, %v2885_v2  ;;  %v2791_v35 = vld [vmem:[#allocation7 + $0xd0] sm:$0xff] }
 0x682   :  { %6031 = vpow2.f32 %v3486_v52  ;;  %v2792_v52 = vld [vmem:[#allocation7 + $0xf0] sm:$0xff] }
 0x683   :  { %v6992_v22 = vpack.c.bf16 %v2792_v52, %v2791_v35 }
 0x68b   :  { %v6030_v7 = vpop.eup %6029 }
 0x68c   :  { %v6032_v3 = vpop.eup %6031  ;;  %v2361_v12 = vadd.f32 1.0, %v6030_v7  ;;  %v2887_v7 = vld [vmem:[#allocation7 + $0xd8] sm:$0xff] }
 0x68d   :  { %v2260_v21 = vadd.f32 1.0, %v6032_v3  ;;  %v6994_v3 = vpack.c.bf16 %v2888_v15, %v2887_v7 }
 0x68e   :  { %6033 = vrcp.f32 %v2361_v12  ;;  %v2793_v12 = vld [vmem:[#allocation7 + $0x110] sm:$0xff] }
 0x68f   :  { %6035 = vrcp.f32 %v2260_v21  ;;  %v2890_v21 = vld [vmem:[#allocation7 + $0x138] sm:$0xff] }
 0x698   :  { %v6034_v51 = vpop.eup %6033 }
 0x699   :  { %v6036_v8 = vpop.eup %6035  ;;  %v2561_v25 = vmul.f32 %v6034_v51, %v6846_v56 }
 0x69c   :  { %v2446_v60 = vpop.f32.mrb[22].mxu0  ;;  %v2542_v46 = vpop.f32.mrb[22].mxu1 }
 0x69d   :  { %v2458_v63 = vadd.f32 %v2457_v36, %v2446_v60  ;;  %v2554_v32 = vadd.f32 %v2553_v37, %v2542_v46  ;;  %v4854_v40 = vpop.f32.mrb[23].mxu0  ;;  %v4889_v61 = vpop.f32.mrb[23].mxu1  ;;  %v2794_v36 = vld [vmem:[#allocation7 + $0x130] sm:$0xff]  ;;  %v2889_v37 = vld [vmem:[#allocation7 + $0x118] sm:$0xff] }
 0x69e   :  { %v7000_v60 = vpack.c.bf16 %v2794_v36, %v2793_v12  ;;  %v7002_v46 = vpack.c.bf16 %v2890_v21, %v2889_v37  ;;  %v2891_v40 = vld [vmem:[#allocation7 + $0x158] sm:$0xff] }
 0x69f   :  { %6037 = vtanh.f32 %v2458_v63  ;;  %v3491_v23 = vmul.f32 -1.442695, %v2554_v32  ;;  %v2795_v63 = vld [vmem:[#allocation7 + $0x150] sm:$0xff]  ;;  %v2892_v61 = vld [vmem:[#allocation7 + $0x178] sm:$0xff] }
 0x6a0   :  { %v2796_v32 = vld [vmem:[#allocation7 + $0x170] sm:$0xff]  ;;  %v7010_v51 = vpack.c.bf16 %v2892_v61, %v2891_v40 }
 0x6a1   :  { %6039 = vpow2.f32 %v3491_v23  ;;  %v7008_v23 = vpack.c.bf16 %v2796_v32, %v2795_v63 }
 0x6a9   :  { %v6038_v9 = vpop.eup %6037 }
 0x6aa   :  { %v2562_v50 = vmul.f32 %v6038_v9, %v6036_v8  ;;  %v2797_v8 = vld [vmem:[#allocation7 + $0x190] sm:$0xff] }
 0x6ab   :  { %v6040_v43 = vpop.eup %6039  ;;  %v2798_v9 = vld [vmem:[#allocation7 + $0x1b0] sm:$0xff] }
 0x6ac   :  { %v6958_v10 = vadd.f32 %v2562_v50, %v2561_v25  ;;  %v2558_v49 = vadd.f32 1.0, %v6040_v43  ;;  %v2893_v25 = vld [vmem:[#allocation7 + $0x198] sm:$0xff]  ;;  %v7016_v43 = vpack.c.bf16 %v2798_v9, %v2797_v8 }
 0x6ad   :  { %v2894_v50 = vld [vmem:[#allocation7 + $0x1b8] sm:$0xff] }
 0x6ae   :  { %6041 = vtanh.f32 %v6958_v10 }
 0x6af   :  { %6043 = vrcp.f32 %v2558_v49  ;;  %v7018_v49 = vpack.c.bf16 %v2894_v50, %v2893_v25 }
 0x6b8   :  { %v6042_v62 = vpop.eup %6041 }
 0x6b9   :  { %v6044_v5 = vpop.eup %6043 }
 0x6ba   :  { %v6965_v56 = vmul.f32 %v6044_v5, %v6042_v62  ;;  %v7024_v62 = vpack.c.bf16 %v2800_v44, %v2799_v26  ;;  %v7026_v5 = vpack.c.bf16 %v2896_v41, %v2895_v27 }
 0x6bc   :  { %2569 = vst [vmem:[#allocation9 + $0x28] sm:$0xff] %v6965_v56  ;;  %4923 = vmatmul.mubr.f32.vlgmr.msra.gmra.mrb[24].mxu0 %v6965_v56  ;;  %4958 = vmatmul.mubr.f32.vlgmr.msra.gmra.mrb[24].mxu1 %v6965_v56 }
 0x6bd   :  { %5796 = vmatpush3.bf16.msra.mxu0 %v6961_v24  ;;  %5820 = vmatpush3.bf16.msra.mxu1 %v6963_v30 }
 0x6be   :  { %5797 = vmatprep.subr.bf16.mxu0 %v6177_v0  ;;  %5821 = vmatprep.subr.bf16.mxu1 %v6177_v0 }
 0x6bf   :  { %4992 = vmatprep.mubr.msk.f32.mxu0 %vm6178_vm0, %v6179_v1  ;;  %5027 = vmatprep.mubr.msk.f32.mxu1 %vm6178_vm0, %v6179_v1 }
 0x6c1   :  { %5799 = vmatpush3.bf16.msra.mxu0 %v6972_v58  ;;  %5823 = vmatpush3.bf16.msra.mxu1 %v6974_v39 }
 0x6c2   :  { %5800 = vmatprep.subr.bf16.mxu0 %v6177_v0  ;;  %5824 = vmatprep.subr.bf16.mxu1 %v6177_v0 }
 0x6c5   :  { %5802 = vmatpush3.bf16.msra.mxu0 %v6984_v4  ;;  %5826 = vmatpush3.bf16.msra.mxu1 %v6986_v34 }
 0x6c6   :  { %5803 = vmatprep.subr.bf16.mxu0 %v6177_v0  ;;  %5827 = vmatprep.subr.bf16.mxu1 %v6177_v0 }
 0x6c9   :  { %5805 = vmatpush3.bf16.msra.mxu0 %v6992_v22  ;;  %5829 = vmatpush3.bf16.msra.mxu1 %v6994_v3 }
 0x6ca   :  { %5806 = vmatprep.subr.bf16.mxu0 %v6177_v0  ;;  %5830 = vmatprep.subr.bf16.mxu1 %v6177_v0 }
 0x6cd   :  { %5808 = vmatpush3.bf16.msra.mxu0 %v7000_v60  ;;  %5832 = vmatpush3.bf16.msra.mxu1 %v7002_v46 }
 0x6ce   :  { %5809 = vmatprep.subr.bf16.mxu0 %v6177_v0  ;;  %5833 = vmatprep.subr.bf16.mxu1 %v6177_v0 }
 0x6d1   :  { %5811 = vmatpush3.bf16.msra.mxu0 %v7008_v23  ;;  %5835 = vmatpush3.bf16.msra.mxu1 %v7010_v51 }
 0x6d2   :  { %5812 = vmatprep.subr.bf16.mxu0 %v6177_v0  ;;  %5836 = vmatprep.subr.bf16.mxu1 %v6177_v0 }
 0x6d5   :  { %5814 = vmatpush3.bf16.msra.mxu0 %v7016_v43  ;;  %5838 = vmatpush3.bf16.msra.mxu1 %v7018_v49 }
 0x6d6   :  { %5815 = vmatprep.subr.bf16.mxu0 %v6177_v0  ;;  %5839 = vmatprep.subr.bf16.mxu1 %v6177_v0 }
 0x6d9   :  { %5817 = vmatpush3.bf16.msra.mxu0 %v7024_v62  ;;  %5841 = vmatpush3.bf16.msra.mxu1 %v7026_v5 }
 0x6da   :  { %5842 = vmatprep.subr.bf16.mxu0 %v6177_v0  ;;  %5866 = vmatprep.subr.bf16.mxu1 %v6177_v0 }
 0x6dc   :  { %4993 = vmatmul.mubr.f32.vlgmr.msra.gmra.mrb[26].mxu0 %v6965_v56  ;;  %5028 = vmatmul.mubr.f32.vlgmr.msra.gmra.mrb[26].mxu1 %v6965_v56  ;;  %v2582_v56 = vld [vmem:[#allocation4 + $0xd8] sm:$0xff] }
 0x6dd   :  { %5844 = vmatpush3.bf16.msra.mxu0 %v6889_v53  ;;  %5868 = vmatpush3.bf16.msra.mxu1 %v6891_v54  ;;  %v2974_v59 = vadd.f32 %v7092_v42, %v2582_v56 }
 0x6de   :  { %5845 = vmatprep.subr.bf16.mxu0 %v6177_v0  ;;  %5869 = vmatprep.subr.bf16.mxu1 %v6177_v0 }
 0x6df   :  { %5062 = vmatprep.mubr.msk.f32.mxu0 %vm6178_vm0, %v6179_v1  ;;  %5097 = vmatprep.mubr.msk.f32.mxu1 %vm6178_vm0, %v6179_v1 }
 0x6e1   :  { %5847 = vmatpush3.bf16.msra.mxu0 %v6897_v57  ;;  %5871 = vmatpush3.bf16.msra.mxu1 %v6899_v18  ;;  %v2580_v57 = vld [vmem:[#allocation4 + $0xc8] sm:$0xff]  ;;  %v7075_v18 = vld [vmem:[%s7165_s2 + $0x1] ss:$0 sm:$0xff] }
 0x6e2   :  { %5848 = vmatprep.subr.bf16.mxu0 %v6177_v0  ;;  %5872 = vmatprep.subr.bf16.mxu1 %v6177_v0 }
 0x6e5   :  { %5850 = vmatpush3.bf16.msra.mxu0 %v6905_v28  ;;  %5874 = vmatpush3.bf16.msra.mxu1 %v6907_v14 }
 0x6e6   :  { %5851 = vmatprep.subr.bf16.mxu0 %v6177_v0  ;;  %5875 = vmatprep.subr.bf16.mxu1 %v6177_v0 }
 0x6e9   :  { %5853 = vmatpush3.bf16.msra.mxu0 %v6913_v6  ;;  %5877 = vmatpush3.bf16.msra.mxu1 %v6915_v33  ;;  %v2579_v6 = vld [vmem:[#allocation4 + $0xc0] sm:$0xff] }
 0x6ea   :  { %5854 = vmatprep.subr.bf16.mxu0 %v6177_v0  ;;  %5878 = vmatprep.subr.bf16.mxu1 %v6177_v0  ;;  %v7080_v33 = vld [vmem:[%s7165_s2] ss:$0 sm:$0xff]  ;;  %s6180_s2 = smov [#allocation10]  }
 0x6eb   :  { %s3436_s11 = sshll.u32 %s6180_s2, 4  ;;  %s3437_s11 = int_to_ptr.vmem [resolvable:$true] %s3436_s11 }
 0x6ec   :  { %s6121_s12 = scalar_lea.vmem %s3437_s11, 128  ;;  %p6126_p3 = scmp.lt.s32.totalorder %s3437_s11, %s3437_s11 }
 0x6ed   :  { %5856 = vmatpush3.bf16.msra.mxu0 %v6921_v13  ;;  %5880 = vmatpush3.bf16.msra.mxu1 %v6923_v31  ;;  %v2777_v13 = vadd.f32 %v7075_v18, %v2580_v57  ;;  %v2676_v31 = vadd.f32 %v7080_v33, %v2579_v6  ;;  %p6122_p2 = scmp.ne.s32.totalorder %s3437_s11, %s6121_s12  ;;  %p6127_p4 = scmp.lt.s32.totalorder %s6121_s12, %s6121_s12 }
 0x6ee   :  { %5857 = vmatprep.subr.bf16.mxu0 %v6177_v0  ;;  %5881 = vmatprep.subr.bf16.mxu1 %v6177_v0 }
 0x6ef   :  { %p6128_p5 = por %p6127_p4, %p6126_p3 }
 0x6f1   :  { %5859 = vmatpush3.bf16.msra.mxu0 %v6929_v29  ;;  %5883 = vmatpush3.bf16.msra.mxu1 %v6931_v45  ;;  %p6129_p6 = pnand %p6128_p5, %p6122_p2 }
 0x6f2   :  { %5860 = vmatprep.subr.bf16.mxu0 %v6177_v0  ;;  %5884 = vmatprep.subr.bf16.mxu1 %v6177_v0 }
 0x6f5   :  { %5862 = vmatpush3.bf16.msra.mxu0 %v6934_v11  ;;  %5886 = vmatpush3.bf16.msra.mxu1 %v6938_v19 }
 0x6f6   :  { %5863 = vmatprep.subr.bf16.mxu0 %v6177_v0  ;;  %5887 = vmatprep.subr.bf16.mxu1 %v6177_v0 }
 0x6f9   :  { %5865 = vmatpush3.bf16.msra.mxu0 %v6942_v48  ;;  %5889 = vmatpush3.bf16.msra.mxu1 %v6946_v16  ;;  %v2581_v48 = vld [vmem:[#allocation4 + $0xd0] sm:$0xff] }
 0x6fa   :  { %5890 = vmatprep.subr.bf16.mxu0 %v6177_v0  ;;  %5914 = vmatprep.subr.bf16.mxu1 %v6177_v0  ;;  %v2878_v47 = vadd.f32 %v7087_v20, %v2581_v48 }
 0x78f   :  { %v2665_v53 = vpop.f32.mrb[24].mxu0  ;;  %v2766_v54 = vpop.f32.mrb[24].mxu1 }
 0x790   :  { %v4924_v28 = vpop.f32.mrb[25].mxu0  ;;  %v4959_v14 = vpop.f32.mrb[25].mxu1  ;;  %v2778_v29 = vadd.f32 %v2777_v13, %v2766_v54  ;;  %v2677_v45 = vadd.f32 %v2676_v31, %v2665_v53 }
 0x792   :  { %v3495_v11 = vmul.f32 -1.442695, %v2778_v29  ;;  %v3493_v19 = vmul.f32 -1.442695, %v2677_v45 }
 0x794   :  { %6045 = vpow2.f32 %v3495_v11 }
 0x795   :  { %6047 = vpow2.f32 %v3493_v19 }
 0x79e   :  { %v6046_v16 = vpop.eup %6045 }
 0x79f   :  { %v6048_v17 = vpop.eup %6047  ;;  %v2782_v38 = vadd.f32 1.0, %v6046_v16 }
 0x7a0   :  { %v2681_v2 = vadd.f32 1.0, %v6048_v17 }
 0x7a1   :  { %6049 = vrcp.f32 %v2782_v38 }
 0x7a2   :  { %6051 = vrcp.f32 %v2681_v2 }
 0x7ab   :  { %v6050_v37 = vpop.eup %6049 }
 0x7ac   :  { %v6052_v21 = vpop.eup %6051  ;;  %v2982_v32 = vmul.f32 %v6050_v37, %v6958_v10 }
 0x7af   :  { %v2867_v55 = vpop.f32.mrb[26].mxu0  ;;  %v2963_v35 = vpop.f32.mrb[26].mxu1 }
 0x7b0   :  { %v2879_v52 = vadd.f32 %v2878_v47, %v2867_v55  ;;  %v2975_v7 = vadd.f32 %v2974_v59, %v2963_v35  ;;  %v4994_v15 = vpop.f32.mrb[27].mxu0  ;;  %v5029_v12 = vpop.f32.mrb[27].mxu1 }
 0x7b2   :  { %6053 = vtanh.f32 %v2879_v52  ;;  %v3498_v36 = vmul.f32 -1.442695, %v2975_v7 }
 0x7b4   :  { %6055 = vpow2.f32 %v3498_v36 }
 0x7bc   :  { %v6054_v63 = vpop.eup %6053 }
 0x7bd   :  { %v2983_v40 = vmul.f32 %v6054_v63, %v6052_v21 }
 0x7be   :  { %v6056_v61 = vpop.eup %6055 }
 0x7bf   :  { %v7097_v8 = vadd.f32 %v2983_v40, %v2982_v32  ;;  %v2979_v9 = vadd.f32 1.0, %v6056_v61 }
 0x7c1   :  { %6057 = vtanh.f32 %v7097_v8 }
 0x7c2   :  { %6059 = vrcp.f32 %v2979_v9 }
 0x7cb   :  { %v6058_v25 = vpop.eup %6057 }
 0x7cc   :  { %v6060_v50 = vpop.eup %6059 }
 0x7cd   :  { %v2986_v26 = vmul.f32 %v6060_v50, %v6058_v25 }
 0x7cf   :  { %2990 = vst [vmem:[#allocation9 + $0x30] sm:$0xff] %v2986_v26  ;;  %5063 = vmatmul.mubr.f32.vlgmr.msra.gmra.mrb[28].mxu0 %v2986_v26  ;;  %5098 = vmatmul.mubr.f32.vlgmr.msra.gmra.mrb[28].mxu1 %v2986_v26 }
 0x7d0   :  { %5892 = vmatpush3.bf16.msra.mxu0 %v6961_v24  ;;  %5916 = vmatpush3.bf16.msra.mxu1 %v6963_v30  ;;  %v3001_v24 = vld [vmem:[#allocation4 + $0xe8] sm:$0xff] }
 0x7d1   :  { %5893 = vmatprep.subr.bf16.mxu0 %v6177_v0  ;;  %5917 = vmatprep.subr.bf16.mxu1 %v6177_v0 }
 0x7d2   :  { %5132 = vmatprep.mubr.msk.f32.mxu0 %vm6178_vm0, %v6179_v1  ;;  %5167 = vmatprep.mubr.msk.f32.mxu1 %vm6178_vm0, %v6179_v1 }
 0x7d4   :  { %5895 = vmatpush3.bf16.msra.mxu0 %v6972_v58  ;;  %5919 = vmatpush3.bf16.msra.mxu1 %v6974_v39  ;;  %v3000_v39 = vld [vmem:[#allocation4 + $0xe0] sm:$0xff] }
 0x7d5   :  { %5896 = vmatprep.subr.bf16.mxu0 %v6177_v0  ;;  %5920 = vmatprep.subr.bf16.mxu1 %v6177_v0 }
 0x7d8   :  { %5898 = vmatpush3.bf16.msra.mxu0 %v6984_v4  ;;  %5922 = vmatpush3.bf16.msra.mxu1 %v6986_v34  ;;  %v3198_v4 = vadd.f32 %v7075_v18, %v3001_v24  ;;  %v3097_v34 = vadd.f32 %v7080_v33, %v3000_v39 }
 0x7d9   :  { %5899 = vmatprep.subr.bf16.mxu0 %v6177_v0  ;;  %5923 = vmatprep.subr.bf16.mxu1 %v6177_v0 }
 0x7dc   :  { %5901 = vmatpush3.bf16.msra.mxu0 %v6992_v22  ;;  %5925 = vmatpush3.bf16.msra.mxu1 %v6994_v3 }
 0x7dd   :  { %5902 = vmatprep.subr.bf16.mxu0 %v6177_v0  ;;  %5926 = vmatprep.subr.bf16.mxu1 %v6177_v0 }
 0x7e0   :  { %5904 = vmatpush3.bf16.msra.mxu0 %v7000_v60  ;;  %5928 = vmatpush3.bf16.msra.mxu1 %v7002_v46 }
 0x7e1   :  { %5905 = vmatprep.subr.bf16.mxu0 %v6177_v0  ;;  %5929 = vmatprep.subr.bf16.mxu1 %v6177_v0 }
 0x7e4   :  { %5907 = vmatpush3.bf16.msra.mxu0 %v7008_v23  ;;  %5931 = vmatpush3.bf16.msra.mxu1 %v7010_v51  ;;  %v3002_v23 = vld [vmem:[#allocation4 + $0xf0] sm:$0xff]  ;;  %v3003_v51 = vld [vmem:[#allocation4 + $0xf8] sm:$0xff] }
 0x7e5   :  { %5908 = vmatprep.subr.bf16.mxu0 %v6177_v0  ;;  %5932 = vmatprep.subr.bf16.mxu1 %v6177_v0  ;;  %v3299_v44 = vadd.f32 %v7087_v20, %v3002_v23  ;;  %v3395_v27 = vadd.f32 %v7092_v42, %v3003_v51 }
 0x7e8   :  { %5910 = vmatpush3.bf16.msra.mxu0 %v7016_v43  ;;  %5934 = vmatpush3.bf16.msra.mxu1 %v7018_v49 }
 0x7e9   :  { %5911 = vmatprep.subr.bf16.mxu0 %v6177_v0  ;;  %5935 = vmatprep.subr.bf16.mxu1 %v6177_v0 }
 0x7ec   :  { %5913 = vmatpush3.bf16.msra.mxu0 %v7024_v62  ;;  %5937 = vmatpush3.bf16.msra.mxu1 %v7026_v5 }
 0x7ef   :  { %5133 = vmatmul.mubr.f32.vlgmr.msra.gmra.mrb[30].mxu0 %v2986_v26  ;;  %5168 = vmatmul.mubr.f32.vlgmr.msra.gmra.mrb[30].mxu1 %v2986_v26 }
 0x8a2   :  { %v3086_v1 = vpop.f32.mrb[28].mxu0  ;;  %v3187_v10 = vpop.f32.mrb[28].mxu1 }
 0x8a3   :  { %v5064_v30 = vpop.f32.mrb[29].mxu0  ;;  %v5099_v58 = vpop.f32.mrb[29].mxu1  ;;  %v3199_v22 = vadd.f32 %v3198_v4, %v3187_v10  ;;  %v3098_v3 = vadd.f32 %v3097_v34, %v3086_v1 }
 0x8a5   :  { %v3502_v60 = vmul.f32 -1.442695, %v3199_v22  ;;  %v3500_v0 = vmul.f32 -1.442695, %v3098_v3 }
 0x8a7   :  { %6061 = vpow2.f32 %v3502_v60 }
 0x8a8   :  { %6063 = vpow2.f32 %v3500_v0 }
 0x8b1   :  { %v6062_v46 = vpop.eup %6061 }
 0x8b2   :  { %v6064_v43 = vpop.eup %6063  ;;  %v3203_v49 = vadd.f32 1.0, %v6062_v46 }
 0x8b3   :  { %v3102_v41 = vadd.f32 1.0, %v6064_v43 }
 0x8b4   :  { %6065 = vrcp.f32 %v3203_v49 }
 0x8b5   :  { %6067 = vrcp.f32 %v3102_v41 }
 0x8be   :  { %v6066_v14 = vpop.eup %6065 }
 0x8bf   :  { %v6068_v6 = vpop.eup %6067  ;;  %v3403_v13 = vmul.f32 %v6066_v14, %v7097_v8 }
 0x8c2   :  { %v3288_v62 = vpop.f32.mrb[30].mxu0  ;;  %v3384_v5 = vpop.f32.mrb[30].mxu1 }
 0x8c3   :  { %v3300_v53 = vadd.f32 %v3299_v44, %v3288_v62  ;;  %v3396_v54 = vadd.f32 %v3395_v27, %v3384_v5  ;;  %v5134_v57 = vpop.f32.mrb[31].mxu0  ;;  %v5169_v18 = vpop.f32.mrb[31].mxu1 }
 0x8c5   :  { %6069 = vtanh.f32 %v3300_v53  ;;  %v3505_v28 = vmul.f32 -1.442695, %v3396_v54 }
 0x8c7   :  { %6071 = vpow2.f32 %v3505_v28 }
 0x8cf   :  { %v6070_v33 = vpop.eup %6069 }
 0x8d0   :  { %v3404_v31 = vmul.f32 %v6070_v33, %v6068_v6 }
 0x8d1   :  { %v6072_v29 = vpop.eup %6071 }
 0x8d2   :  { %v3405_v45 = vadd.f32 %v3404_v31, %v3403_v13  ;;  %v3400_v11 = vadd.f32 1.0, %v6072_v29 }
 0x8d4   :  { %6073 = vtanh.f32 %v3405_v45  ;;  %3417 = vst [vmem:[#allocation10] sm:$0xff] %v3405_v45 }
 0x8d5   :  { %6075 = vrcp.f32 %v3400_v11 }
 0x8d6   :  { %6132 = shalt.err (!%p6129_p6)
}
 0x8d7   :  { %s6133_s1 = scalar_lea.hbm %s7167_s4, 128 }
 0x8d8   :  { %p6134_p7 = scmp.ne.s32.totalorder %s7167_s4, %s6133_s1  ;;  %p6137_p8 = scmp.lt.u32.totalorder %s6133_s1, %s7167_s4 }
 0x8da   :  { %p6139_p9 = pnand %p6137_p8, %p6134_p7 }
 0x8dc   :  { %6142 = shalt.err (!%p6139_p9)
}
 0x8dd   :  { %3439 = dma.vmem_to_hbm [thread:$0]  %s3437_s11, 128, %s7167_s4, [#allocation11]  }
 0x8de   :  { %s6181_s20 = smov [#allocation9]   ;;  %v6074_v19 = vpop.eup %6073 }
 0x8df   :  { %s3423_s21 = sshll.u32 %s6181_s20, 4  ;;  %v6076_v48 = vpop.eup %6075  ;;  %s3424_s21 = int_to_ptr.vmem [resolvable:$true] %s3423_s21 }
 0x8e0   :  { %v3407_v16 = vmul.f32 %v6076_v48, %v6074_v19  ;;  %s6143_s22 = scalar_lea.vmem %s3424_s21, 1024  ;;  %p6148_p11 = scmp.lt.s32.totalorder %s3424_s21, %s3424_s21 }
 0x8e1   :  { %p6144_p10 = scmp.ne.s32.totalorder %s3424_s21, %s6143_s22  ;;  %p6149_p12 = scmp.lt.s32.totalorder %s6143_s22, %s6143_s22 }
 0x8e2   :  { %3411 = vst [vmem:[#allocation9 + $0x38] sm:$0xff] %v3407_v16 }
 0x8e3   :  { %p6150_p13 = por %p6149_p12, %p6148_p11 }
 0x8e5   :  { %p6151_p0 = pnand %p6150_p13, %p6144_p10 }
 0x8e7   :  { %6154 = shalt.err (!%p6151_p0)
}
 0x8e8   :  { %s6155_s25 = scalar_lea.hbm %s7166_s3, 1024 }
 0x8e9   :  { %p6156_p1 = scmp.ne.s32.totalorder %s7166_s3, %s6155_s25  ;;  %p6159_p2 = scmp.lt.u32.totalorder %s6155_s25, %s7166_s3 }
 0x8eb   :  { %p6161_p3 = pnand %p6159_p2, %p6156_p1 }
 0x8ed   :  { %6164 = shalt.err (!%p6161_p3)
}
 0x8ee   :  { %s6182_s29 = smov 128   ;;  %s6183_s30 = smov 8  }
 0x8ef   :  { %3429 = dma.vmem_to_hbm [thread:$0]  %s3424_s21, 1024, %s7166_s3, [#allocation6], %s6182_s29, %s6182_s29, %s6183_s30  }
 0x8f0   :  { %6169 = dma.done.wait [#allocation6], 1024  }
 0x8f1   :  { %6170 = vsyncadd [#allocation6], 4294966272 }
 0x8f2   :  { %6171 = dma.done.wait [#allocation11], 128  }
 0x8f3   :  { %6172 = vsyncadd [#allocation11], 4294967168 }
 0x8f4   :  { %3446 = vsyncpa [#allocation5], 1 }
 0x8f5   :  { %3447 = vsyncpa [#allocation8], 1 }
 0x8f6   :  { %3448 = vsyncpa [#allocation6], 1 }
 0x8f7   :  { %3449 = vsyncpa [#allocation11], 1 }

</bundles_post_ra>
